<compile_context>
chip_gen: v6e
topology: v6e:2x2x1
jax: 0.10.0
libtpu: 0.0.40
codegen_flags: <defaults>
</compile_context>

<pallas_src>
import jax
import jax.numpy as jnp
from jax.experimental import pallas as pl
from jax.experimental.pallas import tpu as pltpu

# Logical (PyTorch) dims
H1, H2, H3, FEAT = 500, 500, 2000, 10
# Hardware-padded dims (lane axis must be a multiple of 128)
LANE = 128
H1P, H2P, H3P, FEATP = 512, 512, 2048, 128


def _round_up(n, m):
    return (n + m - 1) // m * m


def _pad_to(a, shape, dtype):
    out = jnp.zeros(shape, dtype)
    return out.at[tuple(slice(0, s) for s in a.shape)].set(a.astype(dtype))


def dec_kernel(x_ref,
               w1_ref, b1_ref,
               w2_ref, b2_ref,
               w3_ref, b3_ref,
               w4_ref, b4_ref,
               wc_ref, bc_ref,
               logits_ref, feat_ref):
    # Activations cast to bf16 for the MXU; all accumulation in f32.
    h = x_ref[...].astype(jnp.bfloat16)

    # encoder
    h = jnp.dot(h, w1_ref[...], preferred_element_type=jnp.float32) + b1_ref[...]
    h = jnp.maximum(h, 0.0).astype(jnp.bfloat16)
    h = jnp.dot(h, w2_ref[...], preferred_element_type=jnp.float32) + b2_ref[...]
    h = jnp.maximum(h, 0.0).astype(jnp.bfloat16)
    h = jnp.dot(h, w3_ref[...], preferred_element_type=jnp.float32) + b3_ref[...]
    h = jnp.maximum(h, 0.0).astype(jnp.bfloat16)
    feats = jnp.dot(h, w4_ref[...], preferred_element_type=jnp.float32) + b4_ref[...]

    # cluster layer (padded feature cols are 0 and padded wc rows are 0 -> exact)
    logits = jnp.dot(feats.astype(jnp.bfloat16), wc_ref[...],
                     preferred_element_type=jnp.float32) + bc_ref[...]

    feat_ref[...] = feats
    logits_ref[...] = logits


@jax.jit
def dec_forward(x, params):
    """x: [B, n_features] f32.  Returns (logits [B, n_clusters], features [B, 10])."""
    (w1, b1, w2, b2, w3, b3, w4, b4, wc, bc) = params
    B, F = x.shape
    nc = wc.shape[1]

    FP = _round_up(F, LANE)
    NCP = _round_up(nc, LANE)

    # Big batch tiles for MXU row utilization; small batches keep one 8-aligned tile.
    TILE_B = 256 if B >= 256 else _round_up(B, 8)
    B_pad = _round_up(B, TILE_B)
    grid = (B_pad // TILE_B,)

    wdt = jnp.bfloat16  # weight storage dtype (halves HBM traffic)
    xp = _pad_to(x, (B_pad, FP), jnp.float32)
    w1p = _pad_to(w1, (FP, H1P), wdt);   b1p = _pad_to(b1, (1, H1P), jnp.float32)
    w2p = _pad_to(w2, (H1P, H2P), wdt);  b2p = _pad_to(b2, (1, H2P), jnp.float32)
    w3p = _pad_to(w3, (H2P, H3P), wdt);  b3p = _pad_to(b3, (1, H3P), jnp.float32)
    w4p = _pad_to(w4, (H3P, FEATP), wdt); b4p = _pad_to(b4, (1, FEATP), jnp.float32)
    wcp = _pad_to(wc, (FEATP, NCP), wdt); bcp = _pad_to(bc, (1, NCP), jnp.float32)

    weight_ops = (w1p, b1p, w2p, b2p, w3p, b3p, w4p, b4p, wcp, bcp)

    # Weights/biases: full-array blocks whose block index never changes across
    # the grid -> DMA'd once, VMEM-resident for all batch tiles.
    def resident_spec(a):
        return pl.BlockSpec(a.shape, lambda i: (0,) * a.ndim)

    in_specs = [pl.BlockSpec((TILE_B, FP), lambda i: (i, 0))] + \
               [resident_spec(a) for a in weight_ops]

    out_shapes = (
        jax.ShapeDtypeStruct((B_pad, NCP), jnp.float32),    # padded logits
        jax.ShapeDtypeStruct((B_pad, FEATP), jnp.float32),  # padded features
    )
    out_specs = (
        pl.BlockSpec((TILE_B, NCP), lambda i: (i, 0)),
        pl.BlockSpec((TILE_B, FEATP), lambda i: (i, 0)),
    )

    flops = 2 * B_pad * (FP * H1P + H1P * H2P + H2P * H3P + H3P * FEATP + FEATP * NCP)
    bytes_accessed = (xp.size * 4
                      + sum(int(a.size) * a.dtype.itemsize for a in weight_ops)
                      + B_pad * (NCP + FEATP) * 4)

    logits_p, feats_p = pl.pallas_call(
        dec_kernel,
        out_shape=out_shapes,
        grid=grid,
        in_specs=in_specs,
        out_specs=out_specs,
        compiler_params=pltpu.CompilerParams(
            dimension_semantics=("parallel",),   # shards batch tiles across v7x TCs
            vmem_limit_bytes=32 << 20,
        ),
        cost_estimate=pl.CostEstimate(
            flops=flops, transcendentals=0, bytes_accessed=bytes_accessed),
    )(xp, *weight_ops)

    # Strip padding in the wrapper.
    return logits_p[:B, :nc], feats_p[:B, :FEAT]


def init_params(key, n_features, n_clusters):
    """Deterministic synthetic parameters; weights stored as [in, out], f32."""
    dims = [(n_features, H1), (H1, H2), (H2, H3), (H3, FEAT), (FEAT, n_clusters)]
    params = []
    for i, (din, dout) in enumerate(dims):
        kw, kb = jax.random.split(jax.random.fold_in(key, i))
        w = jax.random.normal(kw, (din, dout), jnp.float32) * 0.02
        b = jax.random.normal(kb, (1, dout), jnp.float32) * 0.01
        params.extend([w, b])
    return tuple(params)


def dec_reference(x, params):
    (w1, b1, w2, b2, w3, b3, w4, b4, wc, bc) = params
    h = jnp.maximum(x @ w1 + b1, 0.0)
    h = jnp.maximum(h @ w2 + b2, 0.0)
    h = jnp.maximum(h @ w3 + b3, 0.0)
    feats = h @ w4 + b4
    logits = feats @ wc + bc
    return logits, feats


if __name__ == "__main__":
    key = jax.random.PRNGKey(0)
    batch, n_features, n_clusters = 8, 32, 4

    kx, kp = jax.random.split(key)
    x = jax.random.normal(kx, (batch, n_features), jnp.float32)
    params = init_params(kp, n_features, n_clusters)

    logits, feats = dec_forward(x, params)
    jax.block_until_ready((logits, feats))

    ref_logits, ref_feats = dec_reference(x, params)
    assert logits.shape == (batch, n_clusters)
    assert feats.shape == (batch, FEAT)
    # bf16 weight storage + bf16 activation casts -> slightly looser tolerance
    # than pure f32 (kernel accumulates in f32).
    assert jnp.allclose(logits, ref_logits, atol=5e-3, rtol=5e-2)
    assert jnp.allclose(feats, ref_feats, atol=5e-3, rtol=5e-2)

    print("KERNEL_OK")
</pallas_src>

<mosaic_0001>
module attributes {stable_mosaic.version = 11 : i64} {
  func.func @dec_kernel(%arg0: i32, %arg1: memref<8x128xf32, #tpu.memory_space<vmem>>, %arg2: memref<128x512xbf16, #tpu.memory_space<vmem>>, %arg3: memref<1x512xf32, #tpu.memory_space<vmem>>, %arg4: memref<512x512xbf16, #tpu.memory_space<vmem>>, %arg5: memref<1x512xf32, #tpu.memory_space<vmem>>, %arg6: memref<512x2048xbf16, #tpu.memory_space<vmem>>, %arg7: memref<1x2048xf32, #tpu.memory_space<vmem>>, %arg8: memref<2048x128xbf16, #tpu.memory_space<vmem>>, %arg9: memref<1x128xf32, #tpu.memory_space<vmem>>, %arg10: memref<128x128xbf16, #tpu.memory_space<vmem>>, %arg11: memref<1x128xf32, #tpu.memory_space<vmem>>, %arg12: memref<8x128xf32, #tpu.memory_space<vmem>>, %arg13: memref<8x128xf32, #tpu.memory_space<vmem>>) attributes {dimension_semantics = [#tpu.dimension_semantics<parallel>], iteration_bounds = array<i64: 1>, scalar_prefetch = 0 : i64, scratch_operands = 0 : i64, tpu.core_type = #tpu.core_type<tc>, window_params = [{transform_indices = @transform_0, window_bounds = array<i64: 8, 128>}, {pipeline_mode = #tpu.pipeline_mode<synchronous>, transform_indices = @transform_1, window_bounds = array<i64: 128, 512>}, {pipeline_mode = #tpu.pipeline_mode<synchronous>, transform_indices = @transform_2, window_bounds = array<i64: 1, 512>}, {pipeline_mode = #tpu.pipeline_mode<synchronous>, transform_indices = @transform_3, window_bounds = array<i64: 512, 512>}, {pipeline_mode = #tpu.pipeline_mode<synchronous>, transform_indices = @transform_4, window_bounds = array<i64: 1, 512>}, {pipeline_mode = #tpu.pipeline_mode<synchronous>, transform_indices = @transform_5, window_bounds = array<i64: 512, 2048>}, {pipeline_mode = #tpu.pipeline_mode<synchronous>, transform_indices = @transform_6, window_bounds = array<i64: 1, 2048>}, {pipeline_mode = #tpu.pipeline_mode<synchronous>, transform_indices = @transform_7, window_bounds = array<i64: 2048, 128>}, {pipeline_mode = #tpu.pipeline_mode<synchronous>, transform_indices = @transform_8, window_bounds = array<i64: 1, 128>}, {pipeline_mode = #tpu.pipeline_mode<synchronous>, transform_indices = @transform_9, window_bounds = array<i64: 128, 128>}, {pipeline_mode = #tpu.pipeline_mode<synchronous>, transform_indices = @transform_10, window_bounds = array<i64: 1, 128>}, {transform_indices = @transform_11, window_bounds = array<i64: 8, 128>}, {transform_indices = @transform_12, window_bounds = array<i64: 8, 128>}]} {
    %c0 = arith.constant 0 : index
    %c0_0 = arith.constant 0 : index
    %0 = vector.load %arg1[%c0, %c0_0] : memref<8x128xf32, #tpu.memory_space<vmem>>, vector<8x128xf32>
    %1 = arith.truncf %0 : vector<8x128xf32> to vector<8x128xbf16>
    %c0_1 = arith.constant 0 : index
    %c0_2 = arith.constant 0 : index
    %2 = vector.load %arg2[%c0_1, %c0_2] : memref<128x512xbf16, #tpu.memory_space<vmem>>, vector<128x512xbf16>
    %cst = arith.constant dense<0.000000e+00> : vector<8x512xf32>
    %3 = tpu.matmul %1, %2, %cst {dimension_numbers = #tpu.dot_dimension_numbers<[1], [0], [0], [1], [0, 0, 1, 1], [], []>} : vector<8x128xbf16>, vector<128x512xbf16>, vector<8x512xf32> -> vector<8x512xf32>
    %c0_3 = arith.constant 0 : index
    %c0_4 = arith.constant 0 : index
    %4 = vector.load %arg3[%c0_3, %c0_4] : memref<1x512xf32, #tpu.memory_space<vmem>>, vector<1x512xf32>
    %5 = vector.broadcast %4 : vector<1x512xf32> to vector<8x512xf32>
    %6 = arith.addf %3, %5 : vector<8x512xf32>
    %cst_5 = arith.constant 0.000000e+00 : f32
    %7 = vector.broadcast %cst_5 : f32 to vector<8x512xf32>
    %8 = arith.maximumf %6, %7 : vector<8x512xf32>
    %9 = arith.truncf %8 : vector<8x512xf32> to vector<8x512xbf16>
    %c0_6 = arith.constant 0 : index
    %c0_7 = arith.constant 0 : index
    %10 = vector.load %arg4[%c0_6, %c0_7] : memref<512x512xbf16, #tpu.memory_space<vmem>>, vector<512x512xbf16>
    %cst_8 = arith.constant dense<0.000000e+00> : vector<8x512xf32>
    %11 = tpu.matmul %9, %10, %cst_8 {dimension_numbers = #tpu.dot_dimension_numbers<[1], [0], [0], [1], [0, 0, 1, 1], [], []>} : vector<8x512xbf16>, vector<512x512xbf16>, vector<8x512xf32> -> vector<8x512xf32>
    %c0_9 = arith.constant 0 : index
    %c0_10 = arith.constant 0 : index
    %12 = vector.load %arg5[%c0_9, %c0_10] : memref<1x512xf32, #tpu.memory_space<vmem>>, vector<1x512xf32>
    %13 = vector.broadcast %12 : vector<1x512xf32> to vector<8x512xf32>
    %14 = arith.addf %11, %13 : vector<8x512xf32>
    %cst_11 = arith.constant 0.000000e+00 : f32
    %15 = vector.broadcast %cst_11 : f32 to vector<8x512xf32>
    %16 = arith.maximumf %14, %15 : vector<8x512xf32>
    %17 = arith.truncf %16 : vector<8x512xf32> to vector<8x512xbf16>
    %c0_12 = arith.constant 0 : index
    %c0_13 = arith.constant 0 : index
    %18 = vector.load %arg6[%c0_12, %c0_13] : memref<512x2048xbf16, #tpu.memory_space<vmem>>, vector<512x2048xbf16>
    %cst_14 = arith.constant dense<0.000000e+00> : vector<8x2048xf32>
    %19 = tpu.matmul %17, %18, %cst_14 {dimension_numbers = #tpu.dot_dimension_numbers<[1], [0], [0], [1], [0, 0, 1, 1], [], []>} : vector<8x512xbf16>, vector<512x2048xbf16>, vector<8x2048xf32> -> vector<8x2048xf32>
    %c0_15 = arith.constant 0 : index
    %c0_16 = arith.constant 0 : index
    %20 = vector.load %arg7[%c0_15, %c0_16] : memref<1x2048xf32, #tpu.memory_space<vmem>>, vector<1x2048xf32>
    %21 = vector.broadcast %20 : vector<1x2048xf32> to vector<8x2048xf32>
    %22 = arith.addf %19, %21 : vector<8x2048xf32>
    %cst_17 = arith.constant 0.000000e+00 : f32
    %23 = vector.broadcast %cst_17 : f32 to vector<8x2048xf32>
    %24 = arith.maximumf %22, %23 : vector<8x2048xf32>
    %25 = arith.truncf %24 : vector<8x2048xf32> to vector<8x2048xbf16>
    %c0_18 = arith.constant 0 : index
    %c0_19 = arith.constant 0 : index
    %26 = vector.load %arg8[%c0_18, %c0_19] : memref<2048x128xbf16, #tpu.memory_space<vmem>>, vector<2048x128xbf16>
    %cst_20 = arith.constant dense<0.000000e+00> : vector<8x128xf32>
    %27 = tpu.matmul %25, %26, %cst_20 {dimension_numbers = #tpu.dot_dimension_numbers<[1], [0], [0], [1], [0, 0, 1, 1], [], []>} : vector<8x2048xbf16>, vector<2048x128xbf16>, vector<8x128xf32> -> vector<8x128xf32>
    %c0_21 = arith.constant 0 : index
    %c0_22 = arith.constant 0 : index
    %28 = vector.load %arg9[%c0_21, %c0_22] : memref<1x128xf32, #tpu.memory_space<vmem>>, vector<1x128xf32>
    %29 = vector.broadcast %28 : vector<1x128xf32> to vector<8x128xf32>
    %30 = arith.addf %27, %29 : vector<8x128xf32>
    %31 = arith.truncf %30 : vector<8x128xf32> to vector<8x128xbf16>
    %c0_23 = arith.constant 0 : index
    %c0_24 = arith.constant 0 : index
    %32 = vector.load %arg10[%c0_23, %c0_24] : memref<128x128xbf16, #tpu.memory_space<vmem>>, vector<128x128xbf16>
    %cst_25 = arith.constant dense<0.000000e+00> : vector<8x128xf32>
    %33 = tpu.matmul %31, %32, %cst_25 {dimension_numbers = #tpu.dot_dimension_numbers<[1], [0], [0], [1], [0, 0, 1, 1], [], []>} : vector<8x128xbf16>, vector<128x128xbf16>, vector<8x128xf32> -> vector<8x128xf32>
    %c0_26 = arith.constant 0 : index
    %c0_27 = arith.constant 0 : index
    %34 = vector.load %arg11[%c0_26, %c0_27] : memref<1x128xf32, #tpu.memory_space<vmem>>, vector<1x128xf32>
    %35 = vector.broadcast %34 : vector<1x128xf32> to vector<8x128xf32>
    %36 = arith.addf %33, %35 : vector<8x128xf32>
    %c0_28 = arith.constant 0 : index
    %c0_29 = arith.constant 0 : index
    %37 = vector.load %arg13[%c0_28, %c0_29] : memref<8x128xf32, #tpu.memory_space<vmem>>, vector<8x128xf32>
    tpu.vector_store %arg13[%c0_28, %c0_29], %30 {strides = array<i32>} : memref<8x128xf32, #tpu.memory_space<vmem>>, vector<8x128xf32>,
    %c0_30 = arith.constant 0 : index
    %c0_31 = arith.constant 0 : index
    %38 = vector.load %arg12[%c0_30, %c0_31] : memref<8x128xf32, #tpu.memory_space<vmem>>, vector<8x128xf32>
    tpu.vector_store %arg12[%c0_30, %c0_31], %36 {strides = array<i32>} : memref<8x128xf32, #tpu.memory_space<vmem>>, vector<8x128xf32>,
    return
  }
  func.func @transform_0(%arg0: i32) -> (i32, i32) {
    %c0_i32 = arith.constant 0 : i32
    %c0_i32_0 = arith.constant 0 : i32
    return %arg0, %c0_i32 : i32, i32
  }
  func.func @transform_1(%arg0: i32) -> (i32, i32) {
    %c0_i32 = arith.constant 0 : i32
    %c0_i32_0 = arith.constant 0 : i32
    %c0_i32_1 = arith.constant 0 : i32
    return %c0_i32, %c0_i32_0 : i32, i32
  }
  func.func @transform_2(%arg0: i32) -> (i32, i32) {
    %c0_i32 = arith.constant 0 : i32
    %c0_i32_0 = arith.constant 0 : i32
    %c0_i32_1 = arith.constant 0 : i32
    return %c0_i32, %c0_i32_0 : i32, i32
  }
  func.func @transform_3(%arg0: i32) -> (i32, i32) {
    %c0_i32 = arith.constant 0 : i32
    %c0_i32_0 = arith.constant 0 : i32
    %c0_i32_1 = arith.constant 0 : i32
    return %c0_i32, %c0_i32_0 : i32, i32
  }
  func.func @transform_4(%arg0: i32) -> (i32, i32) {
    %c0_i32 = arith.constant 0 : i32
    %c0_i32_0 = arith.constant 0 : i32
    %c0_i32_1 = arith.constant 0 : i32
    return %c0_i32, %c0_i32_0 : i32, i32
  }
  func.func @transform_5(%arg0: i32) -> (i32, i32) {
    %c0_i32 = arith.constant 0 : i32
    %c0_i32_0 = arith.constant 0 : i32
    %c0_i32_1 = arith.constant 0 : i32
    return %c0_i32, %c0_i32_0 : i32, i32
  }
  func.func @transform_6(%arg0: i32) -> (i32, i32) {
    %c0_i32 = arith.constant 0 : i32
    %c0_i32_0 = arith.constant 0 : i32
    %c0_i32_1 = arith.constant 0 : i32
    return %c0_i32, %c0_i32_0 : i32, i32
  }
  func.func @transform_7(%arg0: i32) -> (i32, i32) {
    %c0_i32 = arith.constant 0 : i32
    %c0_i32_0 = arith.constant 0 : i32
    %c0_i32_1 = arith.constant 0 : i32
    return %c0_i32, %c0_i32_0 : i32, i32
  }
  func.func @transform_8(%arg0: i32) -> (i32, i32) {
    %c0_i32 = arith.constant 0 : i32
    %c0_i32_0 = arith.constant 0 : i32
    %c0_i32_1 = arith.constant 0 : i32
    return %c0_i32, %c0_i32_0 : i32, i32
  }
  func.func @transform_9(%arg0: i32) -> (i32, i32) {
    %c0_i32 = arith.constant 0 : i32
    %c0_i32_0 = arith.constant 0 : i32
    %c0_i32_1 = arith.constant 0 : i32
    return %c0_i32, %c0_i32_0 : i32, i32
  }
  func.func @transform_10(%arg0: i32) -> (i32, i32) {
    %c0_i32 = arith.constant 0 : i32
    %c0_i32_0 = arith.constant 0 : i32
    %c0_i32_1 = arith.constant 0 : i32
    return %c0_i32, %c0_i32_0 : i32, i32
  }
  func.func @transform_11(%arg0: i32) -> (i32, i32) {
    %c0_i32 = arith.constant 0 : i32
    %c0_i32_0 = arith.constant 0 : i32
    return %arg0, %c0_i32 : i32, i32
  }
  func.func @transform_12(%arg0: i32) -> (i32, i32) {
    %c0_i32 = arith.constant 0 : i32
    %c0_i32_0 = arith.constant 0 : i32
    return %arg0, %c0_i32 : i32, i32
  }
}

</mosaic_0001>

<bundles_post_ra>
// kernel: dec_forward.1
= control target key start
LH: loop header
LB: loop body
LE: loop exit
PB: predicated region body
PF: predicated region fallthrough
CT: control target
= control target key end

     0   :  { %v8055_v2 = vmov 0   ;;  %s10791_s0 = inlined_call_operand.vmem [shape: f32[8,128], index: 0, kind: input, shape index: {}]   ;;  %s10792_s1 = inlined_call_operand.vmem [shape: bf16[128,512], index: 1, kind: input, shape index: {}]   ;;  %s10793_s2 = inlined_call_operand.vmem [shape: f32[1,512], index: 2, kind: input, shape index: {}]   ;;  %s10794_s3 = inlined_call_operand.vmem [shape: bf16[512,512], index: 3, kind: input, shape index: {}]   ;;  %s10795_s4 = inlined_call_operand.vmem [shape: f32[1,512], index: 4, kind: input, shape index: {}]   ;;  %s10796_s5 = inlined_call_operand.vmem [shape: bf16[512,2048], index: 5, kind: input, shape index: {}]   ;;  %s10797_s6 = inlined_call_operand.vmem [shape: f32[1,2048], index: 6, kind: input, shape index: {}]   ;;  %s10798_s7 = inlined_call_operand.vmem [shape: bf16[2048,128], index: 7, kind: input, shape index: {}]   ;;  %s10799_s8 = inlined_call_operand.vmem [shape: f32[1,128], index: 8, kind: input, shape index: {}]   ;;  %s10800_s9 = inlined_call_operand.vmem [shape: bf16[128,128], index: 9, kind: input, shape index: {}]   ;;  %s10801_s10 = inlined_call_operand.vmem [shape: f32[1,128], index: 10, kind: input, shape index: {}]   ;;  %s10802_s11 = inlined_call_operand.vmem [shape: f32[8,128], index: 11, kind: output, shape index: {0}]   ;;  %s10803_s12 = inlined_call_operand.hbm [shape: f32[8,128], index: 12, kind: output, shape index: {1}]  }
   0x1   :  { %v7656_v0 = vld [vmem:[%s10792_s1 + $0xe4] ss:$16 sps:$4 sm:$0xff]   ;;  %v7658_v1 = vld [vmem:[%s10792_s1 + $0xec] ss:$16 sps:$4 sm:$0xff]   ;;  %290 = vmatprep.mubr.bf16.mxu0 %v8055_v2  ;;  %331 = vmatprep.mubr.bf16.mxu1 %v8055_v2  ;;  %v7660_v3 = vld [vmem:[%s10792_s1 + $0xe0] ss:$16 sps:$4 sm:$0xff]  }
   0x2   :  { %258 = vmatprep.subr.bf16.mxu0 %v7656_v0  ;;  %v7661_v4 = vld [vmem:[%s10792_s1 + $0xe8] ss:$16 sps:$4 sm:$0xff]   ;;  %299 = vmatprep.subr.bf16.mxu1 %v7658_v1  ;;  %v7662_v5 = vld [vmem:[%s10792_s1 + $0xc4] ss:$16 sps:$4 sm:$0xff]   ;;  %v7664_v6 = vld [vmem:[%s10792_s1 + $0xcc] ss:$16 sps:$4 sm:$0xff]  }
   0x3   :  { %259 = vmatpush1.bf16.msra.mxu0 %v7660_v3  ;;  %300 = vmatpush1.bf16.msra.mxu1 %v7661_v4  ;;  %v7666_v7 = vld [vmem:[%s10792_s1 + $0xc0] ss:$16 sps:$4 sm:$0xff]   ;;  %v7667_v8 = vld [vmem:[%s10792_s1 + $0xc8] ss:$16 sps:$4 sm:$0xff]   ;;  %v7668_v9 = vld [vmem:[%s10792_s1 + $0xa4] ss:$16 sps:$4 sm:$0xff]  }
   0x4   :  { %260 = vmatprep.subr.bf16.mxu0 %v7662_v5  ;;  %301 = vmatprep.subr.bf16.mxu1 %v7664_v6  ;;  %v7670_v10 = vld [vmem:[%s10792_s1 + $0xac] ss:$16 sps:$4 sm:$0xff]   ;;  %v7672_v11 = vld [vmem:[%s10792_s1 + $0xa0] ss:$16 sps:$4 sm:$0xff]   ;;  %v7673_v12 = vld [vmem:[%s10792_s1 + $0xa8] ss:$16 sps:$4 sm:$0xff]  }
   0x5   :  { %v7674_v13 = vld [vmem:[%s10792_s1 + $0x84] ss:$16 sps:$4 sm:$0xff]   ;;  %v7676_v14 = vld [vmem:[%s10792_s1 + $0x8c] ss:$16 sps:$4 sm:$0xff]   ;;  %v7678_v15 = vld [vmem:[%s10792_s1 + $0x80] ss:$16 sps:$4 sm:$0xff]  }
   0x6   :  { %v7679_v16 = vld [vmem:[%s10792_s1 + $0x88] ss:$16 sps:$4 sm:$0xff]   ;;  %v7680_v17 = vld [vmem:[%s10792_s1 + $0x64] ss:$16 sps:$4 sm:$0xff]   ;;  %v7682_v18 = vld [vmem:[%s10792_s1 + $0x6c] ss:$16 sps:$4 sm:$0xff]  }
   0x7   :  { %261 = vmatpush1.bf16.msra.mxu0 %v7666_v7  ;;  %302 = vmatpush1.bf16.msra.mxu1 %v7667_v8  ;;  %v7684_v19 = vld [vmem:[%s10792_s1 + $0x60] ss:$16 sps:$4 sm:$0xff]   ;;  %v7685_v20 = vld [vmem:[%s10792_s1 + $0x68] ss:$16 sps:$4 sm:$0xff]   ;;  %v7686_v21 = vld [vmem:[%s10792_s1 + $0x44] ss:$16 sps:$4 sm:$0xff]  }
   0x8   :  { %262 = vmatprep.subr.bf16.mxu0 %v7668_v9  ;;  %303 = vmatprep.subr.bf16.mxu1 %v7670_v10  ;;  %v7688_v22 = vld [vmem:[%s10792_s1 + $0x4c] ss:$16 sps:$4 sm:$0xff]   ;;  %v7690_v23 = vld [vmem:[%s10792_s1 + $0x40] ss:$16 sps:$4 sm:$0xff]   ;;  %v7691_v24 = vld [vmem:[%s10792_s1 + $0x48] ss:$16 sps:$4 sm:$0xff]  }
   0x9   :  { %v7692_v25 = vld [vmem:[%s10792_s1 + $0x24] ss:$16 sps:$4 sm:$0xff]   ;;  %v7694_v26 = vld [vmem:[%s10792_s1 + $0x2c] ss:$16 sps:$4 sm:$0xff]   ;;  %v7696_v27 = vld [vmem:[%s10792_s1 + $0x20] ss:$16 sps:$4 sm:$0xff]  }
   0xa   :  { %v7697_v28 = vld [vmem:[%s10792_s1 + $0x28] ss:$16 sps:$4 sm:$0xff]   ;;  %v7698_v29 = vld [vmem:[%s10792_s1 + $0x4] ss:$16 sps:$4 sm:$0xff]   ;;  %v7700_v30 = vld [vmem:[%s10792_s1 + $0xc] ss:$16 sps:$4 sm:$0xff]  }
   0xb   :  { %263 = vmatpush1.bf16.msra.mxu0 %v7672_v11  ;;  %304 = vmatpush1.bf16.msra.mxu1 %v7673_v12  ;;  %v7702_v31 = vld [vmem:[%s10792_s1] ss:$16 sps:$4 sm:$0xff]   ;;  %v7703_v32 = vld [vmem:[%s10792_s1 + $0x8] ss:$16 sps:$4 sm:$0xff]   ;;  %v7706_v34 = vld [vmem:[%s10794_s3 + $0xe4] ss:$16 sps:$4 sm:$0xff]  }
   0xc   :  { %264 = vmatprep.subr.bf16.mxu0 %v7674_v13  ;;  %305 = vmatprep.subr.bf16.mxu1 %v7676_v14  ;;  %v42_v33 = vld [vmem:[%s10791_s0] sm:$0xff] }
   0xd   :  { %v7709_v35 = vld [vmem:[%s10794_s3 + $0x2e4] ss:$16 sps:$4 sm:$0xff]   ;;  %v43_v36 = vpack.c.bf16 %v42_v33, %v42_v33  ;;  %v7704_v37 = vld [vmem:[%s10794_s3 + $0xe0] ss:$16 sps:$4 sm:$0xff]  }
   0xe   :  { %v7707_v38 = vld [vmem:[%s10794_s3 + $0x2e0] ss:$16 sps:$4 sm:$0xff]   ;;  %v7712_v39 = vld [vmem:[%s10794_s3 + $0xc4] ss:$16 sps:$4 sm:$0xff]  }
   0xf   :  { %265 = vmatpush1.bf16.msra.mxu0 %v7678_v15  ;;  %306 = vmatpush1.bf16.msra.mxu1 %v7679_v16  ;;  %v7715_v40 = vld [vmem:[%s10794_s3 + $0x2c4] ss:$16 sps:$4 sm:$0xff]   ;;  %v7710_v41 = vld [vmem:[%s10794_s3 + $0xc0] ss:$16 sps:$4 sm:$0xff]  }
  0x10   :  { %266 = vmatprep.subr.bf16.mxu0 %v7680_v17  ;;  %307 = vmatprep.subr.bf16.mxu1 %v7682_v18  ;;  %v7713_v42 = vld [vmem:[%s10794_s3 + $0x2c0] ss:$16 sps:$4 sm:$0xff]   ;;  %v7718_v43 = vld [vmem:[%s10794_s3 + $0xa4] ss:$16 sps:$4 sm:$0xff]  }
  0x11   :  { %v7721_v44 = vld [vmem:[%s10794_s3 + $0x2a4] ss:$16 sps:$4 sm:$0xff]   ;;  %v7716_v45 = vld [vmem:[%s10794_s3 + $0xa0] ss:$16 sps:$4 sm:$0xff]  }
  0x12   :  { %v7719_v46 = vld [vmem:[%s10794_s3 + $0x2a0] ss:$16 sps:$4 sm:$0xff]   ;;  %v7724_v47 = vld [vmem:[%s10794_s3 + $0x84] ss:$16 sps:$4 sm:$0xff]  }
  0x13   :  { %267 = vmatpush1.bf16.msra.mxu0 %v7684_v19  ;;  %308 = vmatpush1.bf16.msra.mxu1 %v7685_v20  ;;  %v7727_v48 = vld [vmem:[%s10794_s3 + $0x284] ss:$16 sps:$4 sm:$0xff]   ;;  %v7722_v49 = vld [vmem:[%s10794_s3 + $0x80] ss:$16 sps:$4 sm:$0xff]  }
  0x14   :  { %268 = vmatprep.subr.bf16.mxu0 %v7686_v21  ;;  %309 = vmatprep.subr.bf16.mxu1 %v7688_v22  ;;  %v7725_v50 = vld [vmem:[%s10794_s3 + $0x280] ss:$16 sps:$4 sm:$0xff]   ;;  %v7730_v51 = vld [vmem:[%s10794_s3 + $0x64] ss:$16 sps:$4 sm:$0xff]  }
  0x15   :  { %v7733_v52 = vld [vmem:[%s10794_s3 + $0x264] ss:$16 sps:$4 sm:$0xff]   ;;  %v7728_v53 = vld [vmem:[%s10794_s3 + $0x60] ss:$16 sps:$4 sm:$0xff]  }
  0x16   :  { %v7731_v54 = vld [vmem:[%s10794_s3 + $0x260] ss:$16 sps:$4 sm:$0xff]   ;;  %v7736_v55 = vld [vmem:[%s10794_s3 + $0x44] ss:$16 sps:$4 sm:$0xff]  }
  0x17   :  { %269 = vmatpush1.bf16.msra.mxu0 %v7690_v23  ;;  %310 = vmatpush1.bf16.msra.mxu1 %v7691_v24  ;;  %v7739_v56 = vld [vmem:[%s10794_s3 + $0x244] ss:$16 sps:$4 sm:$0xff]   ;;  %v7734_v57 = vld [vmem:[%s10794_s3 + $0x40] ss:$16 sps:$4 sm:$0xff]  }
  0x18   :  { %270 = vmatprep.subr.bf16.mxu0 %v7692_v25  ;;  %311 = vmatprep.subr.bf16.mxu1 %v7694_v26  ;;  %v7737_v58 = vld [vmem:[%s10794_s3 + $0x240] ss:$16 sps:$4 sm:$0xff]   ;;  %v7742_v59 = vld [vmem:[%s10794_s3 + $0x24] ss:$16 sps:$4 sm:$0xff]  }
  0x19   :  { %v7745_v60 = vld [vmem:[%s10794_s3 + $0x224] ss:$16 sps:$4 sm:$0xff]   ;;  %v7740_v61 = vld [vmem:[%s10794_s3 + $0x20] ss:$16 sps:$4 sm:$0xff]  }
  0x1a   :  { %v7743_v62 = vld [vmem:[%s10794_s3 + $0x220] ss:$16 sps:$4 sm:$0xff]   ;;  %v7748_v63 = vld [vmem:[%s10794_s3 + $0x4] ss:$16 sps:$4 sm:$0xff]  }
  0x1b   :  { %271 = vmatpush1.bf16.msra.mxu0 %v7696_v27  ;;  %312 = vmatpush1.bf16.msra.mxu1 %v7697_v28  ;;  %v7751_v0 = vld [vmem:[%s10794_s3 + $0x204] ss:$16 sps:$4 sm:$0xff]   ;;  %v7746_v1 = vld [vmem:[%s10794_s3] ss:$16 sps:$4 sm:$0xff]  }
  0x1c   :  { %272 = vmatprep.subr.bf16.mxu0 %v7698_v29  ;;  %313 = vmatprep.subr.bf16.mxu1 %v7700_v30  ;;  %v7749_v2 = vld [vmem:[%s10794_s3 + $0x200] ss:$16 sps:$4 sm:$0xff]   ;;  %v7754_v3 = vld [vmem:[%s10794_s3 + $0x1e4] ss:$16 sps:$4 sm:$0xff]  }
  0x1d   :  { %v7757_v4 = vld [vmem:[%s10794_s3 + $0x3e4] ss:$16 sps:$4 sm:$0xff]   ;;  %v7752_v5 = vld [vmem:[%s10794_s3 + $0x1e0] ss:$16 sps:$4 sm:$0xff]  }
  0x1e   :  { %v7755_v6 = vld [vmem:[%s10794_s3 + $0x3e0] ss:$16 sps:$4 sm:$0xff]   ;;  %v7760_v7 = vld [vmem:[%s10794_s3 + $0x1c4] ss:$16 sps:$4 sm:$0xff]  }
  0x1f   :  { %273 = vmatpush1.bf16.msra.mxu0 %v7702_v31  ;;  %314 = vmatpush1.bf16.msra.mxu1 %v7703_v32  ;;  %v7763_v8 = vld [vmem:[%s10794_s3 + $0x3c4] ss:$16 sps:$4 sm:$0xff]   ;;  %v7758_v9 = vld [vmem:[%s10794_s3 + $0x1c0] ss:$16 sps:$4 sm:$0xff]  }
  0x20   :  { %1138 = vmatprep.subr.bf16.mxu0 %v7706_v34  ;;  %1179 = vmatprep.subr.bf16.mxu1 %v7709_v35  ;;  %v7761_v10 = vld [vmem:[%s10794_s3 + $0x3c0] ss:$16 sps:$4 sm:$0xff]   ;;  %v7766_v11 = vld [vmem:[%s10794_s3 + $0x1a4] ss:$16 sps:$4 sm:$0xff]   ;;  %v7802_v35 = vld [vmem:[%s10794_s3 + $0xec] ss:$16 sps:$4 sm:$0xff]  }
  0x21   :  { %v7769_v12 = vld [vmem:[%s10794_s3 + $0x3a4] ss:$16 sps:$4 sm:$0xff]   ;;  %v7764_v13 = vld [vmem:[%s10794_s3 + $0x1a0] ss:$16 sps:$4 sm:$0xff]  }
  0x22   :  { %291 = vmatmul.mubr.bf16.vlgmr.msra.gmra.mxu0 %v43_v36  ;;  %332 = vmatmul.mubr.bf16.vlgmr.msra.gmra.mxu1 %v43_v36  ;;  %v7767_v14 = vld [vmem:[%s10794_s3 + $0x3a0] ss:$16 sps:$4 sm:$0xff]   ;;  %v7772_v15 = vld [vmem:[%s10794_s3 + $0x184] ss:$16 sps:$4 sm:$0xff]   ;;  %v7805_v36 = vld [vmem:[%s10794_s3 + $0x2ec] ss:$16 sps:$4 sm:$0xff]  }
  0x23   :  { %1139 = vmatpush1.bf16.msra.mxu0 %v7704_v37  ;;  %1180 = vmatpush1.bf16.msra.mxu1 %v7707_v38  ;;  %v7775_v16 = vld [vmem:[%s10794_s3 + $0x384] ss:$16 sps:$4 sm:$0xff]   ;;  %v7770_v17 = vld [vmem:[%s10794_s3 + $0x180] ss:$16 sps:$4 sm:$0xff]  }
  0x24   :  { %1140 = vmatprep.subr.bf16.mxu0 %v7712_v39  ;;  %1181 = vmatprep.subr.bf16.mxu1 %v7715_v40  ;;  %v7773_v18 = vld [vmem:[%s10794_s3 + $0x380] ss:$16 sps:$4 sm:$0xff]   ;;  %v7778_v19 = vld [vmem:[%s10794_s3 + $0x164] ss:$16 sps:$4 sm:$0xff]  }
  0x25   :  { %v7781_v20 = vld [vmem:[%s10794_s3 + $0x364] ss:$16 sps:$4 sm:$0xff]   ;;  %v7776_v21 = vld [vmem:[%s10794_s3 + $0x160] ss:$16 sps:$4 sm:$0xff]  }
  0x26   :  { %v7779_v22 = vld [vmem:[%s10794_s3 + $0x360] ss:$16 sps:$4 sm:$0xff]   ;;  %v7784_v23 = vld [vmem:[%s10794_s3 + $0x144] ss:$16 sps:$4 sm:$0xff]  }
  0x27   :  { %1141 = vmatpush1.bf16.msra.mxu0 %v7710_v41  ;;  %1182 = vmatpush1.bf16.msra.mxu1 %v7713_v42  ;;  %v7787_v24 = vld [vmem:[%s10794_s3 + $0x344] ss:$16 sps:$4 sm:$0xff]   ;;  %v7782_v25 = vld [vmem:[%s10794_s3 + $0x140] ss:$16 sps:$4 sm:$0xff]  }
  0x28   :  { %1142 = vmatprep.subr.bf16.mxu0 %v7718_v43  ;;  %1183 = vmatprep.subr.bf16.mxu1 %v7721_v44  ;;  %v7785_v26 = vld [vmem:[%s10794_s3 + $0x340] ss:$16 sps:$4 sm:$0xff]   ;;  %v7790_v27 = vld [vmem:[%s10794_s3 + $0x124] ss:$16 sps:$4 sm:$0xff]  }
  0x29   :  { %v7793_v28 = vld [vmem:[%s10794_s3 + $0x324] ss:$16 sps:$4 sm:$0xff]   ;;  %v7788_v29 = vld [vmem:[%s10794_s3 + $0x120] ss:$16 sps:$4 sm:$0xff]  }
  0x2a   :  { %v7791_v30 = vld [vmem:[%s10794_s3 + $0x320] ss:$16 sps:$4 sm:$0xff]   ;;  %v7796_v31 = vld [vmem:[%s10794_s3 + $0x104] ss:$16 sps:$4 sm:$0xff]  }
  0x2b   :  { %1143 = vmatpush1.bf16.msra.mxu0 %v7716_v45  ;;  %1184 = vmatpush1.bf16.msra.mxu1 %v7719_v46  ;;  %v7799_v32 = vld [vmem:[%s10794_s3 + $0x304] ss:$16 sps:$4 sm:$0xff]   ;;  %v7794_v33 = vld [vmem:[%s10794_s3 + $0x100] ss:$16 sps:$4 sm:$0xff]  }
  0x2c   :  { %1144 = vmatprep.subr.bf16.mxu0 %v7724_v47  ;;  %1185 = vmatprep.subr.bf16.mxu1 %v7727_v48  ;;  %v7797_v34 = vld [vmem:[%s10794_s3 + $0x300] ss:$16 sps:$4 sm:$0xff]  }
  0x2f   :  { %1145 = vmatpush1.bf16.msra.mxu0 %v7722_v49  ;;  %1186 = vmatpush1.bf16.msra.mxu1 %v7725_v50 }
  0x30   :  { %1146 = vmatprep.subr.bf16.mxu0 %v7730_v51  ;;  %1187 = vmatprep.subr.bf16.mxu1 %v7733_v52 }
  0x33   :  { %1147 = vmatpush1.bf16.msra.mxu0 %v7728_v53  ;;  %1188 = vmatpush1.bf16.msra.mxu1 %v7731_v54 }
  0x34   :  { %1148 = vmatprep.subr.bf16.mxu0 %v7736_v55  ;;  %1189 = vmatprep.subr.bf16.mxu1 %v7739_v56 }
  0x37   :  { %1149 = vmatpush1.bf16.msra.mxu0 %v7734_v57  ;;  %1190 = vmatpush1.bf16.msra.mxu1 %v7737_v58 }
  0x38   :  { %1150 = vmatprep.subr.bf16.mxu0 %v7742_v59  ;;  %1191 = vmatprep.subr.bf16.mxu1 %v7745_v60 }
  0x3b   :  { %1151 = vmatpush1.bf16.msra.mxu0 %v7740_v61  ;;  %1192 = vmatpush1.bf16.msra.mxu1 %v7743_v62 }
  0x3c   :  { %1152 = vmatprep.subr.bf16.mxu0 %v7748_v63  ;;  %1193 = vmatprep.subr.bf16.mxu1 %v7751_v0 }
  0x3f   :  { %1153 = vmatpush1.bf16.msra.mxu0 %v7746_v1  ;;  %1194 = vmatpush1.bf16.msra.mxu1 %v7749_v2 }
  0x40   :  { %1154 = vmatprep.subr.bf16.mxu0 %v7754_v3  ;;  %1195 = vmatprep.subr.bf16.mxu1 %v7757_v4 }
  0x43   :  { %1155 = vmatpush2.bf16.msra.mxu0 %v7752_v5  ;;  %1196 = vmatpush2.bf16.msra.mxu1 %v7755_v6 }
  0x44   :  { %1156 = vmatprep.subr.bf16.mxu0 %v7760_v7  ;;  %1197 = vmatprep.subr.bf16.mxu1 %v7763_v8 }
  0x47   :  { %1157 = vmatpush2.bf16.msra.mxu0 %v7758_v9  ;;  %1198 = vmatpush2.bf16.msra.mxu1 %v7761_v10 }
  0x48   :  { %1158 = vmatprep.subr.bf16.mxu0 %v7766_v11  ;;  %1199 = vmatprep.subr.bf16.mxu1 %v7769_v12 }
  0x4b   :  { %1159 = vmatpush2.bf16.msra.mxu0 %v7764_v13  ;;  %1200 = vmatpush2.bf16.msra.mxu1 %v7767_v14 }
  0x4c   :  { %1160 = vmatprep.subr.bf16.mxu0 %v7772_v15  ;;  %1201 = vmatprep.subr.bf16.mxu1 %v7775_v16 }
  0x4f   :  { %1161 = vmatpush2.bf16.msra.mxu0 %v7770_v17  ;;  %1202 = vmatpush2.bf16.msra.mxu1 %v7773_v18 }
  0x50   :  { %1162 = vmatprep.subr.bf16.mxu0 %v7778_v19  ;;  %1203 = vmatprep.subr.bf16.mxu1 %v7781_v20 }
  0x53   :  { %1163 = vmatpush2.bf16.msra.mxu0 %v7776_v21  ;;  %1204 = vmatpush2.bf16.msra.mxu1 %v7779_v22 }
  0x54   :  { %1164 = vmatprep.subr.bf16.mxu0 %v7784_v23  ;;  %1205 = vmatprep.subr.bf16.mxu1 %v7787_v24 }
  0x57   :  { %1165 = vmatpush2.bf16.msra.mxu0 %v7782_v25  ;;  %1206 = vmatpush2.bf16.msra.mxu1 %v7785_v26 }
  0x58   :  { %1166 = vmatprep.subr.bf16.mxu0 %v7790_v27  ;;  %1207 = vmatprep.subr.bf16.mxu1 %v7793_v28 }
  0x5b   :  { %1167 = vmatpush2.bf16.msra.mxu0 %v7788_v29  ;;  %1208 = vmatpush2.bf16.msra.mxu1 %v7791_v30 }
  0x5c   :  { %1168 = vmatprep.subr.bf16.mxu0 %v7796_v31  ;;  %1209 = vmatprep.subr.bf16.mxu1 %v7799_v32 }
  0x5f   :  { %1169 = vmatpush2.bf16.msra.mxu0 %v7794_v33  ;;  %1210 = vmatpush2.bf16.msra.mxu1 %v7797_v34 }
  0x60   :  { %1220 = vmatprep.subr.bf16.mxu0 %v7802_v35  ;;  %1261 = vmatprep.subr.bf16.mxu1 %v7805_v36 }
  0x61   :  { %18 = vsyncpa [#allocation3], 0  ;;  %v78_v37 = vlaneseq  ;;  %v76_v41 = vld [vmem:[%s10793_s2] sm:$0xf]  ;;  %v7800_v3 = vld [vmem:[%s10794_s3 + $0xe8] ss:$16 sps:$4 sm:$0xff]  }
  0x62   :  { %v7803_v4 = vld [vmem:[%s10794_s3 + $0x2e8] ss:$16 sps:$4 sm:$0xff]   ;;  %v7808_v6 = vld [vmem:[%s10794_s3 + $0xcc] ss:$16 sps:$4 sm:$0xff]   ;;  %vm8057_vm0 = vmmov 0  }
  0x63   :  { %v8421_v38 = vshrl.u32 %v78_v37, 7  ;;  %v7811_v7 = vld [vmem:[%s10794_s3 + $0x2cc] ss:$16 sps:$4 sm:$0xff]   ;;  %v7806_v8 = vld [vmem:[%s10794_s3 + $0xc8] ss:$16 sps:$4 sm:$0xff]  }
  0x64   :  { %v7809_v9 = vld [vmem:[%s10794_s3 + $0x2c8] ss:$16 sps:$4 sm:$0xff]   ;;  %v7814_v10 = vld [vmem:[%s10794_s3 + $0xac] ss:$16 sps:$4 sm:$0xff]  }
  0x65   :  { %v8424_v39 = vsub.s32 0, %v8421_v38  ;;  %v8427_v40 = vsub.s32 2, %v8421_v38  ;;  %v8433_v42 = vsub.s32 1, %v8421_v38  ;;  %v8436_v43 = vsub.s32 3, %v8421_v38  ;;  %v7817_v11 = vld [vmem:[%s10794_s3 + $0x2ac] ss:$16 sps:$4 sm:$0xff]  }
  0x66   :  { %v7812_v12 = vld [vmem:[%s10794_s3 + $0xa8] ss:$16 sps:$4 sm:$0xff]   ;;  %v7820_v14 = vld [vmem:[%s10794_s3 + $0x8c] ss:$16 sps:$4 sm:$0xff]  }
  0x67   :  { %v81_v44 = vrot.slane %v76_v41, %v8424_v39  ;;  %v89_v45 = vrot.slane %v76_v41, %v8427_v40  ;;  %v85_v46 = vrot.slane %v76_v41, %v8433_v42  ;;  %v93_v47 = vrot.slane %v76_v41, %v8436_v43  ;;  %v7815_v13 = vld [vmem:[%s10794_s3 + $0x2a8] ss:$16 sps:$4 sm:$0xff]   ;;  %v7823_v15 = vld [vmem:[%s10794_s3 + $0x28c] ss:$16 sps:$4 sm:$0xff]  }
  0x68   :  { %v7818_v16 = vld [vmem:[%s10794_s3 + $0x88] ss:$16 sps:$4 sm:$0xff]   ;;  %v7826_v18 = vld [vmem:[%s10794_s3 + $0x6c] ss:$16 sps:$4 sm:$0xff]  }
  0x69   :  { %v7821_v17 = vld [vmem:[%s10794_s3 + $0x288] ss:$16 sps:$4 sm:$0xff]   ;;  %v7829_v19 = vld [vmem:[%s10794_s3 + $0x26c] ss:$16 sps:$4 sm:$0xff]  }
  0x6a   :  { %v7824_v20 = vld [vmem:[%s10794_s3 + $0x68] ss:$16 sps:$4 sm:$0xff]   ;;  %v7832_v22 = vld [vmem:[%s10794_s3 + $0x4c] ss:$16 sps:$4 sm:$0xff]  }
  0x6b   :  { %v7827_v21 = vld [vmem:[%s10794_s3 + $0x268] ss:$16 sps:$4 sm:$0xff]   ;;  %v7835_v23 = vld [vmem:[%s10794_s3 + $0x24c] ss:$16 sps:$4 sm:$0xff]  }
  0x6c   :  { %v7830_v24 = vld [vmem:[%s10794_s3 + $0x48] ss:$16 sps:$4 sm:$0xff]   ;;  %v7838_v26 = vld [vmem:[%s10794_s3 + $0x2c] ss:$16 sps:$4 sm:$0xff]  }
  0x6d   :  { %v7833_v25 = vld [vmem:[%s10794_s3 + $0x248] ss:$16 sps:$4 sm:$0xff]   ;;  %v7841_v27 = vld [vmem:[%s10794_s3 + $0x22c] ss:$16 sps:$4 sm:$0xff]  }
  0x6e   :  { %v7836_v28 = vld [vmem:[%s10794_s3 + $0x28] ss:$16 sps:$4 sm:$0xff]   ;;  %v7844_v30 = vld [vmem:[%s10794_s3 + $0xc] ss:$16 sps:$4 sm:$0xff]  }
  0x6f   :  { %v7839_v29 = vld [vmem:[%s10794_s3 + $0x228] ss:$16 sps:$4 sm:$0xff]   ;;  %v7847_v31 = vld [vmem:[%s10794_s3 + $0x20c] ss:$16 sps:$4 sm:$0xff]  }
  0x70   :  { %v7842_v32 = vld [vmem:[%s10794_s3 + $0x8] ss:$16 sps:$4 sm:$0xff]   ;;  %v7850_v34 = vld [vmem:[%s10794_s3 + $0x1ec] ss:$16 sps:$4 sm:$0xff]  }
  0x71   :  { %v7845_v33 = vld [vmem:[%s10794_s3 + $0x208] ss:$16 sps:$4 sm:$0xff]   ;;  %v7853_v35 = vld [vmem:[%s10794_s3 + $0x3ec] ss:$16 sps:$4 sm:$0xff]  }
  0x72   :  { %v7848_v36 = vld [vmem:[%s10794_s3 + $0x1e8] ss:$16 sps:$4 sm:$0xff]   ;;  %v7856_v41 = vld [vmem:[%s10794_s3 + $0x1cc] ss:$16 sps:$4 sm:$0xff]  }
  0x73   :  { %v7851_v37 = vld [vmem:[%s10794_s3 + $0x3e8] ss:$16 sps:$4 sm:$0xff]  }
  0xe2   :  { %v292_v48 = vpop.f32.mrf.mxu0  ;;  %v333_v49 = vpop.f32.mrf.mxu1 }
  0xe3   :  { %v293_v50 = vadd.f32 %v292_v48, %v81_v44  ;;  %v334_v51 = vadd.f32 %v333_v49, %v89_v45  ;;  %v7859_v44 = vld [vmem:[%s10794_s3 + $0x3cc] ss:$16 sps:$4 sm:$0xff]   ;;  %v7854_v45 = vld [vmem:[%s10794_s3 + $0x1c8] ss:$16 sps:$4 sm:$0xff]  }
  0xe4   :  { %v294_v52 = vpop.f32.mrf.mxu0  ;;  %v335_v53 = vpop.f32.mrf.mxu1  ;;  %v7865_v48 = vld [vmem:[%s10794_s3 + $0x3ac] ss:$16 sps:$4 sm:$0xff]   ;;  %v7860_v49 = vld [vmem:[%s10794_s3 + $0x1a8] ss:$16 sps:$4 sm:$0xff]  }
  0xe5   :  { %v342_v54 = vmax.f32 %v334_v51, 0.0  ;;  %v295_v55 = vadd.f32 %v294_v52, %v85_v46  ;;  %v336_v56 = vadd.f32 %v335_v53, %v93_v47  ;;  %v340_v57 = vmax.f32 %v293_v50, 0.0  ;;  %v7857_v46 = vld [vmem:[%s10794_s3 + $0x3c8] ss:$16 sps:$4 sm:$0xff]   ;;  %v7862_v47 = vld [vmem:[%s10794_s3 + $0x1ac] ss:$16 sps:$4 sm:$0xff]  }
  0xe6   :  { %v296_v58 = vpop.f32.mrf.mxu0  ;;  %v337_v59 = vpop.f32.mrf.mxu1  ;;  %v7863_v50 = vld [vmem:[%s10794_s3 + $0x3a8] ss:$16 sps:$4 sm:$0xff]   ;;  %v7868_v51 = vld [vmem:[%s10794_s3 + $0x18c] ss:$16 sps:$4 sm:$0xff]  }
  0xe7   :  { %v341_v60 = vmax.f32 %v295_v55, 0.0  ;;  %v343_v61 = vmax.f32 %v336_v56, 0.0  ;;  %v8442_v62 = vpack.c.bf16 %v342_v54, %v342_v54  ;;  %v8450_v5 = vpack.c.bf16 %v340_v57, %v340_v57  ;;  %v7871_v52 = vld [vmem:[%s10794_s3 + $0x38c] ss:$16 sps:$4 sm:$0xff]   ;;  %v7866_v53 = vld [vmem:[%s10794_s3 + $0x188] ss:$16 sps:$4 sm:$0xff]  }
  0xe8   :  { %v297_v63 = vpop.f32.mrf.mxu0  ;;  %v338_v0 = vpop.f32.mrf.mxu1  ;;  %v7869_v54 = vld [vmem:[%s10794_s3 + $0x388] ss:$16 sps:$4 sm:$0xff]   ;;  %v7874_v55 = vld [vmem:[%s10794_s3 + $0x16c] ss:$16 sps:$4 sm:$0xff]  }
  0xe9   :  { %v345_v1 = vpack.c.bf16 %v341_v60, %v341_v60  ;;  %v347_v2 = vpack.c.bf16 %v343_v61, %v343_v61  ;;  %v7877_v56 = vld [vmem:[%s10794_s3 + $0x36c] ss:$16 sps:$4 sm:$0xff]   ;;  %v7872_v57 = vld [vmem:[%s10794_s3 + $0x168] ss:$16 sps:$4 sm:$0xff]  }
  0xea   :  { %v7875_v58 = vld [vmem:[%s10794_s3 + $0x368] ss:$16 sps:$4 sm:$0xff]   ;;  %v7880_v59 = vld [vmem:[%s10794_s3 + $0x14c] ss:$16 sps:$4 sm:$0xff]  }
  0xeb   :  { %1170 = vmatprep.mubr.bf16.mxu0 %v345_v1  ;;  %1211 = vmatprep.mubr.bf16.mxu1 %v347_v2  ;;  %v7883_v60 = vld [vmem:[%s10794_s3 + $0x34c] ss:$16 sps:$4 sm:$0xff]   ;;  %v7878_v61 = vld [vmem:[%s10794_s3 + $0x148] ss:$16 sps:$4 sm:$0xff]  }
  0xec   :  { %1171 = vmatmul.mubr.bf16.vlgmr.msra.gmra.mxu0 %v8450_v5  ;;  %1212 = vmatmul.mubr.bf16.vlgmr.msra.gmra.mxu1 %v8442_v62  ;;  %v7881_v63 = vld [vmem:[%s10794_s3 + $0x348] ss:$16 sps:$4 sm:$0xff]   ;;  %v7886_v0 = vld [vmem:[%s10794_s3 + $0x12c] ss:$16 sps:$4 sm:$0xff]  }
  0xed   :  { %1221 = vmatpush1.bf16.msra.mxu0 %v7800_v3  ;;  %1262 = vmatpush1.bf16.msra.mxu1 %v7803_v4  ;;  %v7887_v3 = vld [vmem:[%s10794_s3 + $0x328] ss:$16 sps:$4 sm:$0xff]   ;;  %v7892_v4 = vld [vmem:[%s10794_s3 + $0x10c] ss:$16 sps:$4 sm:$0xff]  }
  0xee   :  { %1252 = vmatprep.mubr.bf16.mxu0 %v345_v1  ;;  %1293 = vmatprep.mubr.bf16.mxu1 %v347_v2  ;;  %v7889_v1 = vld [vmem:[%s10794_s3 + $0x32c] ss:$16 sps:$4 sm:$0xff]   ;;  %v7884_v2 = vld [vmem:[%s10794_s3 + $0x128] ss:$16 sps:$4 sm:$0xff]  }
  0xef   :  { %1222 = vmatprep.subr.bf16.mxu0 %v7808_v6  ;;  %1263 = vmatprep.subr.bf16.mxu1 %v7811_v7  ;;  %v7895_v6 = vld [vmem:[%s10794_s3 + $0x30c] ss:$16 sps:$4 sm:$0xff]   ;;  %v1422_v7 = vld [vmem:[%s10796_s5 + $0x380] sm:$0xff] }
  0xf1   :  { %1223 = vmatpush1.bf16.msra.mxu0 %v7806_v8  ;;  %1264 = vmatpush1.bf16.msra.mxu1 %v7809_v9  ;;  %v1430_v8 = vld [vmem:[%s10796_s5 + $0x3c0] sm:$0xff]  ;;  %v7890_v9 = vld [vmem:[%s10794_s3 + $0x108] ss:$16 sps:$4 sm:$0xff]  }
  0xf2   :  { %1224 = vmatprep.subr.bf16.mxu0 %v7814_v10  ;;  %1265 = vmatprep.subr.bf16.mxu1 %v7817_v11  ;;  %v7893_v10 = vld [vmem:[%s10794_s3 + $0x308] ss:$16 sps:$4 sm:$0xff]   ;;  %v6910_v11 = vcombine.high %v1422_v7, %v1430_v8 }
  0xf5   :  { %1225 = vmatpush1.bf16.msra.mxu0 %v7812_v12  ;;  %1266 = vmatpush1.bf16.msra.mxu1 %v7815_v13  ;;  %v1406_v12 = vld [vmem:[%s10796_s5 + $0x300] sm:$0xff] }
  0xf6   :  { %1226 = vmatprep.subr.bf16.mxu0 %v7820_v14  ;;  %1267 = vmatprep.subr.bf16.mxu1 %v7823_v15  ;;  %v1414_v13 = vld [vmem:[%s10796_s5 + $0x340] sm:$0xff]  ;;  %v6909_v14 = vcombine.low %v1422_v7, %v1430_v8 }
  0xf7   :  { %v6894_v15 = vcombine.high %v1406_v12, %v1414_v13  ;;  %v1534_v8 = vld [vmem:[%s10796_s5 + $0x700] sm:$0xff] }
  0xf9   :  { %1227 = vmatpush1.bf16.msra.mxu0 %v7818_v16  ;;  %1268 = vmatpush1.bf16.msra.mxu1 %v7821_v17  ;;  %v1390_v16 = vld [vmem:[%s10796_s5 + $0x280] sm:$0xff] }
  0xfa   :  { %1228 = vmatprep.subr.bf16.mxu0 %v7826_v18  ;;  %1269 = vmatprep.subr.bf16.mxu1 %v7829_v19  ;;  %v1398_v17 = vld [vmem:[%s10796_s5 + $0x2c0] sm:$0xff]  ;;  %v6893_v18 = vcombine.low %v1406_v12, %v1414_v13 }
  0xfb   :  { %v6878_v19 = vcombine.high %v1390_v16, %v1398_v17 }
  0xfd   :  { %1229 = vmatpush1.bf16.msra.mxu0 %v7824_v20  ;;  %1270 = vmatpush1.bf16.msra.mxu1 %v7827_v21  ;;  %v1374_v20 = vld [vmem:[%s10796_s5 + $0x200] sm:$0xff] }
  0xfe   :  { %1230 = vmatprep.subr.bf16.mxu0 %v7832_v22  ;;  %1271 = vmatprep.subr.bf16.mxu1 %v7835_v23  ;;  %v1382_v21 = vld [vmem:[%s10796_s5 + $0x240] sm:$0xff]  ;;  %v6877_v22 = vcombine.low %v1390_v16, %v1398_v17 }
  0xff   :  { %v6862_v23 = vcombine.high %v1374_v20, %v1382_v21  ;;  %v1518_v16 = vld [vmem:[%s10796_s5 + $0x680] sm:$0xff] }
 0x100   :  { %v1526_v17 = vld [vmem:[%s10796_s5 + $0x6c0] sm:$0xff] }
 0x101   :  { %1231 = vmatpush1.bf16.msra.mxu0 %v7830_v24  ;;  %1272 = vmatpush1.bf16.msra.mxu1 %v7833_v25  ;;  %v1678_v24 = vld [vmem:[%s10796_s5 + $0xb80] sm:$0xff] }
 0x102   :  { %1232 = vmatprep.subr.bf16.mxu0 %v7838_v26  ;;  %1273 = vmatprep.subr.bf16.mxu1 %v7841_v27  ;;  %v1686_v25 = vld [vmem:[%s10796_s5 + $0xbc0] sm:$0xff]  ;;  %v6861_v26 = vcombine.low %v1374_v20, %v1382_v21 }
 0x103   :  { %v7165_v27 = vcombine.low %v1678_v24, %v1686_v25 }
 0x105   :  { %1233 = vmatpush1.bf16.msra.mxu0 %v7836_v28  ;;  %1274 = vmatpush1.bf16.msra.mxu1 %v7839_v29  ;;  %v7166_v28 = vcombine.high %v1678_v24, %v1686_v25  ;;  %v8675_v29 = vld [vmem:[%s10796_s5 + $0x388] sm:$0xff]  ;;  %v1566_v24 = vld [vmem:[%s10796_s5 + $0x800] sm:$0xff] }
 0x106   :  { %1234 = vmatprep.subr.bf16.mxu0 %v7844_v30  ;;  %1275 = vmatprep.subr.bf16.mxu1 %v7847_v31  ;;  %v8680_v30 = vld [vmem:[%s10796_s5 + $0x3c8] sm:$0xff]  ;;  %v1574_v25 = vld [vmem:[%s10796_s5 + $0x840] sm:$0xff] }
 0x109   :  { %1235 = vmatpush1.bf16.msra.mxu0 %v7842_v32  ;;  %1276 = vmatpush1.bf16.msra.mxu1 %v7845_v33  ;;  %v1342_v32 = vld [vmem:[%s10796_s5 + $0x100] sm:$0xff] }
 0x10a   :  { %1236 = vmatprep.subr.bf16.mxu0 %v7850_v34  ;;  %1277 = vmatprep.subr.bf16.mxu1 %v7853_v35  ;;  %v1350_v33 = vld [vmem:[%s10796_s5 + $0x140] sm:$0xff]  ;;  %v6911_v34 = vcombine.low %v8675_v29, %v8680_v30 }
 0x10b   :  { %v1662_v35 = vld [vmem:[%s10796_s5 + $0xb00] sm:$0xff] }
 0x10d   :  { %1237 = vmatpush2.bf16.msra.mxu0 %v7848_v36  ;;  %1278 = vmatpush2.bf16.msra.mxu1 %v7851_v37  ;;  %v1670_v36 = vld [vmem:[%s10796_s5 + $0xb40] sm:$0xff] }
 0x10e   :  { %1238 = vmatprep.subr.bf16.mxu0 %v7856_v41  ;;  %1279 = vmatprep.subr.bf16.mxu1 %v7859_v44  ;;  %v7149_v41 = vcombine.low %v1662_v35, %v1670_v36  ;;  %v7150_v44 = vcombine.high %v1662_v35, %v1670_v36  ;;  %v1806_v35 = vld [vmem:[%s10796_s5 + $0xf80] sm:$0xff] }
 0x10f   :  { %v1814_v36 = vld [vmem:[%s10796_s5 + $0xfc0] sm:$0xff] }
 0x111   :  { %1239 = vmatpush2.bf16.msra.mxu0 %v7854_v45  ;;  %1280 = vmatpush2.bf16.msra.mxu1 %v7857_v46  ;;  %v6830_v45 = vcombine.high %v1342_v32, %v1350_v33  ;;  %v1326_v46 = vld [vmem:[%s10796_s5 + $0x80] sm:$0xff] }
 0x112   :  { %1240 = vmatprep.subr.bf16.mxu0 %v7862_v47  ;;  %1281 = vmatprep.subr.bf16.mxu1 %v7865_v48  ;;  %v1334_v47 = vld [vmem:[%s10796_s5 + $0xc0] sm:$0xff] }
 0x113   :  { %v1646_v48 = vld [vmem:[%s10796_s5 + $0xa80] sm:$0xff] }
 0x115   :  { %1241 = vmatpush2.bf16.msra.mxu0 %v7860_v49  ;;  %1282 = vmatpush2.bf16.msra.mxu1 %v7863_v50  ;;  %v1654_v49 = vld [vmem:[%s10796_s5 + $0xac0] sm:$0xff]  ;;  %v6829_v50 = vcombine.low %v1342_v32, %v1350_v33 }
 0x116   :  { %1242 = vmatprep.subr.bf16.mxu0 %v7868_v51  ;;  %1283 = vmatprep.subr.bf16.mxu1 %v7871_v52  ;;  %v7133_v51 = vcombine.low %v1646_v48, %v1654_v49  ;;  %v7134_v52 = vcombine.high %v1646_v48, %v1654_v49  ;;  %v1486_v32 = vld [vmem:[%s10796_s5 + $0x580] sm:$0xff] }
 0x117   :  { %v1494_v33 = vld [vmem:[%s10796_s5 + $0x5c0] sm:$0xff] }
 0x118   :  { %v1790_v48 = vld [vmem:[%s10796_s5 + $0xf00] sm:$0xff] }
 0x119   :  { %1243 = vmatpush2.bf16.msra.mxu0 %v7866_v53  ;;  %1284 = vmatpush2.bf16.msra.mxu1 %v7869_v54  ;;  %v6814_v53 = vcombine.high %v1326_v46, %v1334_v47  ;;  %v1310_v54 = vld [vmem:[%s10796_s5] sm:$0xff] }
 0x11a   :  { %1244 = vmatprep.subr.bf16.mxu0 %v7874_v55  ;;  %1285 = vmatprep.subr.bf16.mxu1 %v7877_v56  ;;  %v1318_v55 = vld [vmem:[%s10796_s5 + $0x40] sm:$0xff] }
 0x11b   :  { %v1630_v56 = vld [vmem:[%s10796_s5 + $0xa00] sm:$0xff] }
 0x11c   :  { %v1798_v49 = vld [vmem:[%s10796_s5 + $0xf40] sm:$0xff] }
 0x11d   :  { %1245 = vmatpush2.bf16.msra.mxu0 %v7872_v57  ;;  %1286 = vmatpush2.bf16.msra.mxu1 %v7875_v58  ;;  %v1638_v57 = vld [vmem:[%s10796_s5 + $0xa40] sm:$0xff]  ;;  %v6813_v58 = vcombine.low %v1326_v46, %v1334_v47 }
 0x11e   :  { %1246 = vmatprep.subr.bf16.mxu0 %v7880_v59  ;;  %1287 = vmatprep.subr.bf16.mxu1 %v7883_v60  ;;  %v7117_v59 = vcombine.low %v1630_v56, %v1638_v57  ;;  %v7118_v60 = vcombine.high %v1630_v56, %v1638_v57  ;;  %v1470_v46 = vld [vmem:[%s10796_s5 + $0x500] sm:$0xff] }
 0x11f   :  { %v1478_v47 = vld [vmem:[%s10796_s5 + $0x540] sm:$0xff] }
 0x120   :  { %v1774_v56 = vld [vmem:[%s10796_s5 + $0xe80] sm:$0xff] }
 0x121   :  { %1247 = vmatpush2.bf16.msra.mxu0 %v7878_v61  ;;  %1288 = vmatpush2.bf16.msra.mxu1 %v7881_v63  ;;  %v6798_v61 = vcombine.high %v1310_v54, %v1318_v55  ;;  %v1550_v63 = vld [vmem:[%s10796_s5 + $0x780] sm:$0xff] }
 0x122   :  { %1248 = vmatprep.subr.bf16.mxu0 %v7886_v0  ;;  %1289 = vmatprep.subr.bf16.mxu1 %v7889_v1  ;;  %v1558_v0 = vld [vmem:[%s10796_s5 + $0x7c0] sm:$0xff] }
 0x123   :  { %v1614_v1 = vld [vmem:[%s10796_s5 + $0x980] sm:$0xff]  ;;  %v7038_v7 = vcombine.high %v1550_v63, %v1558_v0  ;;  %v7037_v12 = vcombine.low %v1550_v63, %v1558_v0 }
 0x124   :  { %v1782_v57 = vld [vmem:[%s10796_s5 + $0xec0] sm:$0xff] }
 0x125   :  { %1249 = vmatpush2.bf16.msra.mxu0 %v7884_v2  ;;  %1290 = vmatpush2.bf16.msra.mxu1 %v7887_v3  ;;  %v1622_v2 = vld [vmem:[%s10796_s5 + $0x9c0] sm:$0xff]  ;;  %v6797_v3 = vcombine.low %v1310_v54, %v1318_v55 }
 0x126   :  { %1250 = vmatprep.subr.bf16.mxu0 %v7892_v4  ;;  %1291 = vmatprep.subr.bf16.mxu1 %v7895_v6  ;;  %v7101_v4 = vcombine.low %v1614_v1, %v1622_v2  ;;  %v7102_v6 = vcombine.high %v1614_v1, %v1622_v2  ;;  %v1454_v54 = vld [vmem:[%s10796_s5 + $0x480] sm:$0xff] }
 0x127   :  { %v1462_v55 = vld [vmem:[%s10796_s5 + $0x4c0] sm:$0xff] }
 0x128   :  { %v1438_v63 = vld [vmem:[%s10796_s5 + $0x400] sm:$0xff] }
 0x129   :  { %1251 = vmatpush2.bf16.msra.mxu0 %v7890_v9  ;;  %1292 = vmatpush2.bf16.msra.mxu1 %v7893_v10  ;;  %v1542_v9 = vld [vmem:[%s10796_s5 + $0x740] sm:$0xff] }
 0x12a   :  { %4466 = vmatprep.subr.bf16.mxu0 %v6910_v11  ;;  %4507 = vmatprep.subr.bf16.mxu1 %v7166_v28  ;;  %v1598_v10 = vld [vmem:[%s10796_s5 + $0x900] sm:$0xff]  ;;  %v7021_v20 = vcombine.low %v1534_v8, %v1542_v9  ;;  %v7054_v28 = vcombine.high %v1566_v24, %v1574_v25 }
 0x12b   :  { %v1606_v11 = vld [vmem:[%s10796_s5 + $0x940] sm:$0xff] }
 0x12c   :  { %1253 = vmatmul.mubr.bf16.vlgmr.msra.gmra.mxu0 %v8450_v5  ;;  %1294 = vmatmul.mubr.bf16.vlgmr.msra.gmra.mxu1 %v8442_v62  ;;  %v1358_v62 = vld [vmem:[%s10796_s5 + $0x180] sm:$0xff]  ;;  %v7085_v13 = vcombine.low %v1598_v10, %v1606_v11 }
 0x12d   :  { %4467 = vmatpush1.bf16.msra.mxu0 %v6909_v14  ;;  %v1366_v5 = vld [vmem:[%s10796_s5 + $0x1c0] sm:$0xff]  ;;  %4508 = vmatpush1.bf16.msra.mxu1 %v7165_v27  ;;  %v7086_v14 = vcombine.high %v1598_v10, %v1606_v11  ;;  %v7053_v27 = vcombine.low %v1566_v24, %v1574_v25  ;;  %v8845_v24 = vld [vmem:[%s10796_s5 + $0xb88] sm:$0xff] }
 0x12e   :  { %4468 = vmatprep.subr.bf16.mxu0 %v6894_v15  ;;  %v6846_v31 = vcombine.high %v1358_v62, %v1366_v5  ;;  %v6845_v37 = vcombine.low %v1358_v62, %v1366_v5  ;;  %4509 = vmatprep.subr.bf16.mxu1 %v7150_v44  ;;  %v7022_v15 = vcombine.high %v1534_v8, %v1542_v9  ;;  %v1502_v62 = vld [vmem:[%s10796_s5 + $0x600] sm:$0xff]  ;;  %v8850_v25 = vld [vmem:[%s10796_s5 + $0xbc8] sm:$0xff] }
 0x12f   :  { %v1510_v5 = vld [vmem:[%s10796_s5 + $0x640] sm:$0xff]  ;;  %v7294_v44 = vcombine.high %v1806_v35, %v1814_v36 }
 0x130   :  { %v1446_v0 = vld [vmem:[%s10796_s5 + $0x440] sm:$0xff] }
 0x131   :  { %4469 = vmatpush1.bf16.msra.mxu0 %v6893_v18  ;;  %4510 = vmatpush1.bf16.msra.mxu1 %v7149_v41  ;;  %v1582_v18 = vld [vmem:[%s10796_s5 + $0x880] sm:$0xff]  ;;  %v7293_v41 = vcombine.low %v1806_v35, %v1814_v36  ;;  %v6925_v10 = vcombine.low %v1438_v63, %v1446_v0 }
 0x132   :  { %4470 = vmatprep.subr.bf16.mxu0 %v6878_v19  ;;  %4511 = vmatprep.subr.bf16.mxu1 %v7134_v52  ;;  %v1590_v19 = vld [vmem:[%s10796_s5 + $0x8c0] sm:$0xff]  ;;  %v7278_v52 = vcombine.high %v1790_v48, %v1798_v49 }
 0x133   :  { %v7069_v21 = vcombine.low %v1582_v18, %v1590_v19  ;;  %v1758_v1 = vld [vmem:[%s10796_s5 + $0xe00] sm:$0xff] }
 0x134   :  { %v1766_v2 = vld [vmem:[%s10796_s5 + $0xe40] sm:$0xff] }
 0x135   :  { %4471 = vmatpush1.bf16.msra.mxu0 %v6877_v22  ;;  %4512 = vmatpush1.bf16.msra.mxu1 %v7133_v51  ;;  %v7070_v22 = vcombine.high %v1582_v18, %v1590_v19  ;;  %v7277_v51 = vcombine.low %v1790_v48, %v1798_v49  ;;  %v1742_v8 = vld [vmem:[%s10796_s5 + $0xd80] sm:$0xff] }
 0x136   :  { %4472 = vmatprep.subr.bf16.mxu0 %v6862_v23  ;;  %4513 = vmatprep.subr.bf16.mxu1 %v7118_v60  ;;  %v7006_v23 = vcombine.high %v1518_v16, %v1526_v17  ;;  %v7262_v60 = vcombine.high %v1774_v56, %v1782_v57  ;;  %v1750_v9 = vld [vmem:[%s10796_s5 + $0xdc0] sm:$0xff] }
 0x137   :  { %v7229_v11 = vcombine.low %v1742_v8, %v1750_v9  ;;  %v1710_v18 = vld [vmem:[%s10796_s5 + $0xc80] sm:$0xff] }
 0x138   :  { %v1718_v19 = vld [vmem:[%s10796_s5 + $0xcc0] sm:$0xff] }
 0x139   :  { %4473 = vmatpush1.bf16.msra.mxu0 %v6861_v26  ;;  %4514 = vmatpush1.bf16.msra.mxu1 %v7117_v59  ;;  %v7005_v26 = vcombine.low %v1518_v16, %v1526_v17  ;;  %v7261_v59 = vcombine.low %v1774_v56, %v1782_v57 }
 0x13a   :  { %4474 = vmatprep.subr.bf16.mxu0 %v6846_v31  ;;  %4515 = vmatprep.subr.bf16.mxu1 %v7102_v6  ;;  %v6990_v31 = vcombine.high %v1502_v62, %v1510_v5  ;;  %v7246_v6 = vcombine.high %v1758_v1, %v1766_v2 }
 0x13d   :  { %4475 = vmatpush1.bf16.msra.mxu0 %v6845_v37  ;;  %4516 = vmatpush1.bf16.msra.mxu1 %v7101_v4  ;;  %v6989_v37 = vcombine.low %v1502_v62, %v1510_v5  ;;  %v7245_v4 = vcombine.low %v1758_v1, %v1766_v2 }
 0x13e   :  { %4476 = vmatprep.subr.bf16.mxu0 %v6830_v45  ;;  %4517 = vmatprep.subr.bf16.mxu1 %v7086_v14  ;;  %v6974_v45 = vcombine.high %v1486_v32, %v1494_v33  ;;  %v1726_v14 = vld [vmem:[%s10796_s5 + $0xd00] sm:$0xff] }
 0x141   :  { %4477 = vmatpush1.bf16.msra.mxu0 %v6829_v50  ;;  %4518 = vmatpush1.bf16.msra.mxu1 %v7085_v13  ;;  %v6973_v50 = vcombine.low %v1486_v32, %v1494_v33  ;;  %v6912_v13 = vcombine.high %v8675_v29, %v8680_v30  ;;  %v1359_v29 = vld [vmem:[%s10796_s5 + $0x188] sm:$0xff] }
 0x142   :  { %4478 = vmatprep.subr.bf16.mxu0 %v6814_v53  ;;  %4519 = vmatprep.subr.bf16.mxu1 %v7070_v22  ;;  %v6958_v53 = vcombine.high %v1470_v46, %v1478_v47  ;;  %v1694_v22 = vld [vmem:[%s10796_s5 + $0xc00] sm:$0xff]  ;;  %v1367_v30 = vld [vmem:[%s10796_s5 + $0x1c8] sm:$0xff] }
 0x145   :  { %4479 = vmatpush1.bf16.msra.mxu0 %v6813_v58  ;;  %4520 = vmatpush1.bf16.msra.mxu1 %v7069_v21  ;;  %v6957_v58 = vcombine.low %v1470_v46, %v1478_v47  ;;  %v7197_v21 = vcombine.low %v1710_v18, %v1718_v19 }
 0x146   :  { %4480 = vmatprep.subr.bf16.mxu0 %v6798_v61  ;;  %4521 = vmatprep.subr.bf16.mxu1 %v7054_v28  ;;  %v6942_v61 = vcombine.high %v1454_v54, %v1462_v55  ;;  %v8859_v28 = vld [vmem:[%s10795_s4] sm:$0xf] }
 0x147   :  { %v485_v32 = vrot.slane %v8859_v28, %v8433_v42 }
 0x149   :  { %4481 = vmatpush1.bf16.msra.mxu0 %v6797_v3  ;;  %4522 = vmatpush1.bf16.msra.mxu1 %v7053_v27  ;;  %v6941_v3 = vcombine.low %v1454_v54, %v1462_v55  ;;  %v7167_v27 = vcombine.low %v8845_v24, %v8850_v25  ;;  %v1415_v54 = vld [vmem:[%s10796_s5 + $0x348] sm:$0xff] }
 0x14a   :  { %4482 = vmatprep.subr.bf16.mxu0 %v7038_v7  ;;  %4523 = vmatprep.subr.bf16.mxu1 %v7294_v44  ;;  %v6926_v7 = vcombine.high %v1438_v63, %v1446_v0  ;;  %v1375_v63 = vld [vmem:[%s10796_s5 + $0x208] sm:$0xff] }
 0x14b   :  { %v1383_v0 = vld [vmem:[%s10796_s5 + $0x248] sm:$0xff] }
 0x14c   :  { %v6864_v2 = vcombine.high %v1375_v63, %v1383_v0 }
 0x14d   :  { %4483 = vmatpush2.bf16.msra.mxu0 %v7037_v12  ;;  %4524 = vmatpush2.bf16.msra.mxu1 %v7293_v41  ;;  %v7230_v12 = vcombine.high %v1742_v8, %v1750_v9  ;;  %v1327_v9 = vld [vmem:[%s10796_s5 + $0x88] sm:$0xff] }
 0x14e   :  { %4484 = vmatprep.subr.bf16.mxu0 %v7022_v15  ;;  %4525 = vmatprep.subr.bf16.mxu1 %v7278_v52  ;;  %v1734_v15 = vld [vmem:[%s10796_s5 + $0xd40] sm:$0xff] }
 0x14f   :  { %v7213_v16 = vcombine.low %v1726_v14, %v1734_v15  ;;  %v7214_v17 = vcombine.high %v1726_v14, %v1734_v15  ;;  %v1319_v14 = vld [vmem:[%s10796_s5 + $0x48] sm:$0xff] }
 0x151   :  { %4485 = vmatpush2.bf16.msra.mxu0 %v7021_v20  ;;  %4526 = vmatpush2.bf16.msra.mxu1 %v7277_v51  ;;  %v7198_v20 = vcombine.high %v1710_v18, %v1718_v19  ;;  %v1559_v18 = vld [vmem:[%s10796_s5 + $0x7c8] sm:$0xff] }
 0x152   :  { %4486 = vmatprep.subr.bf16.mxu0 %v7006_v23  ;;  %4527 = vmatprep.subr.bf16.mxu1 %v7262_v60  ;;  %v1702_v23 = vld [vmem:[%s10796_s5 + $0xc40] sm:$0xff] }
 0x153   :  { %v7182_v62 = vcombine.high %v1694_v22, %v1702_v23  ;;  %v7181_v5 = vcombine.low %v1694_v22, %v1702_v23  ;;  %v1543_v22 = vld [vmem:[%s10796_s5 + $0x748] sm:$0xff] }
 0x155   :  { %4487 = vmatpush2.bf16.msra.mxu0 %v7005_v26  ;;  %4528 = vmatpush2.bf16.msra.mxu1 %v7261_v59  ;;  %v7168_v26 = vcombine.high %v8845_v24, %v8850_v25  ;;  %v1399_v59 = vld [vmem:[%s10796_s5 + $0x2c8] sm:$0xff]  ;;  %v1376_v25 = vld [vmem:[%s10796_s5 + $0x210] sm:$0xff] }
 0x156   :  { %4488 = vmatprep.subr.bf16.mxu0 %v6990_v31  ;;  %4529 = vmatprep.subr.bf16.mxu1 %v7246_v6  ;;  %v481_v31 = vrot.slane %v8859_v28, %v8424_v39  ;;  %v1351_v6 = vld [vmem:[%s10796_s5 + $0x148] sm:$0xff] }
 0x157   :  { %v1639_v24 = vld [vmem:[%s10796_s5 + $0xa48] sm:$0xff] }
 0x159   :  { %4489 = vmatpush2.bf16.msra.mxu0 %v6989_v37  ;;  %4530 = vmatpush2.bf16.msra.mxu1 %v7245_v4  ;;  %v1343_v4 = vld [vmem:[%s10796_s5 + $0x108] sm:$0xff] }
 0x15a   :  { %4490 = vmatprep.subr.bf16.mxu0 %v6974_v45  ;;  %4531 = vmatprep.subr.bf16.mxu1 %v7230_v12  ;;  %v6832_v8 = vcombine.high %v1343_v4, %v1351_v6 }
 0x15d   :  { %4491 = vmatpush2.bf16.msra.mxu0 %v6973_v50  ;;  %4532 = vmatpush2.bf16.msra.mxu1 %v7229_v11  ;;  %v6831_v11 = vcombine.low %v1343_v4, %v1351_v6  ;;  %v1432_v4 = vld [vmem:[%s10796_s5 + $0x3d0] sm:$0xff] }
 0x15e   :  { %4492 = vmatprep.subr.bf16.mxu0 %v6958_v53  ;;  %4533 = vmatprep.subr.bf16.mxu1 %v7214_v17  ;;  %v1407_v53 = vld [vmem:[%s10796_s5 + $0x308] sm:$0xff] }
 0x15f   :  { %v6896_v57 = vcombine.high %v1407_v53, %v1415_v54  ;;  %v6895_v60 = vcombine.low %v1407_v53, %v1415_v54  ;;  %v1551_v17 = vld [vmem:[%s10796_s5 + $0x788] sm:$0xff]  ;;  %v489_v53 = vrot.slane %v8859_v28, %v8427_v40 }
 0x160   :  { %v7039_v23 = vcombine.low %v1551_v17, %v1559_v18 }
 0x161   :  { %4493 = vmatpush2.bf16.msra.mxu0 %v6957_v58  ;;  %4534 = vmatpush2.bf16.msra.mxu1 %v7213_v16  ;;  %v1391_v58 = vld [vmem:[%s10796_s5 + $0x288] sm:$0xff] }
 0x162   :  { %4494 = vmatprep.subr.bf16.mxu0 %v6942_v61  ;;  %4535 = vmatprep.subr.bf16.mxu1 %v7198_v20  ;;  %v6880_v61 = vcombine.high %v1391_v58, %v1399_v59  ;;  %v6879_v1 = vcombine.low %v1391_v58, %v1399_v59  ;;  %v7040_v20 = vcombine.high %v1551_v17, %v1559_v18  ;;  %v1439_v59 = vld [vmem:[%s10796_s5 + $0x408] sm:$0xff]  ;;  %v1408_v17 = vld [vmem:[%s10796_s5 + $0x310] sm:$0xff] }
 0x163   :  { %v493_v58 = vrot.slane %v8859_v28, %v8436_v43  ;;  %v1424_v28 = vld [vmem:[%s10796_s5 + $0x390] sm:$0xff] }
 0x164   :  { %v1416_v18 = vld [vmem:[%s10796_s5 + $0x350] sm:$0xff] }
 0x165   :  { %4495 = vmatpush2.bf16.msra.mxu0 %v6941_v3  ;;  %4536 = vmatpush2.bf16.msra.mxu1 %v7197_v21  ;;  %v6848_v3 = vcombine.high %v1359_v29, %v1367_v30  ;;  %v1535_v21 = vld [vmem:[%s10796_s5 + $0x708] sm:$0xff] }
 0x166   :  { %4496 = vmatprep.subr.bf16.mxu0 %v6926_v7  ;;  %4537 = vmatprep.subr.bf16.mxu1 %v7182_v62  ;;  %v6847_v7 = vcombine.low %v1359_v29, %v1367_v30  ;;  %v7024_v62 = vcombine.high %v1535_v21, %v1543_v22 }
 0x169   :  { %4497 = vmatpush2.bf16.msra.mxu0 %v6925_v10  ;;  %4538 = vmatpush2.bf16.msra.mxu1 %v7181_v5  ;;  %v1335_v10 = vld [vmem:[%s10796_s5 + $0xc8] sm:$0xff] }
 0x16a   :  { %4548 = vmatprep.subr.bf16.mxu0 %v6912_v13  ;;  %4589 = vmatprep.subr.bf16.mxu1 %v7168_v26  ;;  %v6816_v12 = vcombine.high %v1327_v9, %v1335_v10  ;;  %v1311_v13 = vld [vmem:[%s10796_s5 + $0x8] sm:$0xff]  ;;  %v6815_v15 = vcombine.low %v1327_v9, %v1335_v10 }
 0x16b   :  { %v6800_v16 = vcombine.high %v1311_v13, %v1319_v14  ;;  %v6799_v19 = vcombine.low %v1311_v13, %v1319_v14  ;;  %v1519_v5 = vld [vmem:[%s10796_s5 + $0x688] sm:$0xff]  ;;  %v6914_v13 = vcombine.high %v1424_v28, %v1432_v4 }
 0x16c   :  { %v1527_v26 = vld [vmem:[%s10796_s5 + $0x6c8] sm:$0xff] }
 0x1ac   :  { %v1172_v33 = vpop.f32.mrf.mxu0  ;;  %v1213_v35 = vpop.f32.mrf.mxu1 }
 0x1ad   :  { %v1173_v36 = vadd.f32 %v1172_v33, %v481_v31  ;;  %v7023_v31 = vcombine.low %v1535_v21, %v1543_v22  ;;  %v1503_v33 = vld [vmem:[%s10796_s5 + $0x608] sm:$0xff]  ;;  %v6913_v21 = vcombine.low %v1424_v28, %v1432_v4 }
 0x1ae   :  { %v1174_v37 = vpop.f32.mrf.mxu0  ;;  %v1215_v41 = vpop.f32.mrf.mxu1 }
 0x1af   :  { %v1214_v44 = vadd.f32 %v1213_v35, %v1173_v36  ;;  %v1175_v45 = vadd.f32 %v1174_v37, %v485_v32  ;;  %v7008_v32 = vcombine.high %v1519_v5, %v1527_v26  ;;  %v1511_v35 = vld [vmem:[%s10796_s5 + $0x648] sm:$0xff]  ;;  %v7007_v36 = vcombine.low %v1519_v5, %v1527_v26  ;;  %v1392_v26 = vld [vmem:[%s10796_s5 + $0x290] sm:$0xff] }
 0x1b0   :  { %v1176_v46 = vpop.f32.mrf.mxu0  ;;  %v1217_v47 = vpop.f32.mrf.mxu1  ;;  %v6992_v37 = vcombine.high %v1503_v33, %v1511_v35  ;;  %v1655_v5 = vld [vmem:[%s10796_s5 + $0xac8] sm:$0xff] }
 0x1b1   :  { %v1216_v48 = vadd.f32 %v1215_v41, %v1175_v45  ;;  %v1302_v49 = vmax.f32 %v1214_v44, 0.0  ;;  %v1487_v41 = vld [vmem:[%s10796_s5 + $0x588] sm:$0xff]  ;;  %v6991_v45 = vcombine.low %v1503_v33, %v1511_v35  ;;  %v6897_v33 = vcombine.low %v1408_v17, %v1416_v18 }
 0x1b2   :  { %v1177_v50 = vpop.f32.mrf.mxu0  ;;  %v1218_v51 = vpop.f32.mrf.mxu1  ;;  %v1495_v44 = vld [vmem:[%s10796_s5 + $0x5c8] sm:$0xff] }
 0x1b3   :  { %v1303_v52 = vmax.f32 %v1216_v48, 0.0  ;;  %v8873_v56 = vpack.c.bf16 %v1302_v49, %v1302_v49  ;;  %v6976_v46 = vcombine.high %v1487_v41, %v1495_v44  ;;  %v1471_v47 = vld [vmem:[%s10796_s5 + $0x508] sm:$0xff]  ;;  %v6975_v49 = vcombine.low %v1487_v41, %v1495_v44 }
 0x1b4   :  { %v1479_v48 = vld [vmem:[%s10796_s5 + $0x548] sm:$0xff] }
 0x1b5   :  { %v8871_v55 = vpack.c.bf16 %v1303_v52, %v1303_v52  ;;  %v6960_v50 = vcombine.high %v1471_v47, %v1479_v48  ;;  %v1455_v51 = vld [vmem:[%s10796_s5 + $0x488] sm:$0xff]  ;;  %v6959_v54 = vcombine.low %v1471_v47, %v1479_v48 }
 0x1b6   :  { %v1463_v52 = vld [vmem:[%s10796_s5 + $0x4c8] sm:$0xff] }
 0x1b7   :  { %4498 = vmatprep.mubr.bf16.mxu0 %v8871_v55  ;;  %v1615_v47 = vld [vmem:[%s10796_s5 + $0x988] sm:$0xff] }
 0x1b8   :  { %4499 = vmatmul.mubr.bf16.vlgmr.msra.gmra.mxu0 %v8873_v56  ;;  %v1623_v48 = vld [vmem:[%s10796_s5 + $0x9c8] sm:$0xff] }
 0x1b9   :  { %4549 = vmatpush1.bf16.msra.mxu0 %v6911_v34  ;;  %4580 = vmatprep.mubr.bf16.mxu0 %v8871_v55  ;;  %v6863_v34 = vcombine.low %v1375_v63, %v1383_v0 }
 0x1ba   :  { %4550 = vmatprep.subr.bf16.mxu0 %v6896_v57  ;;  %v6944_v57 = vcombine.high %v1455_v51, %v1463_v52 }
 0x1bd   :  { %4551 = vmatpush1.bf16.msra.mxu0 %v6895_v60  ;;  %v1447_v60 = vld [vmem:[%s10796_s5 + $0x448] sm:$0xff] }
 0x1be   :  { %4552 = vmatprep.subr.bf16.mxu0 %v6880_v61  ;;  %v6928_v30 = vcombine.high %v1439_v59, %v1447_v60  ;;  %v6927_v9 = vcombine.low %v1439_v59, %v1447_v60  ;;  %v1344_v59 = vld [vmem:[%s10796_s5 + $0x110] sm:$0xff] }
 0x1bf   :  { %v1352_v60 = vld [vmem:[%s10796_s5 + $0x150] sm:$0xff] }
 0x1c0   :  { %v6833_v28 = vcombine.low %v1344_v59, %v1352_v60 }
 0x1c1   :  { %4553 = vmatpush1.bf16.msra.mxu0 %v6879_v1  ;;  %v6943_v1 = vcombine.low %v1455_v51, %v1463_v52 }
 0x1c2   :  { %4554 = vmatprep.subr.bf16.mxu0 %v6864_v2 }
 0x1c5   :  { %4555 = vmatpush1.bf16.msra.mxu0 %v6863_v34 }
 0x1c6   :  { %4556 = vmatprep.subr.bf16.mxu0 %v6848_v3 }
 0x1c9   :  { %4557 = vmatpush1.bf16.msra.mxu0 %v6847_v7 }
 0x1ca   :  { %4558 = vmatprep.subr.bf16.mxu0 %v6832_v8 }
 0x1cd   :  { %4559 = vmatpush1.bf16.msra.mxu0 %v6831_v11 }
 0x1ce   :  { %4560 = vmatprep.subr.bf16.mxu0 %v6816_v12 }
 0x1d1   :  { %4561 = vmatpush1.bf16.msra.mxu0 %v6815_v15  ;;  %v1663_v15 = vld [vmem:[%s10796_s5 + $0xb08] sm:$0xff] }
 0x1d2   :  { %4562 = vmatprep.subr.bf16.mxu0 %v6800_v16  ;;  %v1671_v16 = vld [vmem:[%s10796_s5 + $0xb48] sm:$0xff] }
 0x1d3   :  { %v7152_v22 = vcombine.high %v1663_v15, %v1671_v16 }
 0x1d5   :  { %4563 = vmatpush1.bf16.msra.mxu0 %v6799_v19 }
 0x1d6   :  { %4564 = vmatprep.subr.bf16.mxu0 %v7040_v20 }
 0x1d9   :  { %4565 = vmatpush2.bf16.msra.mxu0 %v7039_v23  ;;  %v6898_v23 = vcombine.high %v1408_v17, %v1416_v18  ;;  %v1552_v17 = vld [vmem:[%s10796_s5 + $0x790] sm:$0xff] }
 0x1da   :  { %4566 = vmatprep.subr.bf16.mxu0 %v7024_v62  ;;  %v1647_v62 = vld [vmem:[%s10796_s5 + $0xa88] sm:$0xff]  ;;  %v1560_v18 = vld [vmem:[%s10796_s5 + $0x7d0] sm:$0xff] }
 0x1db   :  { %v7136_v35 = vcombine.high %v1647_v62, %v1655_v5  ;;  %v7135_v41 = vcombine.low %v1647_v62, %v1655_v5  ;;  %v7042_v62 = vcombine.high %v1552_v17, %v1560_v18  ;;  %v1791_v5 = vld [vmem:[%s10796_s5 + $0xf08] sm:$0xff] }
 0x1dd   :  { %4567 = vmatpush2.bf16.msra.mxu0 %v7023_v31  ;;  %v1400_v31 = vld [vmem:[%s10796_s5 + $0x2d0] sm:$0xff] }
 0x1de   :  { %4568 = vmatprep.subr.bf16.mxu0 %v7008_v32  ;;  %v7151_v32 = vcombine.low %v1663_v15, %v1671_v16  ;;  %v6881_v44 = vcombine.low %v1392_v26, %v1400_v31  ;;  %v1807_v15 = vld [vmem:[%s10796_s5 + $0xf88] sm:$0xff] }
 0x1df   :  { %v1815_v16 = vld [vmem:[%s10796_s5 + $0xfc8] sm:$0xff] }
 0x1e1   :  { %4569 = vmatpush2.bf16.msra.mxu0 %v7007_v36  ;;  %v6882_v36 = vcombine.high %v1392_v26, %v1400_v31  ;;  %v1799_v26 = vld [vmem:[%s10796_s5 + $0xf48] sm:$0xff]  ;;  %v1536_v31 = vld [vmem:[%s10796_s5 + $0x710] sm:$0xff] }
 0x1e2   :  { %4570 = vmatprep.subr.bf16.mxu0 %v6992_v37  ;;  %v1631_v37 = vld [vmem:[%s10796_s5 + $0xa08] sm:$0xff] }
 0x1e3   :  { %v7119_v51 = vcombine.low %v1631_v37, %v1639_v24 }
 0x1e5   :  { %4571 = vmatpush2.bf16.msra.mxu0 %v6991_v45  ;;  %v7120_v45 = vcombine.high %v1631_v37, %v1639_v24  ;;  %v1775_v24 = vld [vmem:[%s10796_s5 + $0xe88] sm:$0xff] }
 0x1e6   :  { %4572 = vmatprep.subr.bf16.mxu0 %v6976_v46 }
 0x1e9   :  { %4573 = vmatpush2.bf16.msra.mxu0 %v6975_v49  ;;  %v1360_v49 = vld [vmem:[%s10796_s5 + $0x190] sm:$0xff] }
 0x1ea   :  { %4574 = vmatprep.subr.bf16.mxu0 %v6960_v50  ;;  %v1368_v50 = vld [vmem:[%s10796_s5 + $0x1d0] sm:$0xff] }
 0x1ec   :  { %v1254_v61 = vpop.f32.mrf.mxu0  ;;  %v1295_v63 = vpop.f32.mrf.mxu1 }
 0x1ed   :  { %v1255_v0 = vadd.f32 %v1254_v61, %v489_v53  ;;  %4575 = vmatpush2.bf16.msra.mxu0 %v6959_v54  ;;  %v7104_v53 = vcombine.high %v1615_v47, %v1623_v48  ;;  %v6850_v54 = vcombine.high %v1360_v49, %v1368_v50  ;;  %v7103_v61 = vcombine.low %v1615_v47, %v1623_v48  ;;  %v1759_v48 = vld [vmem:[%s10796_s5 + $0xe08] sm:$0xff] }
 0x1ee   :  { %v1256_v2 = vpop.f32.mrf.mxu0  ;;  %v1297_v29 = vpop.f32.mrf.mxu1  ;;  %4576 = vmatprep.subr.bf16.mxu0 %v6944_v57  ;;  %v1599_v57 = vld [vmem:[%s10796_s5 + $0x908] sm:$0xff] }
 0x1ef   :  { %v1296_v34 = vadd.f32 %v1295_v63, %v1255_v0  ;;  %v1257_v3 = vadd.f32 %v1256_v2, %v493_v58  ;;  %v1607_v58 = vld [vmem:[%s10796_s5 + $0x948] sm:$0xff]  ;;  %v6849_v63 = vcombine.low %v1360_v49, %v1368_v50  ;;  %v1504_v50 = vld [vmem:[%s10796_s5 + $0x610] sm:$0xff] }
 0x1f0   :  { %v1258_v6 = vpop.f32.mrf.mxu0  ;;  %v1299_v7 = vpop.f32.mrf.mxu1  ;;  %v7088_v0 = vcombine.high %v1599_v57, %v1607_v58  ;;  %v1583_v2 = vld [vmem:[%s10796_s5 + $0x888] sm:$0xff] }
 0x1f1   :  { %v1298_v8 = vadd.f32 %v1297_v29, %v1257_v3  ;;  %4577 = vmatpush2.bf16.msra.mxu0 %v6943_v1  ;;  %v1304_v10 = vmax.f32 %v1296_v34, 0.0  ;;  %v6834_v1 = vcombine.high %v1344_v59, %v1352_v60  ;;  %v1591_v29 = vld [vmem:[%s10796_s5 + $0x8c8] sm:$0xff]  ;;  %v1336_v34 = vld [vmem:[%s10796_s5 + $0xd0] sm:$0xff]  ;;  %v7087_v3 = vcombine.low %v1599_v57, %v1607_v58 }
 0x1f2   :  { %v1259_v11 = vpop.f32.mrf.mxu0  ;;  %v1300_v12 = vpop.f32.mrf.mxu1  ;;  %4578 = vmatprep.subr.bf16.mxu0 %v6928_v30  ;;  %v1328_v30 = vld [vmem:[%s10796_s5 + $0x90] sm:$0xff]  ;;  %v7072_v4 = vcombine.high %v1583_v2, %v1591_v29  ;;  %v1567_v7 = vld [vmem:[%s10796_s5 + $0x808] sm:$0xff] }
 0x1f3   :  { %v1305_v14 = vmax.f32 %v1298_v8, 0.0  ;;  %v8989_v20 = vpack.c.bf16 %v1304_v10, %v1304_v10  ;;  %v6818_v6 = vcombine.high %v1328_v30, %v1336_v34  ;;  %v1575_v8 = vld [vmem:[%s10796_s5 + $0x848] sm:$0xff]  ;;  %v1320_v10 = vld [vmem:[%s10796_s5 + $0x50] sm:$0xff]  ;;  %v7071_v11 = vcombine.low %v1583_v2, %v1591_v29 }
 0x1f4   :  { %v6817_v12 = vcombine.low %v1328_v30, %v1336_v34  ;;  %v1767_v49 = vld [vmem:[%s10796_s5 + $0xe48] sm:$0xff]  ;;  %v1488_v60 = vld [vmem:[%s10796_s5 + $0x590] sm:$0xff] }
 0x1f5   :  { %v8987_v19 = vpack.c.bf16 %v1305_v14, %v1305_v14  ;;  %4579 = vmatpush2.bf16.msra.mxu0 %v6927_v9  ;;  %v1312_v9 = vld [vmem:[%s10796_s5 + $0x10] sm:$0xff]  ;;  %v1743_v58 = vld [vmem:[%s10796_s5 + $0xd88] sm:$0xff] }
 0x1f6   :  { %4630 = vmatprep.subr.bf16.mxu0 %v6914_v13  ;;  %v7056_v13 = vcombine.high %v1567_v7, %v1575_v8  ;;  %v6802_v14 = vcombine.high %v1312_v9, %v1320_v10  ;;  %v1751_v59 = vld [vmem:[%s10796_s5 + $0xdc8] sm:$0xff]  ;;  %v1472_v34 = vld [vmem:[%s10796_s5 + $0x510] sm:$0xff] }
 0x1f7   :  { %4539 = vmatprep.mubr.bf16.mxu1 %v8987_v19  ;;  %v1727_v29 = vld [vmem:[%s10796_s5 + $0xd08] sm:$0xff] }
 0x1f8   :  { %4540 = vmatmul.mubr.bf16.vlgmr.msra.gmra.mxu1 %v8989_v20  ;;  %4581 = vmatmul.mubr.bf16.vlgmr.msra.gmra.mxu0 %v8873_v56  ;;  %v1735_v30 = vld [vmem:[%s10796_s5 + $0xd48] sm:$0xff] }
 0x1f9   :  { %4590 = vmatpush1.bf16.msra.mxu1 %v7167_v27  ;;  %4621 = vmatprep.mubr.bf16.mxu1 %v8987_v19  ;;  %v1384_v27 = vld [vmem:[%s10796_s5 + $0x250] sm:$0xff] }
 0x1fa   :  { %4631 = vmatpush1.bf16.msra.mxu0 %v6913_v21  ;;  %4662 = vmatprep.mubr.bf16.mxu0 %v8871_v55  ;;  %v6866_v46 = vcombine.high %v1376_v25, %v1384_v27  ;;  %v6865_v52 = vcombine.low %v1376_v25, %v1384_v27  ;;  %v7055_v21 = vcombine.low %v1567_v7, %v1575_v8  ;;  %v1783_v25 = vld [vmem:[%s10796_s5 + $0xec8] sm:$0xff]  ;;  %v1520_v27 = vld [vmem:[%s10796_s5 + $0x690] sm:$0xff] }
 0x1fb   :  { %4591 = vmatprep.subr.bf16.mxu1 %v7152_v22  ;;  %4632 = vmatprep.subr.bf16.mxu0 %v6898_v23  ;;  %v6801_v22 = vcombine.low %v1312_v9, %v1320_v10  ;;  %v7296_v23 = vcombine.high %v1807_v15, %v1815_v16  ;;  %v1711_v8 = vld [vmem:[%s10796_s5 + $0xc88] sm:$0xff]  ;;  %v1456_v10 = vld [vmem:[%s10796_s5 + $0x490] sm:$0xff] }
 0x1fc   :  { %v1719_v9 = vld [vmem:[%s10796_s5 + $0xcc8] sm:$0xff] }
 0x1fd   :  { %4592 = vmatpush1.bf16.msra.mxu1 %v7151_v32  ;;  %v1544_v32 = vld [vmem:[%s10796_s5 + $0x750] sm:$0xff] }
 0x1fe   :  { %4633 = vmatpush1.bf16.msra.mxu0 %v6897_v33  ;;  %4593 = vmatprep.subr.bf16.mxu1 %v7136_v35  ;;  %v7295_v33 = vcombine.low %v1807_v15, %v1815_v16  ;;  %v7041_v35 = vcombine.low %v1552_v17, %v1560_v18  ;;  %v7026_v37 = vcombine.high %v1536_v31, %v1544_v32  ;;  %v1695_v16 = vld [vmem:[%s10796_s5 + $0xc08] sm:$0xff]  ;;  %v1440_v18 = vld [vmem:[%s10796_s5 + $0x410] sm:$0xff] }
 0x1ff   :  { %4634 = vmatprep.subr.bf16.mxu0 %v6882_v36  ;;  %v7280_v36 = vcombine.high %v1791_v5, %v1799_v26  ;;  %v1703_v17 = vld [vmem:[%s10796_s5 + $0xc48] sm:$0xff] }
 0x201   :  { %4594 = vmatpush1.bf16.msra.mxu1 %v7135_v41  ;;  %v1528_v41 = vld [vmem:[%s10796_s5 + $0x6d0] sm:$0xff] }
 0x202   :  { %4635 = vmatpush1.bf16.msra.mxu0 %v6881_v44  ;;  %4595 = vmatprep.subr.bf16.mxu1 %v7120_v45  ;;  %v7279_v44 = vcombine.low %v1791_v5, %v1799_v26  ;;  %v7025_v45 = vcombine.low %v1536_v31, %v1544_v32  ;;  %v7010_v47 = vcombine.high %v1520_v27, %v1528_v41  ;;  %v1680_v26 = vld [vmem:[%s10796_s5 + $0xb90] sm:$0xff]  ;;  %v1425_v32 = vld [vmem:[%s10796_s5 + $0x398] sm:$0xff] }
 0x203   :  { %4636 = vmatprep.subr.bf16.mxu0 %v6866_v46  ;;  %v7264_v46 = vcombine.high %v1775_v24, %v1783_v25  ;;  %v1688_v31 = vld [vmem:[%s10796_s5 + $0xbd0] sm:$0xff] }
 0x205   :  { %4596 = vmatpush1.bf16.msra.mxu1 %v7119_v51  ;;  %v1512_v51 = vld [vmem:[%s10796_s5 + $0x650] sm:$0xff] }
 0x206   :  { %4637 = vmatpush1.bf16.msra.mxu0 %v6865_v52  ;;  %4597 = vmatprep.subr.bf16.mxu1 %v7104_v53  ;;  %v7263_v52 = vcombine.low %v1775_v24, %v1783_v25  ;;  %v7009_v53 = vcombine.low %v1520_v27, %v1528_v41  ;;  %v6994_v57 = vcombine.high %v1504_v50, %v1512_v51  ;;  %v1664_v25 = vld [vmem:[%s10796_s5 + $0xb10] sm:$0xff] }
 0x207   :  { %4638 = vmatprep.subr.bf16.mxu0 %v6850_v54  ;;  %v7248_v54 = vcombine.high %v1759_v48, %v1767_v49  ;;  %v1672_v27 = vld [vmem:[%s10796_s5 + $0xb50] sm:$0xff]  ;;  %v7169_v41 = vcombine.low %v1680_v26, %v1688_v31 }
 0x209   :  { %4598 = vmatpush1.bf16.msra.mxu1 %v7103_v61  ;;  %v1496_v61 = vld [vmem:[%s10796_s5 + $0x5d0] sm:$0xff] }
 0x20a   :  { %4639 = vmatpush1.bf16.msra.mxu0 %v6849_v63  ;;  %4599 = vmatprep.subr.bf16.mxu1 %v7088_v0  ;;  %v7247_v63 = vcombine.low %v1759_v48, %v1767_v49  ;;  %v6993_v0 = vcombine.low %v1504_v50, %v1512_v51  ;;  %v6978_v2 = vcombine.high %v1488_v60, %v1496_v61  ;;  %v1648_v48 = vld [vmem:[%s10796_s5 + $0xa90] sm:$0xff]  ;;  %v1393_v51 = vld [vmem:[%s10796_s5 + $0x298] sm:$0xff] }
 0x20b   :  { %4640 = vmatprep.subr.bf16.mxu0 %v6834_v1  ;;  %v7232_v1 = vcombine.high %v1743_v58, %v1751_v59  ;;  %v1656_v49 = vld [vmem:[%s10796_s5 + $0xad0] sm:$0xff] }
 0x20d   :  { %4600 = vmatpush1.bf16.msra.mxu1 %v7087_v3  ;;  %v1480_v3 = vld [vmem:[%s10796_s5 + $0x550] sm:$0xff] }
 0x20e   :  { %4641 = vmatpush1.bf16.msra.mxu0 %v6833_v28  ;;  %4601 = vmatprep.subr.bf16.mxu1 %v7072_v4  ;;  %v7231_v28 = vcombine.low %v1743_v58, %v1751_v59  ;;  %v6977_v4 = vcombine.low %v1488_v60, %v1496_v61  ;;  %v6962_v7 = vcombine.high %v1472_v34, %v1480_v3  ;;  %v1632_v59 = vld [vmem:[%s10796_s5 + $0xa10] sm:$0xff]  ;;  %v1377_v61 = vld [vmem:[%s10796_s5 + $0x218] sm:$0xff] }
 0x20f   :  { %4642 = vmatprep.subr.bf16.mxu0 %v6818_v6  ;;  %v7216_v6 = vcombine.high %v1727_v29, %v1735_v30  ;;  %v1640_v60 = vld [vmem:[%s10796_s5 + $0xa50] sm:$0xff] }
 0x211   :  { %4602 = vmatpush1.bf16.msra.mxu1 %v7071_v11  ;;  %v1464_v11 = vld [vmem:[%s10796_s5 + $0x4d0] sm:$0xff] }
 0x212   :  { %4643 = vmatpush1.bf16.msra.mxu0 %v6817_v12  ;;  %4603 = vmatprep.subr.bf16.mxu1 %v7056_v13  ;;  %v7215_v12 = vcombine.low %v1727_v29, %v1735_v30  ;;  %v6961_v13 = vcombine.low %v1472_v34, %v1480_v3  ;;  %v6946_v15 = vcombine.high %v1456_v10, %v1464_v11  ;;  %v1616_v30 = vld [vmem:[%s10796_s5 + $0x990] sm:$0xff]  ;;  %v1361_v3 = vld [vmem:[%s10796_s5 + $0x198] sm:$0xff] }
 0x213   :  { %4644 = vmatprep.subr.bf16.mxu0 %v6802_v14  ;;  %v7200_v14 = vcombine.high %v1711_v8, %v1719_v9  ;;  %v1624_v34 = vld [vmem:[%s10796_s5 + $0x9d0] sm:$0xff] }
 0x215   :  { %4604 = vmatpush1.bf16.msra.mxu1 %v7055_v21  ;;  %v1448_v21 = vld [vmem:[%s10796_s5 + $0x450] sm:$0xff] }
 0x216   :  { %4645 = vmatpush1.bf16.msra.mxu0 %v6801_v22  ;;  %4605 = vmatprep.subr.bf16.mxu1 %v7296_v23  ;;  %v7199_v22 = vcombine.low %v1711_v8, %v1719_v9  ;;  %v6945_v23 = vcombine.low %v1456_v10, %v1464_v11  ;;  %v6930_v5 = vcombine.high %v1440_v18, %v1448_v21  ;;  %v1600_v9 = vld [vmem:[%s10796_s5 + $0x910] sm:$0xff]  ;;  %v1345_v11 = vld [vmem:[%s10796_s5 + $0x118] sm:$0xff] }
 0x217   :  { %4646 = vmatprep.subr.bf16.mxu0 %v7042_v62  ;;  %v7184_v62 = vcombine.high %v1695_v16, %v1703_v17  ;;  %v1608_v10 = vld [vmem:[%s10796_s5 + $0x950] sm:$0xff] }
 0x219   :  { %4606 = vmatpush2.bf16.msra.mxu1 %v7295_v33  ;;  %v1433_v33 = vld [vmem:[%s10796_s5 + $0x3d8] sm:$0xff] }
 0x21a   :  { %4647 = vmatpush2.bf16.msra.mxu0 %v7041_v35  ;;  %4607 = vmatprep.subr.bf16.mxu1 %v7280_v36  ;;  %v7183_v35 = vcombine.low %v1695_v16, %v1703_v17  ;;  %v6929_v36 = vcombine.low %v1440_v18, %v1448_v21  ;;  %v6916_v24 = vcombine.high %v1425_v32, %v1433_v33  ;;  %v1584_v17 = vld [vmem:[%s10796_s5 + $0x890] sm:$0xff]  ;;  %v1329_v21 = vld [vmem:[%s10796_s5 + $0x98] sm:$0xff] }
 0x21b   :  { %4648 = vmatprep.subr.bf16.mxu0 %v7026_v37  ;;  %v7170_v37 = vcombine.high %v1680_v26, %v1688_v31  ;;  %v1592_v18 = vld [vmem:[%s10796_s5 + $0x8d0] sm:$0xff] }
 0x21c   :  { %v1568_v31 = vld [vmem:[%s10796_s5 + $0x810] sm:$0xff] }
 0x21d   :  { %4608 = vmatpush2.bf16.msra.mxu1 %v7279_v44  ;;  %v1409_v44 = vld [vmem:[%s10796_s5 + $0x318] sm:$0xff] }
 0x21e   :  { %4649 = vmatpush2.bf16.msra.mxu0 %v7025_v45  ;;  %4609 = vmatprep.subr.bf16.mxu1 %v7264_v46  ;;  %v1417_v45 = vld [vmem:[%s10796_s5 + $0x358] sm:$0xff]  ;;  %v6915_v46 = vcombine.low %v1425_v32, %v1433_v33  ;;  %v1576_v32 = vld [vmem:[%s10796_s5 + $0x850] sm:$0xff] }
 0x21f   :  { %4650 = vmatprep.subr.bf16.mxu0 %v7010_v47  ;;  %v7154_v47 = vcombine.high %v1664_v25, %v1672_v27  ;;  %v6900_v50 = vcombine.high %v1409_v44, %v1417_v45  ;;  %v1313_v33 = vld [vmem:[%s10796_s5 + $0x18] sm:$0xff] }
 0x221   :  { %4610 = vmatpush2.bf16.msra.mxu1 %v7263_v52  ;;  %v1401_v52 = vld [vmem:[%s10796_s5 + $0x2d8] sm:$0xff] }
 0x222   :  { %4651 = vmatpush2.bf16.msra.mxu0 %v7009_v53  ;;  %4611 = vmatprep.subr.bf16.mxu1 %v7248_v54  ;;  %v7153_v53 = vcombine.low %v1664_v25, %v1672_v27  ;;  %v6899_v54 = vcombine.low %v1409_v44, %v1417_v45  ;;  %v6884_v58 = vcombine.high %v1393_v51, %v1401_v52  ;;  %v1808_v27 = vld [vmem:[%s10796_s5 + $0xf90] sm:$0xff]  ;;  %v1553_v44 = vld [vmem:[%s10796_s5 + $0x798] sm:$0xff] }
 0x223   :  { %4652 = vmatprep.subr.bf16.mxu0 %v6994_v57  ;;  %v7138_v57 = vcombine.high %v1648_v48, %v1656_v49  ;;  %v1561_v45 = vld [vmem:[%s10796_s5 + $0x7d8] sm:$0xff] }
 0x225   :  { %4612 = vmatpush2.bf16.msra.mxu1 %v7247_v63  ;;  %v1385_v63 = vld [vmem:[%s10796_s5 + $0x258] sm:$0xff] }
 0x226   :  { %4653 = vmatpush2.bf16.msra.mxu0 %v6993_v0  ;;  %4613 = vmatprep.subr.bf16.mxu1 %v7232_v1  ;;  %v7137_v0 = vcombine.low %v1648_v48, %v1656_v49  ;;  %v6883_v1 = vcombine.low %v1393_v51, %v1401_v52  ;;  %v6868_v29 = vcombine.high %v1377_v61, %v1385_v63  ;;  %v1800_v51 = vld [vmem:[%s10796_s5 + $0xf50] sm:$0xff]  ;;  %v1537_v52 = vld [vmem:[%s10796_s5 + $0x718] sm:$0xff] }
 0x227   :  { %4654 = vmatprep.subr.bf16.mxu0 %v6978_v2  ;;  %v7122_v2 = vcombine.high %v1632_v59, %v1640_v60  ;;  %v7044_v49 = vcombine.high %v1553_v44, %v1561_v45 }
 0x229   :  { %4614 = vmatpush2.bf16.msra.mxu1 %v7231_v28  ;;  %v1369_v28 = vld [vmem:[%s10796_s5 + $0x1d8] sm:$0xff] }
 0x22a   :  { %4655 = vmatpush2.bf16.msra.mxu0 %v6977_v4  ;;  %4615 = vmatprep.subr.bf16.mxu1 %v7216_v6  ;;  %v7121_v4 = vcombine.low %v1632_v59, %v1640_v60  ;;  %v6867_v6 = vcombine.low %v1377_v61, %v1385_v63  ;;  %v6852_v8 = vcombine.high %v1361_v3, %v1369_v28  ;;  %v1776_v60 = vld [vmem:[%s10796_s5 + $0xe90] sm:$0xff]  ;;  %v1521_v63 = vld [vmem:[%s10796_s5 + $0x698] sm:$0xff] }
 0x22b   :  { %4656 = vmatprep.subr.bf16.mxu0 %v6962_v7  ;;  %v7106_v7 = vcombine.high %v1616_v30, %v1624_v34  ;;  %v1784_v61 = vld [vmem:[%s10796_s5 + $0xed0] sm:$0xff] }
 0x22d   :  { %4616 = vmatpush2.bf16.msra.mxu1 %v7215_v12  ;;  %v1353_v12 = vld [vmem:[%s10796_s5 + $0x158] sm:$0xff] }
 0x22e   :  { %4657 = vmatpush2.bf16.msra.mxu0 %v6961_v13  ;;  %4617 = vmatprep.subr.bf16.mxu1 %v7200_v14  ;;  %v7105_v13 = vcombine.low %v1616_v30, %v1624_v34  ;;  %v6851_v14 = vcombine.low %v1361_v3, %v1369_v28  ;;  %v6836_v16 = vcombine.high %v1345_v11, %v1353_v12  ;;  %v1760_v34 = vld [vmem:[%s10796_s5 + $0xe10] sm:$0xff]  ;;  %v1505_v28 = vld [vmem:[%s10796_s5 + $0x618] sm:$0xff] }
 0x22f   :  { %4658 = vmatprep.subr.bf16.mxu0 %v6946_v15  ;;  %v7090_v15 = vcombine.high %v1600_v9, %v1608_v10  ;;  %v1768_v3 = vld [vmem:[%s10796_s5 + $0xe50] sm:$0xff] }
 0x231   :  { %4618 = vmatpush2.bf16.msra.mxu1 %v7199_v22  ;;  %v1337_v22 = vld [vmem:[%s10796_s5 + $0xd8] sm:$0xff] }
 0x232   :  { %4659 = vmatpush2.bf16.msra.mxu0 %v6945_v23  ;;  %4619 = vmatprep.subr.bf16.mxu1 %v7184_v62  ;;  %v7089_v23 = vcombine.low %v1600_v9, %v1608_v10  ;;  %v6835_v62 = vcombine.low %v1345_v11, %v1353_v12  ;;  %v6820_v26 = vcombine.high %v1329_v21, %v1337_v22  ;;  %v1744_v10 = vld [vmem:[%s10796_s5 + $0xd90] sm:$0xff]  ;;  %v1489_v12 = vld [vmem:[%s10796_s5 + $0x598] sm:$0xff] }
 0x233   :  { %4660 = vmatprep.subr.bf16.mxu0 %v6930_v5  ;;  %v7074_v5 = vcombine.high %v1584_v17, %v1592_v18  ;;  %v1752_v11 = vld [vmem:[%s10796_s5 + $0xdd0] sm:$0xff] }
 0x235   :  { %4620 = vmatpush2.bf16.msra.mxu1 %v7183_v35  ;;  %v1321_v35 = vld [vmem:[%s10796_s5 + $0x58] sm:$0xff] }
 0x236   :  { %4661 = vmatpush2.bf16.msra.mxu0 %v6929_v36  ;;  %4671 = vmatprep.subr.bf16.mxu1 %v7170_v37  ;;  %v7073_v36 = vcombine.low %v1584_v17, %v1592_v18  ;;  %v6819_v37 = vcombine.low %v1329_v21, %v1337_v22  ;;  %v6804_v25 = vcombine.high %v1313_v33, %v1321_v35  ;;  %v1728_v18 = vld [vmem:[%s10796_s5 + $0xd10] sm:$0xff]  ;;  %v1473_v22 = vld [vmem:[%s10796_s5 + $0x518] sm:$0xff] }
 0x237   :  { %4712 = vmatprep.subr.bf16.mxu0 %v6916_v24  ;;  %v7058_v24 = vcombine.high %v1568_v31, %v1576_v32  ;;  %v1736_v21 = vld [vmem:[%s10796_s5 + $0xd50] sm:$0xff] }
 0x238   :  { %4622 = vmatmul.mubr.bf16.vlgmr.msra.gmra.mxu1 %v8989_v20 }
 0x239   :  { %4663 = vmatmul.mubr.bf16.vlgmr.msra.gmra.mxu0 %v8873_v56  ;;  %4672 = vmatpush1.bf16.msra.mxu1 %v7169_v41  ;;  %v1816_v41 = vld [vmem:[%s10796_s5 + $0xfd0] sm:$0xff] }
 0x23a   :  { %4703 = vmatprep.mubr.bf16.mxu1 %v8987_v19  ;;  %4713 = vmatpush1.bf16.msra.mxu0 %v6915_v46  ;;  %v7057_v46 = vcombine.low %v1568_v31, %v1576_v32  ;;  %v7298_v48 = vcombine.high %v1808_v27, %v1816_v41  ;;  %v1712_v32 = vld [vmem:[%s10796_s5 + $0xc90] sm:$0xff] }
 0x23b   :  { %4744 = vmatprep.mubr.bf16.mxu0 %v8871_v55  ;;  %4673 = vmatprep.subr.bf16.mxu1 %v7154_v47  ;;  %v6803_v47 = vcombine.low %v1313_v33, %v1321_v35  ;;  %v1720_v33 = vld [vmem:[%s10796_s5 + $0xcd0] sm:$0xff]  ;;  %v1457_v35 = vld [vmem:[%s10796_s5 + $0x498] sm:$0xff] }
 0x23c   :  { %4714 = vmatprep.subr.bf16.mxu0 %v6900_v50  ;;  %v1792_v50 = vld [vmem:[%s10796_s5 + $0xf10] sm:$0xff] }
 0x23d   :  { %4674 = vmatpush1.bf16.msra.mxu1 %v7153_v53  ;;  %v1545_v53 = vld [vmem:[%s10796_s5 + $0x758] sm:$0xff] }
 0x23e   :  { %4715 = vmatpush1.bf16.msra.mxu0 %v6899_v54  ;;  %4675 = vmatprep.subr.bf16.mxu1 %v7138_v57  ;;  %v7297_v54 = vcombine.low %v1808_v27, %v1816_v41  ;;  %v7043_v57 = vcombine.low %v1553_v44, %v1561_v45  ;;  %v7028_v59 = vcombine.high %v1537_v52, %v1545_v53  ;;  %v1696_v41 = vld [vmem:[%s10796_s5 + $0xc10] sm:$0xff]  ;;  %v1441_v45 = vld [vmem:[%s10796_s5 + $0x418] sm:$0xff] }
 0x23f   :  { %4716 = vmatprep.subr.bf16.mxu0 %v6884_v58  ;;  %v7282_v58 = vcombine.high %v1792_v50, %v1800_v51  ;;  %v1704_v44 = vld [vmem:[%s10796_s5 + $0xc50] sm:$0xff] }
 0x241   :  { %4676 = vmatpush1.bf16.msra.mxu1 %v7137_v0  ;;  %v1529_v0 = vld [vmem:[%s10796_s5 + $0x6d8] sm:$0xff] }
 0x242   :  { %4717 = vmatpush1.bf16.msra.mxu0 %v6883_v1  ;;  %4677 = vmatprep.subr.bf16.mxu1 %v7122_v2  ;;  %v7281_v1 = vcombine.low %v1792_v50, %v1800_v51  ;;  %v7027_v2 = vcombine.low %v1537_v52, %v1545_v53  ;;  %v7012_v30 = vcombine.high %v1521_v63, %v1529_v0  ;;  %v1681_v51 = vld [vmem:[%s10796_s5 + $0xb98] sm:$0xff]  ;;  %v1426_v53 = vld [vmem:[%s10796_s5 + $0x3a0] sm:$0xff] }
 0x243   :  { %4718 = vmatprep.subr.bf16.mxu0 %v6868_v29  ;;  %v7266_v29 = vcombine.high %v1776_v60, %v1784_v61  ;;  %v1689_v52 = vld [vmem:[%s10796_s5 + $0xbd8] sm:$0xff] }
 0x245   :  { %4678 = vmatpush1.bf16.msra.mxu1 %v7121_v4  ;;  %v1513_v4 = vld [vmem:[%s10796_s5 + $0x658] sm:$0xff] }
 0x246   :  { %4719 = vmatpush1.bf16.msra.mxu0 %v6867_v6  ;;  %4679 = vmatprep.subr.bf16.mxu1 %v7106_v7  ;;  %v7265_v6 = vcombine.low %v1776_v60, %v1784_v61  ;;  %v7011_v7 = vcombine.low %v1521_v63, %v1529_v0  ;;  %v6996_v9 = vcombine.high %v1505_v28, %v1513_v4  ;;  %v1665_v61 = vld [vmem:[%s10796_s5 + $0xb18] sm:$0xff] }
 0x247   :  { %4720 = vmatprep.subr.bf16.mxu0 %v6852_v8  ;;  %v7250_v8 = vcombine.high %v1760_v34, %v1768_v3  ;;  %v1673_v63 = vld [vmem:[%s10796_s5 + $0xb58] sm:$0xff]  ;;  %v7171_v0 = vcombine.low %v1681_v51, %v1689_v52 }
 0x249   :  { %4680 = vmatpush1.bf16.msra.mxu1 %v7105_v13  ;;  %v1497_v13 = vld [vmem:[%s10796_s5 + $0x5d8] sm:$0xff] }
 0x24a   :  { %4721 = vmatpush1.bf16.msra.mxu0 %v6851_v14  ;;  %4681 = vmatprep.subr.bf16.mxu1 %v7090_v15  ;;  %v7249_v14 = vcombine.low %v1760_v34, %v1768_v3  ;;  %v6995_v15 = vcombine.low %v1505_v28, %v1513_v4  ;;  %v6980_v17 = vcombine.high %v1489_v12, %v1497_v13  ;;  %v1649_v34 = vld [vmem:[%s10796_s5 + $0xa98] sm:$0xff] }
 0x24b   :  { %4722 = vmatprep.subr.bf16.mxu0 %v6836_v16  ;;  %v7234_v16 = vcombine.high %v1744_v10, %v1752_v11  ;;  %v1657_v3 = vld [vmem:[%s10796_s5 + $0xad8] sm:$0xff] }
 0x24d   :  { %4682 = vmatpush1.bf16.msra.mxu1 %v7089_v23  ;;  %v1481_v23 = vld [vmem:[%s10796_s5 + $0x558] sm:$0xff] }
 0x24e   :  { %4723 = vmatpush1.bf16.msra.mxu0 %v6835_v62  ;;  %4683 = vmatprep.subr.bf16.mxu1 %v7074_v5  ;;  %v7233_v62 = vcombine.low %v1744_v10, %v1752_v11  ;;  %v6979_v5 = vcombine.low %v1489_v12, %v1497_v13  ;;  %v6964_v31 = vcombine.high %v1473_v22, %v1481_v23  ;;  %v1633_v13 = vld [vmem:[%s10796_s5 + $0xa18] sm:$0xff] }
 0x24f   :  { %4724 = vmatprep.subr.bf16.mxu0 %v6820_v26  ;;  %v7218_v26 = vcombine.high %v1728_v18, %v1736_v21  ;;  %v7140_v11 = vcombine.high %v1649_v34, %v1657_v3 }
 0x251   :  { %4684 = vmatpush1.bf16.msra.mxu1 %v7073_v36  ;;  %v1465_v36 = vld [vmem:[%s10796_s5 + $0x4d8] sm:$0xff] }
 0x252   :  { %4725 = vmatpush1.bf16.msra.mxu0 %v6819_v37  ;;  %4685 = vmatprep.subr.bf16.mxu1 %v7058_v24  ;;  %v7217_v37 = vcombine.low %v1728_v18, %v1736_v21  ;;  %v6963_v24 = vcombine.low %v1473_v22, %v1481_v23  ;;  %v6948_v27 = vcombine.high %v1457_v35, %v1465_v36 }
 0x253   :  { %4726 = vmatprep.subr.bf16.mxu0 %v6804_v25  ;;  %v7202_v25 = vcombine.high %v1712_v32, %v1720_v33  ;;  %v7139_v18 = vcombine.low %v1649_v34, %v1657_v3  ;;  %v1554_v34 = vld [vmem:[%s10796_s5 + $0x7a0] sm:$0xff] }
 0x254   :  { %v1562_v3 = vld [vmem:[%s10796_s5 + $0x7e0] sm:$0xff] }
 0x255   :  { %4686 = vmatpush1.bf16.msra.mxu1 %v7057_v46  ;;  %v1449_v46 = vld [vmem:[%s10796_s5 + $0x458] sm:$0xff] }
 0x256   :  { %4727 = vmatpush1.bf16.msra.mxu0 %v6803_v47  ;;  %4687 = vmatprep.subr.bf16.mxu1 %v7298_v48  ;;  %v7201_v47 = vcombine.low %v1712_v32, %v1720_v33  ;;  %v6947_v48 = vcombine.low %v1457_v35, %v1465_v36  ;;  %v6932_v50 = vcombine.high %v1441_v45, %v1449_v46  ;;  %v1370_v32 = vld [vmem:[%s10796_s5 + $0x1e0] sm:$0xff] }
 0x257   :  { %4728 = vmatprep.subr.bf16.mxu0 %v7044_v49  ;;  %v7186_v49 = vcombine.high %v1696_v41, %v1704_v44 }
 0x259   :  { %4688 = vmatpush2.bf16.msra.mxu1 %v7297_v54  ;;  %v1434_v54 = vld [vmem:[%s10796_s5 + $0x3e0] sm:$0xff] }
 0x25a   :  { %4729 = vmatpush2.bf16.msra.mxu0 %v7043_v57  ;;  %4689 = vmatprep.subr.bf16.mxu1 %v7282_v58  ;;  %v7185_v57 = vcombine.low %v1696_v41, %v1704_v44  ;;  %v6931_v58 = vcombine.low %v1441_v45, %v1449_v46  ;;  %v6918_v60 = vcombine.high %v1426_v53, %v1434_v54  ;;  %v1354_v41 = vld [vmem:[%s10796_s5 + $0x160] sm:$0xff] }
 0x25b   :  { %4730 = vmatprep.subr.bf16.mxu0 %v7028_v59  ;;  %v7172_v59 = vcombine.high %v1681_v51, %v1689_v52  ;;  %v1338_v51 = vld [vmem:[%s10796_s5 + $0xe0] sm:$0xff] }
 0x25d   :  { %4690 = vmatpush2.bf16.msra.mxu1 %v7281_v1  ;;  %v1410_v1 = vld [vmem:[%s10796_s5 + $0x320] sm:$0xff] }
 0x25e   :  { %4731 = vmatpush2.bf16.msra.mxu0 %v7027_v2  ;;  %4691 = vmatprep.subr.bf16.mxu1 %v7266_v29  ;;  %v1418_v2 = vld [vmem:[%s10796_s5 + $0x360] sm:$0xff]  ;;  %v6917_v29 = vcombine.low %v1426_v53, %v1434_v54 }
 0x25f   :  { %4732 = vmatprep.subr.bf16.mxu0 %v7012_v30  ;;  %v7156_v30 = vcombine.high %v1665_v61, %v1673_v63  ;;  %v6902_v4 = vcombine.high %v1410_v1, %v1418_v2  ;;  %v6901_v10 = vcombine.low %v1410_v1, %v1418_v2 }
 0x261   :  { %4692 = vmatpush2.bf16.msra.mxu1 %v7265_v6  ;;  %v1394_v6 = vld [vmem:[%s10796_s5 + $0x2a0] sm:$0xff] }
 0x262   :  { %4733 = vmatpush2.bf16.msra.mxu0 %v7011_v7  ;;  %4693 = vmatprep.subr.bf16.mxu1 %v7250_v8  ;;  %v1402_v7 = vld [vmem:[%s10796_s5 + $0x2e0] sm:$0xff]  ;;  %v7155_v8 = vcombine.low %v1665_v61, %v1673_v63 }
 0x263   :  { %4734 = vmatprep.subr.bf16.mxu0 %v6996_v9  ;;  %v6886_v12 = vcombine.high %v1394_v6, %v1402_v7  ;;  %v6885_v22 = vcombine.low %v1394_v6, %v1402_v7  ;;  %v1322_v61 = vld [vmem:[%s10796_s5 + $0x60] sm:$0xff] }
 0x265   :  { %4694 = vmatpush2.bf16.msra.mxu1 %v7249_v14  ;;  %v1641_v14 = vld [vmem:[%s10796_s5 + $0xa58] sm:$0xff] }
 0x266   :  { %4735 = vmatpush2.bf16.msra.mxu0 %v6995_v15  ;;  %4695 = vmatprep.subr.bf16.mxu1 %v7234_v16  ;;  %v1378_v16 = vld [vmem:[%s10796_s5 + $0x220] sm:$0xff]  ;;  %v7124_v23 = vcombine.high %v1633_v13, %v1641_v14  ;;  %v7123_v33 = vcombine.low %v1633_v13, %v1641_v14 }
 0x267   :  { %4736 = vmatprep.subr.bf16.mxu0 %v6980_v17  ;;  %v1386_v17 = vld [vmem:[%s10796_s5 + $0x260] sm:$0xff] }
 0x268   :  { %v6869_v35 = vcombine.low %v1378_v16, %v1386_v17  ;;  %v1546_v13 = vld [vmem:[%s10796_s5 + $0x760] sm:$0xff] }
 0x269   :  { %4696 = vmatpush2.bf16.msra.mxu1 %v7233_v62  ;;  %v6870_v62 = vcombine.high %v1378_v16, %v1386_v17 }
 0x26a   :  { %4737 = vmatpush2.bf16.msra.mxu0 %v6979_v5  ;;  %4697 = vmatprep.subr.bf16.mxu1 %v7218_v26  ;;  %v1617_v5 = vld [vmem:[%s10796_s5 + $0x998] sm:$0xff] }
 0x26b   :  { %4738 = vmatprep.subr.bf16.mxu0 %v6964_v31  ;;  %v1625_v26 = vld [vmem:[%s10796_s5 + $0x9d8] sm:$0xff]  ;;  %v1362_v31 = vld [vmem:[%s10796_s5 + $0x1a0] sm:$0xff] }
 0x26c   :  { %v7108_v36 = vcombine.high %v1617_v5, %v1625_v26  ;;  %v7107_v44 = vcombine.low %v1617_v5, %v1625_v26  ;;  %v6853_v45 = vcombine.low %v1362_v31, %v1370_v32 }
 0x26d   :  { %4698 = vmatpush2.bf16.msra.mxu1 %v7217_v37  ;;  %v6854_v37 = vcombine.high %v1362_v31, %v1370_v32  ;;  %v1761_v32 = vld [vmem:[%s10796_s5 + $0xe18] sm:$0xff] }
 0x26e   :  { %4739 = vmatpush2.bf16.msra.mxu0 %v6963_v24  ;;  %4699 = vmatprep.subr.bf16.mxu1 %v7202_v25  ;;  %v1601_v24 = vld [vmem:[%s10796_s5 + $0x918] sm:$0xff] }
 0x26f   :  { %4740 = vmatprep.subr.bf16.mxu0 %v6948_v27  ;;  %v1609_v25 = vld [vmem:[%s10796_s5 + $0x958] sm:$0xff]  ;;  %v1346_v27 = vld [vmem:[%s10796_s5 + $0x120] sm:$0xff] }
 0x270   :  { %v7092_v46 = vcombine.high %v1601_v24, %v1609_v25  ;;  %v7091_v52 = vcombine.low %v1601_v24, %v1609_v25  ;;  %v6837_v53 = vcombine.low %v1346_v27, %v1354_v41 }
 0x271   :  { %4700 = vmatpush2.bf16.msra.mxu1 %v7201_v47  ;;  %v6838_v47 = vcombine.high %v1346_v27, %v1354_v41  ;;  %v1745_v41 = vld [vmem:[%s10796_s5 + $0xd98] sm:$0xff] }
 0x272   :  { %4741 = vmatpush2.bf16.msra.mxu0 %v6947_v48  ;;  %4701 = vmatprep.subr.bf16.mxu1 %v7186_v49  ;;  %v1585_v48 = vld [vmem:[%s10796_s5 + $0x898] sm:$0xff] }
 0x273   :  { %4742 = vmatprep.subr.bf16.mxu0 %v6932_v50  ;;  %v1593_v49 = vld [vmem:[%s10796_s5 + $0x8d8] sm:$0xff]  ;;  %v1330_v50 = vld [vmem:[%s10796_s5 + $0xa0] sm:$0xff] }
 0x274   :  { %v7076_v54 = vcombine.high %v1585_v48, %v1593_v49  ;;  %v7075_v63 = vcombine.low %v1585_v48, %v1593_v49 }
 0x275   :  { %4702 = vmatpush2.bf16.msra.mxu1 %v7185_v57  ;;  %v6822_v57 = vcombine.high %v1330_v50, %v1338_v51 }
 0x276   :  { %4743 = vmatpush2.bf16.msra.mxu0 %v6931_v58  ;;  %4753 = vmatprep.subr.bf16.mxu1 %v7172_v59  ;;  %v1569_v58 = vld [vmem:[%s10796_s5 + $0x818] sm:$0xff] }
 0x277   :  { %4794 = vmatprep.subr.bf16.mxu0 %v6918_v60  ;;  %v1577_v59 = vld [vmem:[%s10796_s5 + $0x858] sm:$0xff]  ;;  %v1314_v60 = vld [vmem:[%s10796_s5 + $0x20] sm:$0xff] }
 0x278   :  { %4704 = vmatmul.mubr.bf16.vlgmr.msra.gmra.mxu1 %v8989_v20  ;;  %v9394_v28 = vpop.f32.mrf.mxu0  ;;  %v7060_v1 = vcombine.high %v1569_v58, %v1577_v59  ;;  %v6806_v2 = vcombine.high %v1314_v60, %v1322_v61  ;;  %v6805_v6 = vcombine.low %v1314_v60, %v1322_v61  ;;  %v1713_v61 = vld [vmem:[%s10796_s5 + $0xc98] sm:$0xff] }
 0x279   :  { %4745 = vmatmul.mubr.bf16.vlgmr.msra.gmra.mxu0 %v8873_v56  ;;  %4754 = vmatpush1.bf16.msra.mxu1 %v7171_v0  ;;  %v6821_v0 = vcombine.low %v1330_v50, %v1338_v51  ;;  %v1729_v51 = vld [vmem:[%s10796_s5 + $0xd18] sm:$0xff] }
 0x27a   :  { %4785 = vmatprep.mubr.bf16.mxu1 %v8987_v19  ;;  %4795 = vmatpush1.bf16.msra.mxu0 %v6917_v29  ;;  %v9404_v9 = vpop.f32.mrf.mxu0  ;;  %v1809_v29 = vld [vmem:[%s10796_s5 + $0xf98] sm:$0xff] }
 0x27b   :  { %4826 = vmatprep.mubr.bf16.mxu0 %v8871_v55  ;;  %4755 = vmatprep.subr.bf16.mxu1 %v7156_v30  ;;  %v1817_v30 = vld [vmem:[%s10796_s5 + $0xfd8] sm:$0xff] }
 0x27c   :  { %4796 = vmatprep.subr.bf16.mxu0 %v6902_v4  ;;  %v4504_v15 = vpop.f32.mrf.mxu0  ;;  %v7059_v4 = vcombine.low %v1569_v58, %v1577_v59  ;;  %v7300_v7 = vcombine.high %v1809_v29, %v1817_v30  ;;  %v7299_v14 = vcombine.low %v1809_v29, %v1817_v30 }
 0x27d   :  { %4756 = vmatpush1.bf16.msra.mxu1 %v7155_v8  ;;  %v7046_v8 = vcombine.high %v1554_v34, %v1562_v3  ;;  %v7045_v15 = vcombine.low %v1554_v34, %v1562_v3  ;;  %v1697_v3 = vld [vmem:[%s10796_s5 + $0xc18] sm:$0xff] }
 0x27e   :  { %4797 = vmatpush1.bf16.msra.mxu0 %v6901_v10  ;;  %v4505_v21 = vpop.f32.mrf.mxu0  ;;  %4757 = vmatprep.subr.bf16.mxu1 %v7140_v11  ;;  %v1793_v10 = vld [vmem:[%s10796_s5 + $0xf18] sm:$0xff] }
 0x27f   :  { %4798 = vmatprep.subr.bf16.mxu0 %v6886_v12  ;;  %v1801_v11 = vld [vmem:[%s10796_s5 + $0xf58] sm:$0xff]  ;;  %v1538_v12 = vld [vmem:[%s10796_s5 + $0x720] sm:$0xff] }
 0x280   :  { %v7284_v16 = vcombine.high %v1793_v10, %v1801_v11  ;;  %v7030_v17 = vcombine.high %v1538_v12, %v1546_v13  ;;  %v1785_v21 = vld [vmem:[%s10796_s5 + $0xed8] sm:$0xff]  ;;  %v7029_v5 = vcombine.low %v1538_v12, %v1546_v13  ;;  %v1682_v13 = vld [vmem:[%s10796_s5 + $0xba0] sm:$0xff] }
 0x281   :  { %4758 = vmatpush1.bf16.msra.mxu1 %v7139_v18  ;;  %v1777_v18 = vld [vmem:[%s10796_s5 + $0xe98] sm:$0xff] }
 0x282   :  { %4799 = vmatpush1.bf16.msra.mxu0 %v6885_v22  ;;  %4759 = vmatprep.subr.bf16.mxu1 %v7124_v23  ;;  %v1522_v22 = vld [vmem:[%s10796_s5 + $0x6a0] sm:$0xff]  ;;  %v7268_v26 = vcombine.high %v1777_v18, %v1785_v21 }
 0x283   :  { %4800 = vmatprep.subr.bf16.mxu0 %v6870_v62  ;;  %v1530_v23 = vld [vmem:[%s10796_s5 + $0x6e0] sm:$0xff]  ;;  %v7283_v62 = vcombine.low %v1793_v10, %v1801_v11 }
 0x284   :  { %v7014_v31 = vcombine.high %v1522_v22, %v1530_v23  ;;  %v7013_v24 = vcombine.low %v1522_v22, %v1530_v23 }
 0x285   :  { %4760 = vmatpush1.bf16.msra.mxu1 %v7123_v33  ;;  %v1769_v33 = vld [vmem:[%s10796_s5 + $0xe58] sm:$0xff] }
 0x286   :  { %4801 = vmatpush1.bf16.msra.mxu0 %v6869_v35  ;;  %4761 = vmatprep.subr.bf16.mxu1 %v7108_v36  ;;  %v1506_v35 = vld [vmem:[%s10796_s5 + $0x620] sm:$0xff]  ;;  %v7252_v25 = vcombine.high %v1761_v32, %v1769_v33 }
 0x287   :  { %4802 = vmatprep.subr.bf16.mxu0 %v6854_v37  ;;  %v1514_v36 = vld [vmem:[%s10796_s5 + $0x660] sm:$0xff]  ;;  %v7267_v37 = vcombine.low %v1777_v18, %v1785_v21 }
 0x288   :  { %v6998_v27 = vcombine.high %v1506_v35, %v1514_v36  ;;  %v6997_v48 = vcombine.low %v1506_v35, %v1514_v36  ;;  %v1419_v35 = vld [vmem:[%s10796_s5 + $0x368] sm:$0xff] }
 0x289   :  { %4762 = vmatpush1.bf16.msra.mxu1 %v7107_v44  ;;  %v1753_v44 = vld [vmem:[%s10796_s5 + $0xdd8] sm:$0xff] }
 0x28a   :  { %4803 = vmatpush1.bf16.msra.mxu0 %v6853_v45  ;;  %4763 = vmatprep.subr.bf16.mxu1 %v7092_v46  ;;  %v1490_v45 = vld [vmem:[%s10796_s5 + $0x5a0] sm:$0xff]  ;;  %v7236_v49 = vcombine.high %v1745_v41, %v1753_v44 }
 0x28b   :  { %4804 = vmatprep.subr.bf16.mxu0 %v6838_v47  ;;  %v1498_v46 = vld [vmem:[%s10796_s5 + $0x5e0] sm:$0xff]  ;;  %v7251_v47 = vcombine.low %v1761_v32, %v1769_v33  ;;  %v1411_v33 = vld [vmem:[%s10796_s5 + $0x328] sm:$0xff] }
 0x28c   :  { %v6982_v50 = vcombine.high %v1490_v45, %v1498_v46  ;;  %v6981_v58 = vcombine.low %v1490_v45, %v1498_v46  ;;  %v6904_v45 = vcombine.high %v1411_v33, %v1419_v35  ;;  %v1403_v46 = vld [vmem:[%s10796_s5 + $0x2e8] sm:$0xff] }
 0x28d   :  { %4764 = vmatpush1.bf16.msra.mxu1 %v7091_v52  ;;  %v1737_v52 = vld [vmem:[%s10796_s5 + $0xd58] sm:$0xff] }
 0x28e   :  { %4805 = vmatpush1.bf16.msra.mxu0 %v6837_v53  ;;  %4765 = vmatprep.subr.bf16.mxu1 %v7076_v54  ;;  %v1474_v53 = vld [vmem:[%s10796_s5 + $0x520] sm:$0xff]  ;;  %v7220_v59 = vcombine.high %v1729_v51, %v1737_v52 }
 0x28f   :  { %4806 = vmatprep.subr.bf16.mxu0 %v6822_v57  ;;  %v1482_v54 = vld [vmem:[%s10796_s5 + $0x560] sm:$0xff]  ;;  %v7235_v57 = vcombine.low %v1745_v41, %v1753_v44 }
 0x290   :  { %v6966_v60 = vcombine.high %v1474_v53, %v1482_v54  ;;  %v6965_v29 = vcombine.low %v1474_v53, %v1482_v54 }
 0x291   :  { %4766 = vmatpush1.bf16.msra.mxu1 %v7075_v63  ;;  %v1721_v63 = vld [vmem:[%s10796_s5 + $0xcd8] sm:$0xff] }
 0x292   :  { %4807 = vmatpush1.bf16.msra.mxu0 %v6821_v0  ;;  %4767 = vmatprep.subr.bf16.mxu1 %v7060_v1  ;;  %v1458_v0 = vld [vmem:[%s10796_s5 + $0x4a0] sm:$0xff]  ;;  %v7204_v30 = vcombine.high %v1713_v61, %v1721_v63 }
 0x293   :  { %4808 = vmatprep.subr.bf16.mxu0 %v6806_v2  ;;  %v1466_v1 = vld [vmem:[%s10796_s5 + $0x4e0] sm:$0xff]  ;;  %v7219_v2 = vcombine.low %v1729_v51, %v1737_v52  ;;  %v6903_v52 = vcombine.low %v1411_v33, %v1419_v35 }
 0x294   :  { %v6950_v34 = vcombine.high %v1458_v0, %v1466_v1  ;;  %v6949_v10 = vcombine.low %v1458_v0, %v1466_v1 }
 0x295   :  { %4768 = vmatpush1.bf16.msra.mxu1 %v7059_v4  ;;  %v1705_v4 = vld [vmem:[%s10796_s5 + $0xc58] sm:$0xff] }
 0x296   :  { %4809 = vmatpush1.bf16.msra.mxu0 %v6805_v6  ;;  %4769 = vmatprep.subr.bf16.mxu1 %v7300_v7  ;;  %v1442_v6 = vld [vmem:[%s10796_s5 + $0x420] sm:$0xff]  ;;  %v7188_v11 = vcombine.high %v1697_v3, %v1705_v4  ;;  %v7187_v18 = vcombine.low %v1697_v3, %v1705_v4 }
 0x297   :  { %4810 = vmatprep.subr.bf16.mxu0 %v7046_v8  ;;  %v1450_v7 = vld [vmem:[%s10796_s5 + $0x460] sm:$0xff]  ;;  %v7203_v8 = vcombine.low %v1713_v61, %v1721_v63  ;;  %v1379_v61 = vld [vmem:[%s10796_s5 + $0x228] sm:$0xff] }
 0x298   :  { %v6934_v12 = vcombine.high %v1442_v6, %v1450_v7  ;;  %v6933_v21 = vcombine.low %v1442_v6, %v1450_v7  ;;  %v1387_v63 = vld [vmem:[%s10796_s5 + $0x268] sm:$0xff]  ;;  %v1618_v3 = vld [vmem:[%s10796_s5 + $0x9a0] sm:$0xff] }
 0x299   :  { %4770 = vmatpush2.bf16.msra.mxu1 %v7299_v14  ;;  %v1690_v14 = vld [vmem:[%s10796_s5 + $0xbe0] sm:$0xff]  ;;  %v1363_v6 = vld [vmem:[%s10796_s5 + $0x1a8] sm:$0xff] }
 0x29a   :  { %4811 = vmatpush2.bf16.msra.mxu0 %v7045_v15  ;;  %4771 = vmatprep.subr.bf16.mxu1 %v7284_v16  ;;  %v9572_v15 = vld [vmem:[%s10797_s6] sm:$0xff]  ;;  %v1427_v16 = vld [vmem:[%s10796_s5 + $0x3a8] sm:$0xff]  ;;  %v7174_v22 = vcombine.high %v1682_v13, %v1690_v14  ;;  %v7173_v32 = vcombine.low %v1682_v13, %v1690_v14 }
 0x29b   :  { %4812 = vmatprep.subr.bf16.mxu0 %v7030_v17  ;;  %v1435_v17 = vld [vmem:[%s10796_s5 + $0x3e8] sm:$0xff]  ;;  %v1829_v23 = vrot.slane %v9572_v15, %v8424_v39  ;;  %v1626_v4 = vld [vmem:[%s10796_s5 + $0x9e0] sm:$0xff] }
 0x29c   :  { %v6919_v36 = vcombine.low %v1427_v16, %v1435_v17  ;;  %v1371_v7 = vld [vmem:[%s10796_s5 + $0x1e8] sm:$0xff]  ;;  %v1602_v13 = vld [vmem:[%s10796_s5 + $0x920] sm:$0xff] }
 0x29d   :  { %4772 = vmatpush2.bf16.msra.mxu1 %v7283_v62  ;;  %v6920_v62 = vcombine.high %v1427_v16, %v1435_v17  ;;  %v1610_v14 = vld [vmem:[%s10796_s5 + $0x960] sm:$0xff]  ;;  %v1347_v16 = vld [vmem:[%s10796_s5 + $0x128] sm:$0xff] }
 0x29e   :  { %4813 = vmatpush2.bf16.msra.mxu0 %v7029_v5  ;;  %4773 = vmatprep.subr.bf16.mxu1 %v7268_v26  ;;  %v1666_v5 = vld [vmem:[%s10796_s5 + $0xb20] sm:$0xff]  ;;  %v1355_v17 = vld [vmem:[%s10796_s5 + $0x168] sm:$0xff] }
 0x29f   :  { %4814 = vmatprep.subr.bf16.mxu0 %v7014_v31  ;;  %v1674_v26 = vld [vmem:[%s10796_s5 + $0xb60] sm:$0xff]  ;;  %v1833_v31 = vrot.slane %v9572_v15, %v8433_v42  ;;  %v6839_v33 = vcombine.low %v1347_v16, %v1355_v17 }
 0x2a1   :  { %4774 = vmatpush2.bf16.msra.mxu1 %v7267_v37  ;;  %v4501_v37 = vadd.f32 %v9394_v28, %v1829_v23  ;;  %v1395_v28 = vld [vmem:[%s10796_s5 + $0x2a8] sm:$0xff]  ;;  %v6840_v23 = vcombine.high %v1347_v16, %v1355_v17 }
 0x2a2   :  { %4815 = vmatpush2.bf16.msra.mxu0 %v7013_v24  ;;  %4775 = vmatprep.subr.bf16.mxu1 %v7252_v25  ;;  %v7158_v24 = vcombine.high %v1666_v5, %v1674_v26  ;;  %v1650_v25 = vld [vmem:[%s10796_s5 + $0xaa0] sm:$0xff] }
 0x2a3   :  { %4816 = vmatprep.subr.bf16.mxu0 %v6998_v27  ;;  %v1658_v27 = vld [vmem:[%s10796_s5 + $0xae0] sm:$0xff] }
 0x2a4   :  { %v7142_v53 = vcombine.high %v1650_v25, %v1658_v27  ;;  %v7141_v0 = vcombine.low %v1650_v25, %v1658_v27  ;;  %v1315_v25 = vld [vmem:[%s10796_s5 + $0x28] sm:$0xff] }
 0x2a5   :  { %4776 = vmatpush2.bf16.msra.mxu1 %v7251_v47  ;;  %v4503_v47 = vadd.f32 %v9404_v9, %v1833_v31  ;;  %v6888_v9 = vcombine.high %v1395_v28, %v1403_v46  ;;  %v1339_v31 = vld [vmem:[%s10796_s5 + $0xe8] sm:$0xff] }
 0x2a6   :  { %4817 = vmatpush2.bf16.msra.mxu0 %v6997_v48  ;;  %4777 = vmatprep.subr.bf16.mxu1 %v7236_v49  ;;  %v7157_v49 = vcombine.low %v1666_v5, %v1674_v26  ;;  %v1594_v5 = vld [vmem:[%s10796_s5 + $0x8e0] sm:$0xff]  ;;  %v1331_v26 = vld [vmem:[%s10796_s5 + $0xa8] sm:$0xff] }
 0x2a7   :  { %4818 = vmatprep.subr.bf16.mxu0 %v6982_v50  ;;  %v1323_v27 = vld [vmem:[%s10796_s5 + $0x68] sm:$0xff] }
 0x2a9   :  { %4778 = vmatpush2.bf16.msra.mxu1 %v7235_v57  ;;  %v1634_v57 = vld [vmem:[%s10796_s5 + $0xa20] sm:$0xff] }
 0x2aa   :  { %4819 = vmatpush2.bf16.msra.mxu0 %v6981_v58  ;;  %4779 = vmatprep.subr.bf16.mxu1 %v7220_v59  ;;  %v1642_v58 = vld [vmem:[%s10796_s5 + $0xa60] sm:$0xff] }
 0x2ab   :  { %4820 = vmatprep.subr.bf16.mxu0 %v6966_v60 }
 0x2ad   :  { %4780 = vmatpush2.bf16.msra.mxu1 %v7219_v2 }
 0x2ae   :  { %4821 = vmatpush2.bf16.msra.mxu0 %v6965_v29  ;;  %4781 = vmatprep.subr.bf16.mxu1 %v7204_v30  ;;  %v6887_v29 = vcombine.low %v1395_v28, %v1403_v46  ;;  %v7126_v30 = vcombine.high %v1634_v57, %v1642_v58  ;;  %v6808_v46 = vcombine.high %v1315_v25, %v1323_v27 }
 0x2af   :  { %4822 = vmatprep.subr.bf16.mxu0 %v6950_v34  ;;  %v6872_v34 = vcombine.high %v1379_v61, %v1387_v63 }
 0x2b1   :  { %4782 = vmatpush2.bf16.msra.mxu1 %v7203_v8  ;;  %v7125_v8 = vcombine.low %v1634_v57, %v1642_v58 }
 0x2b2   :  { %4823 = vmatpush2.bf16.msra.mxu0 %v6949_v10  ;;  %4783 = vmatprep.subr.bf16.mxu1 %v7188_v11  ;;  %v6871_v10 = vcombine.low %v1379_v61, %v1387_v63  ;;  %v7110_v11 = vcombine.high %v1618_v3, %v1626_v4  ;;  %v1539_v61 = vld [vmem:[%s10796_s5 + $0x728] sm:$0xff] }
 0x2b3   :  { %4824 = vmatprep.subr.bf16.mxu0 %v6934_v12  ;;  %v6856_v12 = vcombine.high %v1363_v6, %v1371_v7  ;;  %v1547_v63 = vld [vmem:[%s10796_s5 + $0x768] sm:$0xff] }
 0x2b5   :  { %4784 = vmatpush2.bf16.msra.mxu1 %v7187_v18  ;;  %v7109_v18 = vcombine.low %v1618_v3, %v1626_v4  ;;  %v1523_v3 = vld [vmem:[%s10796_s5 + $0x6a8] sm:$0xff] }
 0x2b6   :  { %4825 = vmatpush2.bf16.msra.mxu0 %v6933_v21  ;;  %4835 = vmatprep.subr.bf16.mxu1 %v7174_v22  ;;  %v6855_v21 = vcombine.low %v1363_v6, %v1371_v7  ;;  %v7094_v22 = vcombine.high %v1602_v13, %v1610_v14  ;;  %v1531_v4 = vld [vmem:[%s10796_s5 + $0x6e8] sm:$0xff]  ;;  %v7031_v7 = vcombine.low %v1539_v61, %v1547_v63 }
 0x2b7   :  { %4876 = vmatprep.subr.bf16.mxu0 %v6920_v62  ;;  %v1586_v62 = vld [vmem:[%s10796_s5 + $0x8a0] sm:$0xff]  ;;  %v7015_v17 = vcombine.low %v1523_v3, %v1531_v4 }
 0x2b8   :  { %4786 = vmatmul.mubr.bf16.vlgmr.msra.gmra.mxu1 %v8989_v20  ;;  %v4541_v41 = vpop.f32.mrf.mxu1  ;;  %v9604_v44 = vpop.f32.mrf.mxu0  ;;  %v7078_v35 = vcombine.high %v1586_v62, %v1594_v5 }
 0x2b9   :  { %v9613_v48 = vadd.f32 %v4541_v41, %v4501_v37  ;;  %4827 = vmatmul.mubr.bf16.vlgmr.msra.gmra.mxu0 %v8873_v56  ;;  %4836 = vmatpush1.bf16.msra.mxu1 %v7173_v32  ;;  %v7093_v32 = vcombine.low %v1602_v13, %v1610_v14  ;;  %v1570_v37 = vld [vmem:[%s10796_s5 + $0x820] sm:$0xff]  ;;  %v7077_v41 = vcombine.low %v1586_v62, %v1594_v5  ;;  %v1507_v13 = vld [vmem:[%s10796_s5 + $0x628] sm:$0xff] }
 0x2ba   :  { %4867 = vmatprep.mubr.bf16.mxu1 %v8987_v19  ;;  %4877 = vmatpush1.bf16.msra.mxu0 %v6919_v36  ;;  %v4543_v50 = vpop.f32.mrf.mxu1  ;;  %v9617_v51 = vpop.f32.mrf.mxu0  ;;  %v6824_v36 = vcombine.high %v1331_v26, %v1339_v31  ;;  %v1515_v14 = vld [vmem:[%s10796_s5 + $0x668] sm:$0xff] }
 0x2bb   :  { %4908 = vmatprep.mubr.bf16.mxu0 %v8871_v55  ;;  %v9620_v54 = vadd.f32 %v4543_v50, %v4503_v47  ;;  %4837 = vmatprep.subr.bf16.mxu1 %v7158_v24  ;;  %v1578_v24 = vld [vmem:[%s10796_s5 + $0x860] sm:$0xff]  ;;  %v1555_v50 = vld [vmem:[%s10796_s5 + $0x7a8] sm:$0xff] }
 0x2bc   :  { %v4545_v59 = vpop.f32.mrf.mxu1  ;;  %v4586_v60 = vpop.f32.mrf.mxu0  ;;  %4878 = vmatprep.subr.bf16.mxu0 %v6904_v45  ;;  %v6823_v45 = vcombine.low %v1331_v26, %v1339_v31  ;;  %v7062_v28 = vcombine.high %v1570_v37, %v1578_v24  ;;  %v1810_v47 = vld [vmem:[%s10796_s5 + $0xfa0] sm:$0xff]  ;;  %v1491_v62 = vld [vmem:[%s10796_s5 + $0x5a8] sm:$0xff]  ;;  %v6999_v31 = vcombine.low %v1507_v13, %v1515_v14 }
 0x2bd   :  { %4838 = vmatpush1.bf16.msra.mxu1 %v7157_v49  ;;  %v1818_v49 = vld [vmem:[%s10796_s5 + $0xfe0] sm:$0xff]  ;;  %v1499_v5 = vld [vmem:[%s10796_s5 + $0x5e8] sm:$0xff] }
 0x2be   :  { %4879 = vmatpush1.bf16.msra.mxu0 %v6903_v52  ;;  %v4546_v1 = vpop.f32.mrf.mxu1  ;;  %v4587_v2 = vpop.f32.mrf.mxu0  ;;  %4839 = vmatprep.subr.bf16.mxu1 %v7142_v53  ;;  %v1563_v52 = vld [vmem:[%s10796_s5 + $0x7e8] sm:$0xff]  ;;  %v7061_v53 = vcombine.low %v1570_v37, %v1578_v24  ;;  %v7302_v57 = vcombine.high %v1810_v47, %v1818_v49  ;;  %v1794_v59 = vld [vmem:[%s10796_s5 + $0xf20] sm:$0xff] }
 0x2bf   :  { %4880 = vmatprep.subr.bf16.mxu0 %v6888_v9  ;;  %v6807_v9 = vcombine.low %v1315_v25, %v1323_v27  ;;  %v7048_v58 = vcombine.high %v1555_v50, %v1563_v52  ;;  %v1802_v60 = vld [vmem:[%s10796_s5 + $0xf60] sm:$0xff]  ;;  %v7047_v1 = vcombine.low %v1555_v50, %v1563_v52  ;;  %v1475_v37 = vld [vmem:[%s10796_s5 + $0x528] sm:$0xff]  ;;  %v6983_v27 = vcombine.low %v1491_v62, %v1499_v5 }
 0x2c0   :  { %v7286_v2 = vcombine.high %v1794_v59, %v1802_v60  ;;  %v7285_v6 = vcombine.low %v1794_v59, %v1802_v60  ;;  %v1483_v24 = vld [vmem:[%s10796_s5 + $0x568] sm:$0xff] }
 0x2c1   :  { %4840 = vmatpush1.bf16.msra.mxu1 %v7141_v0  ;;  %v7301_v0 = vcombine.low %v1810_v47, %v1818_v49  ;;  %v1459_v47 = vld [vmem:[%s10796_s5 + $0x4a8] sm:$0xff]  ;;  %v6967_v52 = vcombine.low %v1475_v37, %v1483_v24 }
 0x2c2   :  { %4881 = vmatpush1.bf16.msra.mxu0 %v6887_v29  ;;  %4841 = vmatprep.subr.bf16.mxu1 %v7126_v30  ;;  %v7032_v29 = vcombine.high %v1539_v61, %v1547_v63  ;;  %v1778_v30 = vld [vmem:[%s10796_s5 + $0xea0] sm:$0xff]  ;;  %v1467_v49 = vld [vmem:[%s10796_s5 + $0x4e8] sm:$0xff] }
 0x2c3   :  { %4882 = vmatprep.subr.bf16.mxu0 %v6872_v34  ;;  %v1786_v34 = vld [vmem:[%s10796_s5 + $0xee0] sm:$0xff]  ;;  %v1443_v59 = vld [vmem:[%s10796_s5 + $0x428] sm:$0xff]  ;;  %v6951_v63 = vcombine.low %v1459_v47, %v1467_v49 }
 0x2c4   :  { %v7269_v16 = vcombine.low %v1778_v30, %v1786_v34  ;;  %v1451_v60 = vld [vmem:[%s10796_s5 + $0x468] sm:$0xff] }
 0x2c5   :  { %4842 = vmatpush1.bf16.msra.mxu1 %v7125_v8  ;;  %v7270_v8 = vcombine.high %v1778_v30, %v1786_v34  ;;  %v1428_v30 = vld [vmem:[%s10796_s5 + $0x3b0] sm:$0xff] }
 0x2c6   :  { %4883 = vmatpush1.bf16.msra.mxu0 %v6871_v10  ;;  %4843 = vmatprep.subr.bf16.mxu1 %v7110_v11  ;;  %v7016_v10 = vcombine.high %v1523_v3, %v1531_v4  ;;  %v1762_v11 = vld [vmem:[%s10796_s5 + $0xe20] sm:$0xff]  ;;  %v1436_v34 = vld [vmem:[%s10796_s5 + $0x3f0] sm:$0xff]  ;;  %v6935_v4 = vcombine.low %v1443_v59, %v1451_v60 }
 0x2c7   :  { %4884 = vmatprep.subr.bf16.mxu0 %v6856_v12  ;;  %v1770_v12 = vld [vmem:[%s10796_s5 + $0xe60] sm:$0xff] }
 0x2c8   :  { %v7253_v26 = vcombine.low %v1762_v11, %v1770_v12 }
 0x2c9   :  { %4844 = vmatpush1.bf16.msra.mxu1 %v7109_v18  ;;  %v7254_v18 = vcombine.high %v1762_v11, %v1770_v12  ;;  %v1675_v11 = vld [vmem:[%s10796_s5 + $0xb68] sm:$0xff]  ;;  %v1841_v12 = vrot.slane %v9572_v15, %v8436_v43 }
 0x2ca   :  { %4885 = vmatpush1.bf16.msra.mxu0 %v6855_v21  ;;  %4845 = vmatprep.subr.bf16.mxu1 %v7094_v22  ;;  %v7000_v21 = vcombine.high %v1507_v13, %v1515_v14  ;;  %v1746_v22 = vld [vmem:[%s10796_s5 + $0xda0] sm:$0xff]  ;;  %v1412_v14 = vld [vmem:[%s10796_s5 + $0x330] sm:$0xff] }
 0x2cb   :  { %4886 = vmatprep.subr.bf16.mxu0 %v6840_v23  ;;  %v1754_v23 = vld [vmem:[%s10796_s5 + $0xde0] sm:$0xff] }
 0x2cc   :  { %v7237_v25 = vcombine.low %v1746_v22, %v1754_v23 }
 0x2cd   :  { %4846 = vmatpush1.bf16.msra.mxu1 %v7093_v32  ;;  %v7238_v32 = vcombine.high %v1746_v22, %v1754_v23  ;;  %v1651_v22 = vld [vmem:[%s10796_s5 + $0xaa8] sm:$0xff] }
 0x2ce   :  { %4887 = vmatpush1.bf16.msra.mxu0 %v6839_v33  ;;  %4847 = vmatprep.subr.bf16.mxu1 %v7078_v35  ;;  %v6984_v33 = vcombine.high %v1491_v62, %v1499_v5  ;;  %v1730_v35 = vld [vmem:[%s10796_s5 + $0xd20] sm:$0xff]  ;;  %v1659_v23 = vld [vmem:[%s10796_s5 + $0xae8] sm:$0xff] }
 0x2cf   :  { %4888 = vmatprep.subr.bf16.mxu0 %v6824_v36  ;;  %v1738_v36 = vld [vmem:[%s10796_s5 + $0xd60] sm:$0xff] }
 0x2d0   :  { %v7221_v50 = vcombine.low %v1730_v35, %v1738_v36 }
 0x2d1   :  { %4848 = vmatpush1.bf16.msra.mxu1 %v7077_v41  ;;  %v7222_v41 = vcombine.high %v1730_v35, %v1738_v36 }
 0x2d2   :  { %4889 = vmatpush1.bf16.msra.mxu0 %v6823_v45  ;;  %4849 = vmatprep.subr.bf16.mxu1 %v7062_v28  ;;  %v6968_v45 = vcombine.high %v1475_v37, %v1483_v24  ;;  %v1714_v28 = vld [vmem:[%s10796_s5 + $0xca0] sm:$0xff]  ;;  %v7144_v24 = vcombine.high %v1651_v22, %v1659_v23 }
 0x2d3   :  { %4890 = vmatprep.subr.bf16.mxu0 %v6808_v46  ;;  %v1722_v46 = vld [vmem:[%s10796_s5 + $0xce0] sm:$0xff] }
 0x2d4   :  { %v7205_v61 = vcombine.low %v1714_v28, %v1722_v46 }
 0x2d5   :  { %4850 = vmatpush1.bf16.msra.mxu1 %v7061_v53  ;;  %v7206_v53 = vcombine.high %v1714_v28, %v1722_v46  ;;  %v1380_v46 = vld [vmem:[%s10796_s5 + $0x230] sm:$0xff] }
 0x2d6   :  { %4891 = vmatpush1.bf16.msra.mxu0 %v6807_v9  ;;  %4851 = vmatprep.subr.bf16.mxu1 %v7302_v57  ;;  %v6952_v9 = vcombine.high %v1459_v47, %v1467_v49  ;;  %v1698_v57 = vld [vmem:[%s10796_s5 + $0xc20] sm:$0xff]  ;;  %v1388_v47 = vld [vmem:[%s10796_s5 + $0x270] sm:$0xff] }
 0x2d7   :  { %4892 = vmatprep.subr.bf16.mxu0 %v7048_v58  ;;  %v1706_v58 = vld [vmem:[%s10796_s5 + $0xc60] sm:$0xff] }
 0x2d8   :  { %v7189_v3 = vcombine.low %v1698_v57, %v1706_v58 }
 0x2d9   :  { %4852 = vmatpush2.bf16.msra.mxu1 %v7301_v0  ;;  %v7190_v0 = vcombine.high %v1698_v57, %v1706_v58  ;;  %v6874_v58 = vcombine.high %v1380_v46, %v1388_v47 }
 0x2da   :  { %4893 = vmatpush2.bf16.msra.mxu0 %v7047_v1  ;;  %4853 = vmatprep.subr.bf16.mxu1 %v7286_v2  ;;  %v6936_v1 = vcombine.high %v1443_v59, %v1451_v60  ;;  %v1683_v2 = vld [vmem:[%s10796_s5 + $0xba8] sm:$0xff] }
 0x2db   :  { %4894 = vmatprep.subr.bf16.mxu0 %v7032_v29  ;;  %v1691_v29 = vld [vmem:[%s10796_s5 + $0xbe8] sm:$0xff] }
 0x2dc   :  { %v7175_v13 = vcombine.low %v1683_v2, %v1691_v29  ;;  %v1619_v59 = vld [vmem:[%s10796_s5 + $0x9a8] sm:$0xff] }
 0x2dd   :  { %4854 = vmatpush2.bf16.msra.mxu1 %v7285_v6  ;;  %v7176_v6 = vcombine.high %v1683_v2, %v1691_v29  ;;  %v1627_v60 = vld [vmem:[%s10796_s5 + $0x9e8] sm:$0xff] }
 0x2de   :  { %4895 = vmatpush2.bf16.msra.mxu0 %v7031_v7  ;;  %4855 = vmatprep.subr.bf16.mxu1 %v7270_v8  ;;  %v1837_v7 = vrot.slane %v9572_v15, %v8427_v40  ;;  %v6922_v8 = vcombine.high %v1428_v30, %v1436_v34  ;;  %v7112_v2 = vcombine.high %v1619_v59, %v1627_v60 }
 0x2df   :  { %4896 = vmatprep.subr.bf16.mxu0 %v7016_v10  ;;  %v1667_v10 = vld [vmem:[%s10796_s5 + $0xb28] sm:$0xff] }
 0x2e0   :  { %v7159_v35 = vcombine.low %v1667_v10, %v1675_v11 }
 0x2e1   :  { %4856 = vmatpush2.bf16.msra.mxu1 %v7269_v16  ;;  %v1420_v16 = vld [vmem:[%s10796_s5 + $0x370] sm:$0xff] }
 0x2e2   :  { %4897 = vmatpush2.bf16.msra.mxu0 %v7015_v17  ;;  %4857 = vmatprep.subr.bf16.mxu1 %v7254_v18  ;;  %v6921_v17 = vcombine.low %v1428_v30, %v1436_v34  ;;  %v4583_v18 = vadd.f32 %v9604_v44, %v1837_v7  ;;  %v6906_v5 = vcombine.high %v1412_v14, %v1420_v16  ;;  %v1404_v44 = vld [vmem:[%s10796_s5 + $0x2f0] sm:$0xff]  ;;  %v1603_v30 = vld [vmem:[%s10796_s5 + $0x928] sm:$0xff] }
 0x2e3   :  { %4898 = vmatprep.subr.bf16.mxu0 %v7000_v21  ;;  %v7160_v21 = vcombine.high %v1667_v10, %v1675_v11  ;;  %v6905_v37 = vcombine.low %v1412_v14, %v1420_v16  ;;  %v1611_v34 = vld [vmem:[%s10796_s5 + $0x968] sm:$0xff]  ;;  %v1340_v14 = vld [vmem:[%s10796_s5 + $0xf0] sm:$0xff] }
 0x2e4   :  { %v1587_v11 = vld [vmem:[%s10796_s5 + $0x8a8] sm:$0xff]  ;;  %v7095_v16 = vcombine.low %v1603_v30, %v1611_v34 }
 0x2e5   :  { %4858 = vmatpush2.bf16.msra.mxu1 %v7253_v26  ;;  %v1396_v26 = vld [vmem:[%s10796_s5 + $0x2b0] sm:$0xff] }
 0x2e6   :  { %4899 = vmatpush2.bf16.msra.mxu0 %v6999_v31  ;;  %4859 = vmatprep.subr.bf16.mxu1 %v7238_v32  ;;  %v4585_v31 = vadd.f32 %v9617_v51, %v1841_v12  ;;  %v6890_v51 = vcombine.high %v1396_v26, %v1404_v44  ;;  %v1595_v12 = vld [vmem:[%s10796_s5 + $0x8e8] sm:$0xff] }
 0x2e7   :  { %4900 = vmatprep.subr.bf16.mxu0 %v6984_v33 }
 0x2e9   :  { %4860 = vmatpush2.bf16.msra.mxu1 %v7237_v25 }
 0x2ea   :  { %4901 = vmatpush2.bf16.msra.mxu0 %v6983_v27  ;;  %4861 = vmatprep.subr.bf16.mxu1 %v7222_v41  ;;  %v1635_v41 = vld [vmem:[%s10796_s5 + $0xa28] sm:$0xff] }
 0x2eb   :  { %4902 = vmatprep.subr.bf16.mxu0 %v6968_v45  ;;  %v1643_v45 = vld [vmem:[%s10796_s5 + $0xa68] sm:$0xff] }
 0x2ed   :  { %4862 = vmatpush2.bf16.msra.mxu1 %v7221_v50  ;;  %v7143_v50 = vcombine.low %v1651_v22, %v1659_v23  ;;  %v1571_v22 = vld [vmem:[%s10796_s5 + $0x828] sm:$0xff] }
 0x2ee   :  { %4903 = vmatpush2.bf16.msra.mxu0 %v6967_v52  ;;  %4863 = vmatprep.subr.bf16.mxu1 %v7206_v53  ;;  %v6889_v53 = vcombine.low %v1396_v26, %v1404_v44  ;;  %v1579_v23 = vld [vmem:[%s10796_s5 + $0x868] sm:$0xff]  ;;  %v7079_v26 = vcombine.low %v1587_v11, %v1595_v12 }
 0x2ef   :  { %4904 = vmatprep.subr.bf16.mxu0 %v6952_v9  ;;  %v7128_v9 = vcombine.high %v1635_v41, %v1643_v45 }
 0x2f1   :  { %4864 = vmatpush2.bf16.msra.mxu1 %v7205_v61  ;;  %v1364_v61 = vld [vmem:[%s10796_s5 + $0x1b0] sm:$0xff] }
 0x2f2   :  { %4905 = vmatpush2.bf16.msra.mxu0 %v6951_v63  ;;  %4865 = vmatprep.subr.bf16.mxu1 %v7190_v0  ;;  %v1372_v63 = vld [vmem:[%s10796_s5 + $0x1f0] sm:$0xff]  ;;  %v7127_v0 = vcombine.low %v1635_v41, %v1643_v45  ;;  %v7063_v41 = vcombine.low %v1571_v22, %v1579_v23 }
 0x2f3   :  { %4906 = vmatprep.subr.bf16.mxu0 %v6936_v1  ;;  %v6873_v1 = vcombine.low %v1380_v46, %v1388_v47  ;;  %v6858_v29 = vcombine.high %v1364_v61, %v1372_v63  ;;  %v6857_v7 = vcombine.low %v1364_v61, %v1372_v63  ;;  %v1795_v47 = vld [vmem:[%s10796_s5 + $0xf28] sm:$0xff]  ;;  %v1524_v61 = vld [vmem:[%s10796_s5 + $0x6b0] sm:$0xff] }
 0x2f4   :  { %v1532_v63 = vld [vmem:[%s10796_s5 + $0x6f0] sm:$0xff] }
 0x2f5   :  { %4866 = vmatpush2.bf16.msra.mxu1 %v7189_v3  ;;  %v1348_v3 = vld [vmem:[%s10796_s5 + $0x130] sm:$0xff] }
 0x2f6   :  { %4907 = vmatpush2.bf16.msra.mxu0 %v6935_v4  ;;  %4917 = vmatprep.subr.bf16.mxu1 %v7176_v6  ;;  %v1356_v4 = vld [vmem:[%s10796_s5 + $0x170] sm:$0xff]  ;;  %v7111_v6 = vcombine.low %v1619_v59, %v1627_v60  ;;  %v1779_v59 = vld [vmem:[%s10796_s5 + $0xea8] sm:$0xff] }
 0x2f7   :  { %4958 = vmatprep.subr.bf16.mxu0 %v6922_v8  ;;  %v7096_v8 = vcombine.high %v1603_v30, %v1611_v34  ;;  %v6842_v10 = vcombine.high %v1348_v3, %v1356_v4  ;;  %v1787_v60 = vld [vmem:[%s10796_s5 + $0xee8] sm:$0xff] }
 0x2f8   :  { %v4623_v62 = vpop.f32.mrf.mxu1  ;;  %4868 = vmatmul.mubr.bf16.vlgmr.msra.gmra.mxu1 %v8989_v20  ;;  %v1763_v30 = vld [vmem:[%s10796_s5 + $0xe28] sm:$0xff] }
 0x2f9   :  { %v9821_v32 = vadd.f32 %v4623_v62, %v4583_v18  ;;  %v9823_v33 = vpop.f32.mrf.mxu0  ;;  %4909 = vmatmul.mubr.bf16.vlgmr.msra.gmra.mxu0 %v8873_v56  ;;  %4918 = vmatpush1.bf16.msra.mxu1 %v7175_v13  ;;  %v1332_v13 = vld [vmem:[%s10796_s5 + $0xb0] sm:$0xff]  ;;  %v7080_v18 = vcombine.high %v1587_v11, %v1595_v12  ;;  %v1771_v34 = vld [vmem:[%s10796_s5 + $0xe68] sm:$0xff] }
 0x2fa   :  { %4949 = vmatprep.mubr.bf16.mxu1 %v8987_v19  ;;  %v4625_v36 = vpop.f32.mrf.mxu1  ;;  %4959 = vmatpush1.bf16.msra.mxu0 %v6921_v17  ;;  %v6841_v17 = vcombine.low %v1348_v3, %v1356_v4  ;;  %v1316_v62 = vld [vmem:[%s10796_s5 + $0x30] sm:$0xff]  ;;  %v6825_v44 = vcombine.low %v1332_v13, %v1340_v14  ;;  %v1747_v11 = vld [vmem:[%s10796_s5 + $0xda8] sm:$0xff] }
 0x2fb   :  { %v9827_v25 = vadd.f32 %v4625_v36, %v4585_v31  ;;  %4990 = vmatprep.mubr.bf16.mxu0 %v8871_v55  ;;  %v9830_v27 = vpop.f32.mrf.mxu0  ;;  %4919 = vmatprep.subr.bf16.mxu1 %v7160_v21  ;;  %v6826_v21 = vcombine.high %v1332_v13, %v1340_v14  ;;  %v7064_v31 = vcombine.high %v1571_v22, %v1579_v23  ;;  %v1811_v36 = vld [vmem:[%s10796_s5 + $0xfa8] sm:$0xff]  ;;  %v1508_v3 = vld [vmem:[%s10796_s5 + $0x630] sm:$0xff] }
 0x2fc   :  { %v4627_v28 = vpop.f32.mrf.mxu1  ;;  %4960 = vmatprep.subr.bf16.mxu0 %v6906_v5  ;;  %v1324_v5 = vld [vmem:[%s10796_s5 + $0x70] sm:$0xff]  ;;  %v1755_v12 = vld [vmem:[%s10796_s5 + $0xde8] sm:$0xff] }
 0x2fd   :  { %v4668_v49 = vpop.f32.mrf.mxu0  ;;  %4920 = vmatpush1.bf16.msra.mxu1 %v7159_v35  ;;  %v6810_v35 = vcombine.high %v1316_v62, %v1324_v5  ;;  %v6809_v45 = vcombine.low %v1316_v62, %v1324_v5  ;;  %v1516_v4 = vld [vmem:[%s10796_s5 + $0x670] sm:$0xff]  ;;  %v1731_v22 = vld [vmem:[%s10796_s5 + $0xd28] sm:$0xff] }
 0x2fe   :  { %v4628_v52 = vpop.f32.mrf.mxu1  ;;  %4961 = vmatpush1.bf16.msra.mxu0 %v6905_v37  ;;  %4921 = vmatprep.subr.bf16.mxu1 %v7144_v24  ;;  %v1819_v37 = vld [vmem:[%s10796_s5 + $0xfe8] sm:$0xff]  ;;  %v1556_v24 = vld [vmem:[%s10796_s5 + $0x7b0] sm:$0xff] }
 0x2ff   :  { %v4669_v57 = vpop.f32.mrf.mxu0  ;;  %4962 = vmatprep.subr.bf16.mxu0 %v6890_v51  ;;  %v1564_v51 = vld [vmem:[%s10796_s5 + $0x7f0] sm:$0xff]  ;;  %v7304_v28 = vcombine.high %v1811_v36, %v1819_v37  ;;  %v1803_v49 = vld [vmem:[%s10796_s5 + $0xf68] sm:$0xff] }
 0x300   :  { %v7050_v46 = vcombine.high %v1556_v24, %v1564_v51  ;;  %v1548_v52 = vld [vmem:[%s10796_s5 + $0x770] sm:$0xff]  ;;  %v7288_v57 = vcombine.high %v1795_v47, %v1803_v49  ;;  %v1739_v23 = vld [vmem:[%s10796_s5 + $0xd68] sm:$0xff] }
 0x301   :  { %4922 = vmatpush1.bf16.msra.mxu1 %v7143_v50  ;;  %v1540_v50 = vld [vmem:[%s10796_s5 + $0x730] sm:$0xff] }
 0x302   :  { %4963 = vmatpush1.bf16.msra.mxu0 %v6889_v53  ;;  %4923 = vmatprep.subr.bf16.mxu1 %v7128_v9  ;;  %v7303_v53 = vcombine.low %v1811_v36, %v1819_v37  ;;  %v7049_v9 = vcombine.low %v1556_v24, %v1564_v51  ;;  %v1492_v13 = vld [vmem:[%s10796_s5 + $0x5b0] sm:$0xff]  ;;  %v1715_v36 = vld [vmem:[%s10796_s5 + $0xca8] sm:$0xff] }
 0x303   :  { %4964 = vmatprep.subr.bf16.mxu0 %v6874_v58  ;;  %v7034_v58 = vcombine.high %v1540_v50, %v1548_v52  ;;  %v1500_v14 = vld [vmem:[%s10796_s5 + $0x5f0] sm:$0xff]  ;;  %v1723_v37 = vld [vmem:[%s10796_s5 + $0xce8] sm:$0xff] }
 0x304   :  { %v1476_v62 = vld [vmem:[%s10796_s5 + $0x530] sm:$0xff] }
 0x305   :  { %4924 = vmatpush1.bf16.msra.mxu1 %v7127_v0  ;;  %v7287_v0 = vcombine.low %v1795_v47, %v1803_v49  ;;  %v1484_v5 = vld [vmem:[%s10796_s5 + $0x570] sm:$0xff]  ;;  %v1699_v47 = vld [vmem:[%s10796_s5 + $0xc28] sm:$0xff] }
 0x306   :  { %4965 = vmatpush1.bf16.msra.mxu0 %v6873_v1  ;;  %4925 = vmatprep.subr.bf16.mxu1 %v7112_v2  ;;  %v7033_v1 = vcombine.low %v1540_v50, %v1548_v52  ;;  %v7272_v2 = vcombine.high %v1779_v59, %v1787_v60  ;;  %v1460_v24 = vld [vmem:[%s10796_s5 + $0x4b0] sm:$0xff]  ;;  %v1707_v49 = vld [vmem:[%s10796_s5 + $0xc68] sm:$0xff] }
 0x307   :  { %4966 = vmatprep.subr.bf16.mxu0 %v6858_v29  ;;  %v7018_v29 = vcombine.high %v1524_v61, %v1532_v63  ;;  %v1468_v51 = vld [vmem:[%s10796_s5 + $0x4f0] sm:$0xff] }
 0x308   :  { %v1444_v50 = vld [vmem:[%s10796_s5 + $0x430] sm:$0xff] }
 0x309   :  { %4926 = vmatpush1.bf16.msra.mxu1 %v7111_v6  ;;  %v7271_v6 = vcombine.low %v1779_v59, %v1787_v60  ;;  %v1452_v52 = vld [vmem:[%s10796_s5 + $0x470] sm:$0xff] }
 0x30a   :  { %4967 = vmatpush1.bf16.msra.mxu0 %v6857_v7  ;;  %4927 = vmatprep.subr.bf16.mxu1 %v7096_v8  ;;  %v7017_v7 = vcombine.low %v1524_v61, %v1532_v63  ;;  %v7256_v8 = vcombine.high %v1763_v30, %v1771_v34  ;;  %v6938_v59 = vcombine.high %v1444_v50, %v1452_v52  ;;  %v1684_v60 = vld [vmem:[%s10796_s5 + $0xbb0] sm:$0xff]  ;;  %v1429_v63 = vld [vmem:[%s10796_s5 + $0x3b8] sm:$0xff] }
 0x30b   :  { %4968 = vmatprep.subr.bf16.mxu0 %v6842_v10  ;;  %v7002_v10 = vcombine.high %v1508_v3, %v1516_v4  ;;  %v1692_v61 = vld [vmem:[%s10796_s5 + $0xbf0] sm:$0xff] }
 0x30d   :  { %4928 = vmatpush1.bf16.msra.mxu1 %v7095_v16  ;;  %v7255_v16 = vcombine.low %v1763_v30, %v1771_v34  ;;  %v7178_v30 = vcombine.high %v1684_v60, %v1692_v61 }
 0x30e   :  { %4969 = vmatpush1.bf16.msra.mxu0 %v6841_v17  ;;  %4929 = vmatprep.subr.bf16.mxu1 %v7080_v18  ;;  %v7001_v17 = vcombine.low %v1508_v3, %v1516_v4  ;;  %v7240_v18 = vcombine.high %v1747_v11, %v1755_v12  ;;  %v1668_v4 = vld [vmem:[%s10796_s5 + $0xb30] sm:$0xff] }
 0x30f   :  { %4970 = vmatprep.subr.bf16.mxu0 %v6826_v21  ;;  %v6986_v21 = vcombine.high %v1492_v13, %v1500_v14 }
 0x311   :  { %4930 = vmatpush1.bf16.msra.mxu1 %v7079_v26  ;;  %v7239_v26 = vcombine.low %v1747_v11, %v1755_v12  ;;  %v1421_v11 = vld [vmem:[%s10796_s5 + $0x378] sm:$0xff] }
 0x312   :  { %4971 = vmatpush1.bf16.msra.mxu0 %v6825_v44  ;;  %4931 = vmatprep.subr.bf16.mxu1 %v7064_v31  ;;  %v6985_v44 = vcombine.low %v1492_v13, %v1500_v14  ;;  %v7224_v31 = vcombine.high %v1731_v22, %v1739_v23 }
 0x313   :  { %4972 = vmatprep.subr.bf16.mxu0 %v6810_v35  ;;  %v6970_v35 = vcombine.high %v1476_v62, %v1484_v5 }
 0x315   :  { %4932 = vmatpush1.bf16.msra.mxu1 %v7063_v41  ;;  %v7223_v41 = vcombine.low %v1731_v22, %v1739_v23 }
 0x316   :  { %4973 = vmatpush1.bf16.msra.mxu0 %v6809_v45  ;;  %4933 = vmatprep.subr.bf16.mxu1 %v7304_v28  ;;  %v6969_v45 = vcombine.low %v1476_v62, %v1484_v5  ;;  %v7208_v28 = vcombine.high %v1715_v36, %v1723_v37 }
 0x317   :  { %4974 = vmatprep.subr.bf16.mxu0 %v7050_v46  ;;  %v6954_v46 = vcombine.high %v1460_v24, %v1468_v51 }
 0x319   :  { %4934 = vmatpush2.bf16.msra.mxu1 %v7303_v53  ;;  %v7207_v53 = vcombine.low %v1715_v36, %v1723_v37  ;;  %v1636_v37 = vld [vmem:[%s10796_s5 + $0xa30] sm:$0xff] }
 0x31a   :  { %4975 = vmatpush2.bf16.msra.mxu0 %v7049_v9  ;;  %4935 = vmatprep.subr.bf16.mxu1 %v7288_v57  ;;  %v6953_v9 = vcombine.low %v1460_v24, %v1468_v51  ;;  %v7192_v57 = vcombine.high %v1699_v47, %v1707_v49  ;;  %v1644_v24 = vld [vmem:[%s10796_s5 + $0xa70] sm:$0xff] }
 0x31b   :  { %4976 = vmatprep.subr.bf16.mxu0 %v7034_v58  ;;  %v1844_v58 = vsub.s32 4, %v8421_v38 }
 0x31d   :  { %4936 = vmatpush2.bf16.msra.mxu1 %v7287_v0  ;;  %v1437_v0 = vld [vmem:[%s10796_s5 + $0x3f8] sm:$0xff]  ;;  %v1845_v34 = vrot.slane %v9572_v15, %v1844_v58 }
 0x31e   :  { %4977 = vmatpush2.bf16.msra.mxu0 %v7033_v1  ;;  %4937 = vmatprep.subr.bf16.mxu1 %v7272_v2  ;;  %v1848_v1 = vsub.s32 5, %v8421_v38  ;;  %v7191_v2 = vcombine.low %v1699_v47, %v1707_v49  ;;  %v6924_v3 = vcombine.high %v1429_v63, %v1437_v0  ;;  %v6923_v12 = vcombine.low %v1429_v63, %v1437_v0 }
 0x31f   :  { %4978 = vmatprep.subr.bf16.mxu0 %v7018_v29  ;;  %v6937_v29 = vcombine.low %v1444_v50, %v1452_v52  ;;  %v4665_v13 = vadd.f32 %v9823_v33, %v1845_v34  ;;  %v1405_v33 = vld [vmem:[%s10796_s5 + $0x2f8] sm:$0xff]  ;;  %v7130_v49 = vcombine.high %v1636_v37, %v1644_v24 }
 0x320   :  { %v1357_v34 = vld [vmem:[%s10796_s5 + $0x178] sm:$0xff] }
 0x321   :  { %4938 = vmatpush2.bf16.msra.mxu1 %v7271_v6  ;;  %v1676_v6 = vld [vmem:[%s10796_s5 + $0xb70] sm:$0xff] }
 0x322   :  { %4979 = vmatpush2.bf16.msra.mxu0 %v7017_v7  ;;  %4939 = vmatprep.subr.bf16.mxu1 %v7256_v8  ;;  %v1849_v7 = vrot.slane %v9572_v15, %v1848_v1  ;;  %v7177_v8 = vcombine.low %v1684_v60, %v1692_v61  ;;  %v7162_v14 = vcombine.high %v1668_v4, %v1676_v6  ;;  %v1652_v15 = vld [vmem:[%s10796_s5 + $0xab0] sm:$0xff] }
 0x323   :  { %4980 = vmatprep.subr.bf16.mxu0 %v7002_v10  ;;  %v1413_v10 = vld [vmem:[%s10796_s5 + $0x338] sm:$0xff]  ;;  %v7161_v5 = vcombine.low %v1668_v4, %v1676_v6  ;;  %v7129_v60 = vcombine.low %v1636_v37, %v1644_v24 }
 0x324   :  { %v4667_v22 = vadd.f32 %v9830_v27, %v1849_v7  ;;  %v1557_v37 = vld [vmem:[%s10796_s5 + $0x7b8] sm:$0xff] }
 0x325   :  { %4940 = vmatpush2.bf16.msra.mxu1 %v7255_v16  ;;  %v1660_v16 = vld [vmem:[%s10796_s5 + $0xaf0] sm:$0xff]  ;;  %v1565_v24 = vld [vmem:[%s10796_s5 + $0x7f8] sm:$0xff] }
 0x326   :  { %4981 = vmatpush2.bf16.msra.mxu0 %v7001_v17  ;;  %4941 = vmatprep.subr.bf16.mxu1 %v7240_v18  ;;  %v6908_v18 = vcombine.high %v1413_v10, %v1421_v11 }
 0x327   :  { %4982 = vmatprep.subr.bf16.mxu0 %v6986_v21  ;;  %v1397_v21 = vld [vmem:[%s10796_s5 + $0x2b8] sm:$0xff] }
 0x328   :  { %v6892_v27 = vcombine.high %v1397_v21, %v1405_v33  ;;  %v6891_v47 = vcombine.low %v1397_v21, %v1405_v33  ;;  %v1317_v21 = vld [vmem:[%s10796_s5 + $0x38] sm:$0xff] }
 0x329   :  { %4942 = vmatpush2.bf16.msra.mxu1 %v7239_v26  ;;  %v1325_v33 = vld [vmem:[%s10796_s5 + $0x78] sm:$0xff] }
 0x32a   :  { %4983 = vmatpush2.bf16.msra.mxu0 %v6985_v44  ;;  %4943 = vmatprep.subr.bf16.mxu1 %v7224_v31  ;;  %v6907_v44 = vcombine.low %v1413_v10, %v1421_v11  ;;  %v7146_v31 = vcombine.high %v1652_v15, %v1660_v16  ;;  %v1596_v10 = vld [vmem:[%s10796_s5 + $0x8f0] sm:$0xff]  ;;  %v1333_v11 = vld [vmem:[%s10796_s5 + $0xb8] sm:$0xff] }
 0x32b   :  { %4984 = vmatprep.subr.bf16.mxu0 %v6970_v35 }
 0x32d   :  { %4944 = vmatpush2.bf16.msra.mxu1 %v7223_v41  ;;  %v1381_v41 = vld [vmem:[%s10796_s5 + $0x238] sm:$0xff] }
 0x32e   :  { %4985 = vmatpush2.bf16.msra.mxu0 %v6969_v45  ;;  %4945 = vmatprep.subr.bf16.mxu1 %v7208_v28  ;;  %v7145_v28 = vcombine.low %v1652_v15, %v1660_v16 }
 0x32f   :  { %4986 = vmatprep.subr.bf16.mxu0 %v6954_v46 }
 0x331   :  { %4946 = vmatpush2.bf16.msra.mxu1 %v7207_v53  ;;  %v1620_v53 = vld [vmem:[%s10796_s5 + $0x9b0] sm:$0xff] }
 0x332   :  { %4987 = vmatpush2.bf16.msra.mxu0 %v6953_v9  ;;  %4947 = vmatprep.subr.bf16.mxu1 %v7192_v57  ;;  %v1628_v9 = vld [vmem:[%s10796_s5 + $0x9f0] sm:$0xff]  ;;  %v1365_v57 = vld [vmem:[%s10796_s5 + $0x1b8] sm:$0xff] }
 0x333   :  { %4988 = vmatprep.subr.bf16.mxu0 %v6938_v59  ;;  %v1373_v59 = vld [vmem:[%s10796_s5 + $0x1f8] sm:$0xff]  ;;  %v7114_v63 = vcombine.high %v1620_v53, %v1628_v9 }
 0x334   :  { %v6860_v0 = vcombine.high %v1365_v57, %v1373_v59  ;;  %v6859_v4 = vcombine.low %v1365_v57, %v1373_v59  ;;  %v1780_v57 = vld [vmem:[%s10796_s5 + $0xeb0] sm:$0xff] }
 0x335   :  { %4948 = vmatpush2.bf16.msra.mxu1 %v7191_v2  ;;  %v1604_v2 = vld [vmem:[%s10796_s5 + $0x930] sm:$0xff] }
 0x336   :  { %4989 = vmatpush2.bf16.msra.mxu0 %v6937_v29  ;;  %4999 = vmatprep.subr.bf16.mxu1 %v7178_v30  ;;  %v1612_v29 = vld [vmem:[%s10796_s5 + $0x970] sm:$0xff]  ;;  %v1349_v30 = vld [vmem:[%s10796_s5 + $0x138] sm:$0xff] }
 0x337   :  { %5040 = vmatprep.subr.bf16.mxu0 %v6924_v3  ;;  %v7113_v3 = vcombine.low %v1620_v53, %v1628_v9  ;;  %v7098_v6 = vcombine.high %v1604_v2, %v1612_v29  ;;  %v6844_v7 = vcombine.high %v1349_v30, %v1357_v34  ;;  %v1788_v59 = vld [vmem:[%s10796_s5 + $0xef0] sm:$0xff] }
 0x338   :  { %v4705_v17 = vpop.f32.mrf.mxu1  ;;  %4950 = vmatmul.mubr.bf16.vlgmr.msra.gmra.mxu1 %v8989_v20 }
 0x339   :  { %v10035_v23 = vadd.f32 %v4705_v17, %v4665_v13  ;;  %v10037_v62 = vpop.f32.mrf.mxu0  ;;  %4991 = vmatmul.mubr.bf16.vlgmr.msra.gmra.mxu0 %v8873_v56  ;;  %5000 = vmatpush1.bf16.msra.mxu1 %v7177_v8  ;;  %v1588_v8 = vld [vmem:[%s10796_s5 + $0x8b0] sm:$0xff]  ;;  %v7097_v13 = vcombine.low %v1604_v2, %v1612_v29  ;;  %v7274_v2 = vcombine.high %v1780_v57, %v1788_v59 }
 0x33a   :  { %5031 = vmatprep.mubr.bf16.mxu1 %v8987_v19  ;;  %v4707_v26 = vpop.f32.mrf.mxu1  ;;  %5041 = vmatpush1.bf16.msra.mxu0 %v6923_v12  ;;  %v1341_v12 = vld [vmem:[%s10796_s5 + $0xf8] sm:$0xff]  ;;  %v7082_v15 = vcombine.high %v1588_v8, %v1596_v10  ;;  %v1572_v17 = vld [vmem:[%s10796_s5 + $0x830] sm:$0xff] }
 0x33b   :  { %v10041_v35 = vadd.f32 %v4707_v26, %v4667_v22  ;;  %5072 = vmatprep.mubr.bf16.mxu0 %v8871_v55  ;;  %v10044_v36 = vpop.f32.mrf.mxu0  ;;  %5001 = vmatprep.subr.bf16.mxu1 %v7162_v14  ;;  %v1389_v55 = vld [vmem:[%s10796_s5 + $0x278] sm:$0xff]  ;;  %v6843_v14 = vcombine.low %v1349_v30, %v1357_v34  ;;  %v6828_v16 = vcombine.high %v1333_v11, %v1341_v12  ;;  %v1764_v30 = vld [vmem:[%s10796_s5 + $0xe30] sm:$0xff] }
 0x33c   :  { %v4709_v51 = vpop.f32.mrf.mxu1  ;;  %5042 = vmatprep.subr.bf16.mxu0 %v6908_v18  ;;  %v6876_v52 = vcombine.high %v1381_v41, %v1389_v55  ;;  %v6875_v61 = vcombine.low %v1381_v41, %v1389_v55  ;;  %v1580_v18 = vld [vmem:[%s10796_s5 + $0x870] sm:$0xff]  ;;  %v7081_v22 = vcombine.low %v1588_v8, %v1596_v10  ;;  %v6811_v41 = vcombine.low %v1317_v21, %v1325_v33 }
 0x33d   :  { %v4750_v45 = vpop.f32.mrf.mxu0  ;;  %5002 = vmatpush1.bf16.msra.mxu1 %v7161_v5  ;;  %v6827_v5 = vcombine.low %v1333_v11, %v1341_v12  ;;  %v7066_v26 = vcombine.high %v1572_v17, %v1580_v18  ;;  %v7065_v51 = vcombine.low %v1572_v17, %v1580_v18  ;;  %v1772_v34 = vld [vmem:[%s10796_s5 + $0xe70] sm:$0xff] }
 0x33e   :  { %v4710_v46 = vpop.f32.mrf.mxu1  ;;  %5043 = vmatpush1.bf16.msra.mxu0 %v6907_v44  ;;  %5003 = vmatprep.subr.bf16.mxu1 %v7146_v31  ;;  %v6812_v44 = vcombine.high %v1317_v21, %v1325_v33  ;;  %v1812_v31 = vld [vmem:[%s10796_s5 + $0xfb0] sm:$0xff]  ;;  %v7052_v45 = vcombine.high %v1557_v37, %v1565_v24  ;;  %v7258_v8 = vcombine.high %v1764_v30, %v1772_v34 }
 0x33f   :  { %v4751_v50 = vpop.f32.mrf.mxu0  ;;  %5044 = vmatprep.subr.bf16.mxu0 %v6892_v27  ;;  %v1820_v27 = vld [vmem:[%s10796_s5 + $0xff0] sm:$0xff] }
 0x340   :  { %v7306_v55 = vcombine.high %v1812_v31, %v1820_v27  ;;  %v1804_v46 = vld [vmem:[%s10796_s5 + $0xf70] sm:$0xff]  ;;  %v7305_v50 = vcombine.low %v1812_v31, %v1820_v27 }
 0x341   :  { %5004 = vmatpush1.bf16.msra.mxu1 %v7145_v28  ;;  %v1796_v28 = vld [vmem:[%s10796_s5 + $0xf30] sm:$0xff] }
 0x342   :  { %5045 = vmatpush1.bf16.msra.mxu0 %v6891_v47  ;;  %5005 = vmatprep.subr.bf16.mxu1 %v7130_v49  ;;  %v1541_v47 = vld [vmem:[%s10796_s5 + $0x738] sm:$0xff]  ;;  %v7290_v53 = vcombine.high %v1796_v28, %v1804_v46  ;;  %v1748_v11 = vld [vmem:[%s10796_s5 + $0xdb0] sm:$0xff] }
 0x343   :  { %5046 = vmatprep.subr.bf16.mxu0 %v6876_v52  ;;  %v1549_v49 = vld [vmem:[%s10796_s5 + $0x778] sm:$0xff]  ;;  %v7051_v52 = vcombine.low %v1557_v37, %v1565_v24  ;;  %v1756_v12 = vld [vmem:[%s10796_s5 + $0xdf0] sm:$0xff] }
 0x344   :  { %v7036_v9 = vcombine.high %v1541_v47, %v1549_v49  ;;  %v7242_v17 = vcombine.high %v1748_v11, %v1756_v12  ;;  %v1732_v21 = vld [vmem:[%s10796_s5 + $0xd30] sm:$0xff] }
 0x345   :  { %5006 = vmatpush1.bf16.msra.mxu1 %v7129_v60  ;;  %v1525_v60 = vld [vmem:[%s10796_s5 + $0x6b8] sm:$0xff]  ;;  %v1740_v33 = vld [vmem:[%s10796_s5 + $0xd70] sm:$0xff] }
 0x346   :  { %5047 = vmatpush1.bf16.msra.mxu0 %v6875_v61  ;;  %5007 = vmatprep.subr.bf16.mxu1 %v7114_v63  ;;  %v1533_v61 = vld [vmem:[%s10796_s5 + $0x6f8] sm:$0xff]  ;;  %v7289_v63 = vcombine.low %v1796_v28, %v1804_v46  ;;  %v7226_v31 = vcombine.high %v1732_v21, %v1740_v33  ;;  %v1716_v37 = vld [vmem:[%s10796_s5 + $0xcb0] sm:$0xff] }
 0x347   :  { %5048 = vmatprep.subr.bf16.mxu0 %v6860_v0  ;;  %v7035_v0 = vcombine.low %v1541_v47, %v1549_v49  ;;  %v7020_v29 = vcombine.high %v1525_v60, %v1533_v61  ;;  %v1724_v24 = vld [vmem:[%s10796_s5 + $0xcf0] sm:$0xff] }
 0x348   :  { %v7210_v28 = vcombine.high %v1716_v37, %v1724_v24  ;;  %v1700_v47 = vld [vmem:[%s10796_s5 + $0xc30] sm:$0xff] }
 0x349   :  { %5008 = vmatpush1.bf16.msra.mxu1 %v7113_v3  ;;  %v1509_v3 = vld [vmem:[%s10796_s5 + $0x638] sm:$0xff]  ;;  %v1708_v49 = vld [vmem:[%s10796_s5 + $0xc70] sm:$0xff] }
 0x34a   :  { %5049 = vmatpush1.bf16.msra.mxu0 %v6859_v4  ;;  %5009 = vmatprep.subr.bf16.mxu1 %v7098_v6  ;;  %v1517_v4 = vld [vmem:[%s10796_s5 + $0x678] sm:$0xff]  ;;  %v7273_v6 = vcombine.low %v1780_v57, %v1788_v59  ;;  %v7194_v57 = vcombine.high %v1700_v47, %v1708_v49  ;;  %v1852_v59 = vsub.s32 6, %v8421_v38 }
 0x34b   :  { %5050 = vmatprep.subr.bf16.mxu0 %v6844_v7  ;;  %v7019_v7 = vcombine.low %v1525_v60, %v1533_v61  ;;  %v7004_v10 = vcombine.high %v1509_v3, %v1517_v4  ;;  %v1685_v61 = vld [vmem:[%s10796_s5 + $0xbb8] sm:$0xff] }
 0x34d   :  { %5010 = vmatpush1.bf16.msra.mxu1 %v7097_v13  ;;  %v1493_v13 = vld [vmem:[%s10796_s5 + $0x5b8] sm:$0xff] }
 0x34e   :  { %5051 = vmatpush1.bf16.msra.mxu0 %v6843_v14  ;;  %5011 = vmatprep.subr.bf16.mxu1 %v7082_v15  ;;  %v1501_v14 = vld [vmem:[%s10796_s5 + $0x5f8] sm:$0xff]  ;;  %v7257_v15 = vcombine.low %v1764_v30, %v1772_v34  ;;  %v8032_v34 = vld [vmem:[%s10797_s6] sm:$0xff] }
 0x34f   :  { %5052 = vmatprep.subr.bf16.mxu0 %v6828_v16  ;;  %v7003_v16 = vcombine.low %v1509_v3, %v1517_v4  ;;  %v6988_v18 = vcombine.high %v1493_v13, %v1501_v14  ;;  %v1853_v3 = vrot.slane %v8032_v34, %v1852_v59  ;;  %v7896_v4 = vld [vmem:[%s10798_s7 + $0x78] sm:$0xff]  }
 0x351   :  { %5012 = vmatpush1.bf16.msra.mxu1 %v7081_v22  ;;  %v1477_v22 = vld [vmem:[%s10796_s5 + $0x538] sm:$0xff] }
 0x352   :  { %5053 = vmatpush1.bf16.msra.mxu0 %v6827_v5  ;;  %5013 = vmatprep.subr.bf16.mxu1 %v7066_v26  ;;  %v1485_v5 = vld [vmem:[%s10796_s5 + $0x578] sm:$0xff]  ;;  %v7241_v26 = vcombine.low %v1748_v11, %v1756_v12 }
 0x353   :  { %5054 = vmatprep.subr.bf16.mxu0 %v6812_v44  ;;  %v6987_v44 = vcombine.low %v1493_v13, %v1501_v14  ;;  %v6972_v27 = vcombine.high %v1477_v22, %v1485_v5  ;;  %v7897_v12 = vld [vmem:[%s10798_s7 + $0x38] sm:$0xff]  }
 0x354   :  { %v1653_v14 = vld [vmem:[%s10796_s5 + $0xab8] sm:$0xff] }
 0x355   :  { %5014 = vmatpush1.bf16.msra.mxu1 %v7065_v51  ;;  %v1461_v51 = vld [vmem:[%s10796_s5 + $0x4b8] sm:$0xff] }
 0x356   :  { %5055 = vmatpush1.bf16.msra.mxu0 %v6811_v41  ;;  %5015 = vmatprep.subr.bf16.mxu1 %v7306_v55  ;;  %v1469_v41 = vld [vmem:[%s10796_s5 + $0x4f8] sm:$0xff]  ;;  %v7225_v55 = vcombine.low %v1732_v21, %v1740_v33 }
 0x357   :  { %5056 = vmatprep.subr.bf16.mxu0 %v7052_v45  ;;  %v6971_v45 = vcombine.low %v1477_v22, %v1485_v5  ;;  %v6956_v46 = vcombine.high %v1461_v51, %v1469_v41 }
 0x359   :  { %5016 = vmatpush2.bf16.msra.mxu1 %v7305_v50  ;;  %v1445_v50 = vld [vmem:[%s10796_s5 + $0x438] sm:$0xff] }
 0x35a   :  { %5057 = vmatpush2.bf16.msra.mxu0 %v7051_v52  ;;  %5017 = vmatprep.subr.bf16.mxu1 %v7290_v53  ;;  %v1453_v52 = vld [vmem:[%s10796_s5 + $0x478] sm:$0xff]  ;;  %v7209_v53 = vcombine.low %v1716_v37, %v1724_v24 }
 0x35b   :  { %5058 = vmatprep.subr.bf16.mxu0 %v7036_v9  ;;  %v6955_v9 = vcombine.low %v1461_v51, %v1469_v41  ;;  %v6940_v60 = vcombine.high %v1445_v50, %v1453_v52 }
 0x35d   :  { %5018 = vmatpush2.bf16.msra.mxu1 %v7289_v63  ;;  %v1693_v63 = vld [vmem:[%s10796_s5 + $0xbf8] sm:$0xff] }
 0x35e   :  { %5059 = vmatpush2.bf16.msra.mxu0 %v7035_v0  ;;  %5019 = vmatprep.subr.bf16.mxu1 %v7274_v2  ;;  %v1856_v0 = vsub.s32 7, %v8421_v38  ;;  %v7193_v2 = vcombine.low %v1700_v47, %v1708_v49  ;;  %v7180_v30 = vcombine.high %v1685_v61, %v1693_v63  ;;  %v7179_v11 = vcombine.low %v1685_v61, %v1693_v63  ;;  %v1621_v47 = vld [vmem:[%s10796_s5 + $0x9b8] sm:$0xff] }
 0x35f   :  { %5060 = vmatprep.subr.bf16.mxu0 %v7020_v29  ;;  %v6939_v29 = vcombine.low %v1445_v50, %v1453_v52  ;;  %v1629_v49 = vld [vmem:[%s10796_s5 + $0x9f8] sm:$0xff]  ;;  %v7903_v52 = vld [vmem:[%s10798_s7 + $0x20] sm:$0xff]  }
 0x360   :  { %v7115_v61 = vcombine.low %v1621_v47, %v1629_v49  ;;  %v7905_v63 = vld [vmem:[%s10798_s7 + $0x18] sm:$0xff]  }
 0x361   :  { %5020 = vmatpush2.bf16.msra.mxu1 %v7273_v6  ;;  %v5123_v6 = vmax.f32 %v9620_v54, 0.0  ;;  %v4747_v54 = vadd.f32 %v10037_v62, %v1853_v3  ;;  %v8024_v38 = vld [vmem:[%s10800_s9 + $0x38] sm:$0xff]  }
 0x362   :  { %5061 = vmatpush2.bf16.msra.mxu0 %v7019_v7  ;;  %5021 = vmatprep.subr.bf16.mxu1 %v7258_v8  ;;  %v1669_v7 = vld [vmem:[%s10796_s5 + $0xb38] sm:$0xff] }
 0x363   :  { %5062 = vmatprep.subr.bf16.mxu0 %v7004_v10  ;;  %v1677_v8 = vld [vmem:[%s10796_s5 + $0xb78] sm:$0xff]  ;;  %v1857_v10 = vrot.slane %v8032_v34, %v1856_v0 }
 0x364   :  { %v7164_v13 = vcombine.high %v1669_v7, %v1677_v8  ;;  %v7163_v22 = vcombine.low %v1669_v7, %v1677_v8  ;;  %v1597_v34 = vld [vmem:[%s10796_s5 + $0x8f8] sm:$0xff]  ;;  %v7908_v7 = vld [vmem:[%s10798_s7 + $0x48] sm:$0xff]  }
 0x365   :  { %5022 = vmatpush2.bf16.msra.mxu1 %v7257_v15  ;;  %v1661_v15 = vld [vmem:[%s10796_s5 + $0xaf8] sm:$0xff]  ;;  %v4749_v62 = vadd.f32 %v10044_v36, %v1857_v10 }
 0x366   :  { %5063 = vmatpush2.bf16.msra.mxu0 %v7003_v16  ;;  %5023 = vmatprep.subr.bf16.mxu1 %v7242_v17  ;;  %v5139_v16 = vpack.c.bf16 %v5123_v6, %v5123_v6  ;;  %v7147_v51 = vcombine.low %v1653_v14, %v1661_v15  ;;  %v1573_v8 = vld [vmem:[%s10796_s5 + $0x838] sm:$0xff] }
 0x367   :  { %5064 = vmatprep.subr.bf16.mxu0 %v6988_v18  ;;  %v7898_v18 = vld [vmem:[%s10798_s7 + $0x70] sm:$0xff]   ;;  %v1581_v10 = vld [vmem:[%s10796_s5 + $0x878] sm:$0xff] }
 0x369   :  { %5024 = vmatpush2.bf16.msra.mxu1 %v7241_v26  ;;  %v7899_v26 = vld [vmem:[%s10798_s7 + $0x30] sm:$0xff]  }
 0x36a   :  { %5065 = vmatpush2.bf16.msra.mxu0 %v6987_v44  ;;  %5025 = vmatprep.subr.bf16.mxu1 %v7226_v31  ;;  %v7148_v44 = vcombine.high %v1653_v14, %v1661_v15  ;;  %v1813_v14 = vld [vmem:[%s10796_s5 + $0xfb8] sm:$0xff] }
 0x36b   :  { %5066 = vmatprep.subr.bf16.mxu0 %v6972_v27  ;;  %v1645_v27 = vld [vmem:[%s10796_s5 + $0xa78] sm:$0xff] }
 0x36c   :  { %v1821_v15 = vld [vmem:[%s10796_s5 + $0xff8] sm:$0xff] }
 0x36d   :  { %5026 = vmatpush2.bf16.msra.mxu1 %v7225_v55  ;;  %v7901_v55 = vld [vmem:[%s10798_s7 + $0x28] sm:$0xff]  }
 0x36e   :  { %5067 = vmatpush2.bf16.msra.mxu0 %v6971_v45  ;;  %5027 = vmatprep.subr.bf16.mxu1 %v7210_v28 }
 0x36f   :  { %5068 = vmatprep.subr.bf16.mxu0 %v6956_v46  ;;  %v7902_v46 = vld [vmem:[%s10798_s7 + $0x60] sm:$0xff]  }
 0x371   :  { %5028 = vmatpush2.bf16.msra.mxu1 %v7209_v53  ;;  %v7116_v53 = vcombine.high %v1621_v47, %v1629_v49  ;;  %v1773_v47 = vld [vmem:[%s10796_s5 + $0xe78] sm:$0xff] }
 0x372   :  { %5069 = vmatpush2.bf16.msra.mxu0 %v6955_v9  ;;  %5029 = vmatprep.subr.bf16.mxu1 %v7194_v57  ;;  %v7904_v9 = vld [vmem:[%s10798_s7 + $0x58] sm:$0xff]  }
 0x373   :  { %5070 = vmatprep.subr.bf16.mxu0 %v6940_v60  ;;  %v1605_v57 = vld [vmem:[%s10796_s5 + $0x938] sm:$0xff] }
 0x374   :  { %v1613_v60 = vld [vmem:[%s10796_s5 + $0x978] sm:$0xff] }
 0x375   :  { %5030 = vmatpush2.bf16.msra.mxu1 %v7193_v2  ;;  %v7100_v2 = vcombine.high %v1605_v57, %v1613_v60  ;;  %v7099_v3 = vcombine.low %v1605_v57, %v1613_v60  ;;  %v1757_v57 = vld [vmem:[%s10796_s5 + $0xdf8] sm:$0xff] }
 0x376   :  { %5071 = vmatpush2.bf16.msra.mxu0 %v6939_v29  ;;  %5081 = vmatprep.subr.bf16.mxu1 %v7180_v30  ;;  %v7906_v29 = vld [vmem:[%s10798_s7 + $0x50] sm:$0xff]   ;;  %v1589_v30 = vld [vmem:[%s10796_s5 + $0x8b8] sm:$0xff] }
 0x377   :  { %7447 = vmatprep.subr.bf16.mxu0 %v7896_v4  ;;  %v7907_v4 = vld [vmem:[%s10798_s7 + $0x10] sm:$0xff]   ;;  %v7084_v6 = vcombine.high %v1589_v30, %v1597_v34 }
 0x378   :  { %v4787_v17 = vpop.f32.mrf.mxu1  ;;  %5032 = vmatmul.mubr.bf16.vlgmr.msra.gmra.mxu1 %v8989_v20 }
 0x379   :  { %v10242_v21 = vadd.f32 %v4787_v17, %v4747_v54  ;;  %v10244_v33 = vpop.f32.mrf.mxu0  ;;  %5073 = vmatmul.mubr.bf16.vlgmr.msra.gmra.mxu0 %v8873_v56  ;;  %5082 = vmatpush1.bf16.msra.mxu1 %v7179_v11  ;;  %v7900_v56 = vld [vmem:[%s10798_s7 + $0x68] sm:$0xff]   ;;  %v7083_v11 = vcombine.low %v1589_v30, %v1597_v34  ;;  %v7068_v54 = vcombine.high %v1573_v8, %v1581_v10  ;;  %v7911_v17 = vld [vmem:[%s10798_s7] sm:$0xff]   ;;  %v1741_v30 = vld [vmem:[%s10796_s5 + $0xd78] sm:$0xff] }
 0x37a   :  { %5113 = vmatprep.mubr.bf16.mxu1 %v8987_v19  ;;  %v4789_v5 = vpop.f32.mrf.mxu1  ;;  %7448 = vmatpush3.bf16.msra.mxu0 %v7897_v12  ;;  %v1637_v19 = vld [vmem:[%s10796_s5 + $0xa38] sm:$0xff]  ;;  %v7909_v12 = vld [vmem:[%s10798_s7 + $0x8] sm:$0xff]  }
 0x37b   :  { %v10251_v31 = vadd.f32 %v4789_v5, %v4749_v62  ;;  %6217 = vmatprep.mubr.bf16.mxu0 %v5139_v16  ;;  %v10253_v36 = vpop.f32.mrf.mxu0  ;;  %5083 = vmatprep.subr.bf16.mxu1 %v7164_v13  ;;  %v7132_v45 = vcombine.high %v1637_v19, %v1645_v27  ;;  %v7131_v50 = vcombine.low %v1637_v19, %v1645_v27  ;;  %v7910_v13 = vld [vmem:[%s10798_s7 + $0x40] sm:$0xff]   ;;  %v5122_v62 = vmax.f32 %v9613_v48, 0.0  ;;  %v7913_v48 = vld [vmem:[%s10798_s7 + $0x138] sm:$0xff]  }
 0x37c   :  { %v4791_v37 = vpop.f32.mrf.mxu1  ;;  %7449 = vmatprep.subr.bf16.mxu0 %v7898_v18  ;;  %v7067_v16 = vcombine.low %v1573_v8, %v1581_v10  ;;  %v7308_v18 = vcombine.high %v1813_v14, %v1821_v15  ;;  %v5127_v5 = vmax.f32 %v10041_v35, 0.0  ;;  %v7914_v35 = vld [vmem:[%s10798_s7 + $0x170] sm:$0xff]   ;;  %v1725_v8 = vld [vmem:[%s10796_s5 + $0xcf8] sm:$0xff] }
 0x37d   :  { %v4832_v24 = vpop.f32.mrf.mxu0  ;;  %5084 = vmatpush1.bf16.msra.mxu1 %v7163_v22  ;;  %v7912_v22 = vld [vmem:[%s10798_s7 + $0x178] sm:$0xff]   ;;  %v5138_v19 = vpack.c.bf16 %v5122_v62, %v5122_v62 }
 0x37e   :  { %v4792_v41 = vpop.f32.mrf.mxu1  ;;  %7450 = vmatpush3.bf16.msra.mxu0 %v7899_v26  ;;  %5085 = vmatprep.subr.bf16.mxu1 %v7148_v44  ;;  %v1797_v26 = vld [vmem:[%s10796_s5 + $0xf38] sm:$0xff] }
 0x37f   :  { %v4833_v28 = vpop.f32.mrf.mxu0  ;;  %7451 = vmatprep.subr.bf16.mxu0 %v7900_v56  ;;  %v1805_v44 = vld [vmem:[%s10796_s5 + $0xf78] sm:$0xff]  ;;  %v7307_v56 = vcombine.low %v1813_v14, %v1821_v15 }
 0x380   :  { %v7292_v27 = vcombine.high %v1797_v26, %v1805_v44  ;;  %v1781_v37 = vld [vmem:[%s10796_s5 + $0xeb8] sm:$0xff]  ;;  %v7291_v41 = vcombine.low %v1797_v26, %v1805_v44  ;;  %v7916_v28 = vld [vmem:[%s10798_s7 + $0x168] sm:$0xff]   ;;  %v5125_v26 = vmax.f32 %v9827_v25, 0.0 }
 0x381   :  { %5086 = vmatpush1.bf16.msra.mxu1 %v7147_v51  ;;  %v1789_v24 = vld [vmem:[%s10796_s5 + $0xef8] sm:$0xff]  ;;  %v5143_v51 = vpack.c.bf16 %v5127_v5, %v5127_v5 }
 0x382   :  { %7452 = vmatpush3.bf16.msra.mxu0 %v7901_v55  ;;  %5087 = vmatprep.subr.bf16.mxu1 %v7132_v45  ;;  %v7915_v55 = vld [vmem:[%s10798_s7 + $0x130] sm:$0xff]   ;;  %v7276_v45 = vcombine.high %v1781_v37, %v1789_v24  ;;  %v7275_v49 = vcombine.low %v1781_v37, %v1789_v24  ;;  %v1709_v14 = vld [vmem:[%s10796_s5 + $0xc78] sm:$0xff] }
 0x383   :  { %7453 = vmatprep.subr.bf16.mxu0 %v7902_v46  ;;  %v1765_v46 = vld [vmem:[%s10796_s5 + $0xe38] sm:$0xff] }
 0x384   :  { %v7259_v60 = vcombine.low %v1765_v46, %v1773_v47  ;;  %v7928_v5 = vld [vmem:[%s10798_s7 + $0xf8] sm:$0xff]  }
 0x385   :  { %5088 = vmatpush1.bf16.msra.mxu1 %v7131_v50  ;;  %v7917_v50 = vld [vmem:[%s10798_s7 + $0x128] sm:$0xff]   ;;  %v7930_v44 = vld [vmem:[%s10798_s7 + $0x278] sm:$0xff]  }
 0x386   :  { %7454 = vmatpush3.bf16.msra.mxu0 %v7903_v52  ;;  %5089 = vmatprep.subr.bf16.mxu1 %v7116_v53  ;;  %v7260_v52 = vcombine.high %v1765_v46, %v1773_v47  ;;  %v7918_v53 = vld [vmem:[%s10798_s7 + $0x160] sm:$0xff]   ;;  %v7929_v25 = vld [vmem:[%s10798_s7 + $0xb8] sm:$0xff]  }
 0x387   :  { %7455 = vmatprep.subr.bf16.mxu0 %v7904_v9  ;;  %v1749_v9 = vld [vmem:[%s10796_s5 + $0xdb8] sm:$0xff] }
 0x388   :  { %v7243_v34 = vcombine.low %v1749_v9, %v1757_v57 }
 0x389   :  { %5090 = vmatpush1.bf16.msra.mxu1 %v7115_v61  ;;  %v7919_v61 = vld [vmem:[%s10798_s7 + $0x120] sm:$0xff]  }
 0x38a   :  { %7456 = vmatpush3.bf16.msra.mxu0 %v7905_v63  ;;  %5091 = vmatprep.subr.bf16.mxu1 %v7100_v2  ;;  %v7244_v63 = vcombine.high %v1749_v9, %v1757_v57  ;;  %v7920_v2 = vld [vmem:[%s10798_s7 + $0x158] sm:$0xff]   ;;  %v7940_v57 = vld [vmem:[%s10798_s7 + $0xe0] sm:$0xff]  }
 0x38b   :  { %7457 = vmatprep.subr.bf16.mxu0 %v7906_v29  ;;  %v1733_v29 = vld [vmem:[%s10796_s5 + $0xd38] sm:$0xff] }
 0x38c   :  { %v7227_v10 = vcombine.low %v1733_v29, %v1741_v30 }
 0x38d   :  { %5092 = vmatpush1.bf16.msra.mxu1 %v7099_v3  ;;  %v7921_v3 = vld [vmem:[%s10798_s7 + $0x118] sm:$0xff]  }
 0x38e   :  { %7458 = vmatpush3.bf16.msra.mxu0 %v7907_v4  ;;  %5093 = vmatprep.subr.bf16.mxu1 %v7084_v6  ;;  %v7228_v4 = vcombine.high %v1733_v29, %v1741_v30  ;;  %v7922_v6 = vld [vmem:[%s10798_s7 + $0x150] sm:$0xff]   ;;  %v7941_v29 = vld [vmem:[%s10798_s7 + $0xa0] sm:$0xff]   ;;  %v7944_v30 = vld [vmem:[%s10798_s7 + $0xd8] sm:$0xff]  }
 0x38f   :  { %7459 = vmatprep.subr.bf16.mxu0 %v7908_v7  ;;  %v1717_v7 = vld [vmem:[%s10796_s5 + $0xcb8] sm:$0xff] }
 0x390   :  { %v7211_v15 = vcombine.low %v1717_v7, %v1725_v8 }
 0x391   :  { %5094 = vmatpush1.bf16.msra.mxu1 %v7083_v11  ;;  %v7923_v11 = vld [vmem:[%s10798_s7 + $0x110] sm:$0xff]  }
 0x392   :  { %7460 = vmatpush3.bf16.msra.mxu0 %v7909_v12  ;;  %5095 = vmatprep.subr.bf16.mxu1 %v7068_v54  ;;  %v7212_v12 = vcombine.high %v1717_v7, %v1725_v8  ;;  %v7924_v54 = vld [vmem:[%s10798_s7 + $0x148] sm:$0xff]   ;;  %v7947_v7 = vld [vmem:[%s10798_s7 + $0x218] sm:$0xff]   ;;  %v7950_v8 = vld [vmem:[%s10798_s7 + $0x250] sm:$0xff]  }
 0x393   :  { %7461 = vmatprep.subr.bf16.mxu0 %v7910_v13  ;;  %v1701_v13 = vld [vmem:[%s10796_s5 + $0xc38] sm:$0xff] }
 0x394   :  { %v7195_v62 = vcombine.low %v1701_v13, %v1709_v14 }
 0x395   :  { %5096 = vmatpush1.bf16.msra.mxu1 %v7067_v16  ;;  %v7925_v16 = vld [vmem:[%s10798_s7 + $0x108] sm:$0xff]  }
 0x396   :  { %7462 = vmatpush3.bf16.msra.mxu0 %v7911_v17  ;;  %5097 = vmatprep.subr.bf16.mxu1 %v7308_v18  ;;  %v7196_v17 = vcombine.high %v1701_v13, %v1709_v14  ;;  %v7926_v18 = vld [vmem:[%s10798_s7 + $0x140] sm:$0xff]   ;;  %v7954_v13 = vld [vmem:[%s10798_s7 + $0x248] sm:$0xff]  }
 0x397   :  { %7491 = vmatprep.subr.bf16.mxu0 %v7912_v22  ;;  %v7927_v22 = vld [vmem:[%s10798_s7 + $0x100] sm:$0xff]  }
 0x399   :  { %5098 = vmatpush2.bf16.msra.mxu1 %v7307_v56  ;;  %6218 = vmatmul.mubr.bf16.vlgmr.msra.gmra.mxu0 %v5138_v19  ;;  %v5126_v56 = vmax.f32 %v10035_v23, 0.0  ;;  %v5141_v23 = vpack.c.bf16 %v5125_v26, %v5125_v26  ;;  %v7959_v26 = vld [vmem:[%s10798_s7 + $0x200] sm:$0xff]  }
 0x39a   :  { %7492 = vmatpush3.bf16.msra.mxu0 %v7913_v48  ;;  %6297 = vmatprep.mubr.bf16.mxu0 %v5143_v51  ;;  %v10430_v48 = vld [vmem:[%s10797_s6 + $0x8] sm:$0xff] }
 0x39b   :  { %5099 = vmatprep.subr.bf16.mxu1 %v7292_v27  ;;  %7493 = vmatprep.subr.bf16.mxu0 %v7914_v35  ;;  %v1865_v19 = vrot.slane %v10430_v48, %v8433_v42  ;;  %v7932_v27 = vld [vmem:[%s10798_s7 + $0xf0] sm:$0xff]   ;;  %v7931_v35 = vld [vmem:[%s10798_s7 + $0x238] sm:$0xff]   ;;  %v5142_v37 = vpack.c.bf16 %v5126_v56, %v5126_v56 }
 0x39c   :  { %v7934_v42 = vld [vmem:[%s10798_s7 + $0x270] sm:$0xff]   ;;  %v7992_v56 = vld [vmem:[%s10798_s7 + $0x378] sm:$0xff]  }
 0x39d   :  { %5100 = vmatpush2.bf16.msra.mxu1 %v7291_v41  ;;  %v4831_v51 = vadd.f32 %v10253_v36, %v1865_v19  ;;  %v7935_v36 = vld [vmem:[%s10798_s7 + $0x230] sm:$0xff]  }
 0x39e   :  { %7494 = vmatpush3.bf16.msra.mxu0 %v7915_v55  ;;  %5101 = vmatprep.subr.bf16.mxu1 %v7276_v45  ;;  %v7933_v55 = vld [vmem:[%s10798_s7 + $0xb0] sm:$0xff]  }
 0x39f   :  { %7495 = vmatprep.subr.bf16.mxu0 %v7916_v28 }
 0x3a1   :  { %5102 = vmatpush2.bf16.msra.mxu1 %v7275_v49  ;;  %v7938_v49 = vld [vmem:[%s10798_s7 + $0x268] sm:$0xff]  }
 0x3a2   :  { %7496 = vmatpush3.bf16.msra.mxu0 %v7917_v50  ;;  %5103 = vmatprep.subr.bf16.mxu1 %v7260_v52 }
 0x3a3   :  { %7497 = vmatprep.subr.bf16.mxu0 %v7918_v53  ;;  %v7937_v53 = vld [vmem:[%s10798_s7 + $0xa8] sm:$0xff]  }
 0x3a5   :  { %5104 = vmatpush2.bf16.msra.mxu1 %v7259_v60 }
 0x3a6   :  { %7498 = vmatpush3.bf16.msra.mxu0 %v7919_v61  ;;  %5105 = vmatprep.subr.bf16.mxu1 %v7244_v63  ;;  %v7939_v63 = vld [vmem:[%s10798_s7 + $0x228] sm:$0xff]  }
 0x3a7   :  { %7499 = vmatprep.subr.bf16.mxu0 %v7920_v2  ;;  %v7942_v2 = vld [vmem:[%s10798_s7 + $0x260] sm:$0xff]  }
 0x3a9   :  { %5106 = vmatpush2.bf16.msra.mxu1 %v7243_v34  ;;  %v7943_v34 = vld [vmem:[%s10798_s7 + $0x220] sm:$0xff]  }
 0x3aa   :  { %7500 = vmatpush3.bf16.msra.mxu0 %v7921_v3  ;;  %5107 = vmatprep.subr.bf16.mxu1 %v7228_v4  ;;  %v7946_v3 = vld [vmem:[%s10798_s7 + $0x258] sm:$0xff]  }
 0x3ab   :  { %7501 = vmatprep.subr.bf16.mxu0 %v7922_v6  ;;  %v7945_v4 = vld [vmem:[%s10798_s7 + $0x98] sm:$0xff]   ;;  %v7948_v6 = vld [vmem:[%s10798_s7 + $0xd0] sm:$0xff]  }
 0x3ad   :  { %5108 = vmatpush2.bf16.msra.mxu1 %v7227_v10  ;;  %v7949_v10 = vld [vmem:[%s10798_s7 + $0x90] sm:$0xff]  }
 0x3ae   :  { %7502 = vmatpush3.bf16.msra.mxu0 %v7923_v11  ;;  %5109 = vmatprep.subr.bf16.mxu1 %v7212_v12  ;;  %v1861_v11 = vrot.slane %v10430_v48, %v8424_v39  ;;  %v7952_v12 = vld [vmem:[%s10798_s7 + $0xc8] sm:$0xff]  }
 0x3af   :  { %7503 = vmatprep.subr.bf16.mxu0 %v7924_v54  ;;  %v7951_v54 = vld [vmem:[%s10798_s7 + $0x210] sm:$0xff]   ;;  %v7953_v39 = vld [vmem:[%s10798_s7 + $0x88] sm:$0xff]  }
 0x3b0   :  { %v4829_v14 = vadd.f32 %v10244_v33, %v1861_v11  ;;  %v7957_v33 = vld [vmem:[%s10798_s7 + $0x80] sm:$0xff]   ;;  %v7977_v11 = vld [vmem:[%s10798_s7 + $0x2b8] sm:$0xff]  }
 0x3b1   :  { %5110 = vmatpush2.bf16.msra.mxu1 %v7211_v15  ;;  %v7956_v15 = vld [vmem:[%s10798_s7 + $0xc0] sm:$0xff]  }
 0x3b2   :  { %7504 = vmatpush3.bf16.msra.mxu0 %v7925_v16  ;;  %5111 = vmatprep.subr.bf16.mxu1 %v7196_v17  ;;  %v7955_v16 = vld [vmem:[%s10798_s7 + $0x208] sm:$0xff]  }
 0x3b3   :  { %7505 = vmatprep.subr.bf16.mxu0 %v7926_v18  ;;  %v7958_v18 = vld [vmem:[%s10798_s7 + $0x240] sm:$0xff]  }
 0x3b5   :  { %5112 = vmatpush2.bf16.msra.mxu1 %v7195_v62  ;;  %v5124_v62 = vmax.f32 %v9821_v32, 0.0  ;;  %v7961_v32 = vld [vmem:[%s10798_s7 + $0x1b8] sm:$0xff]  }
 0x3b6   :  { %7506 = vmatpush3.bf16.msra.mxu0 %v7927_v22  ;;  %7469 = vmatprep.subr.bf16.mxu1 %v7928_v5  ;;  %v7960_v22 = vld [vmem:[%s10798_s7 + $0x1f8] sm:$0xff]   ;;  %v5129_v5 = vmax.f32 %v10251_v31, 0.0  ;;  %v7962_v31 = vld [vmem:[%s10798_s7 + $0x1f0] sm:$0xff]  }
 0x3b7   :  { %7535 = vmatprep.subr.bf16.mxu0 %v7930_v44  ;;  %v5140_v19 = vpack.c.bf16 %v5124_v62, %v5124_v62 }
 0x3b8   :  { %v10443_v24 = vpop.f32.mrf.mxu1  ;;  %5114 = vmatmul.mubr.bf16.vlgmr.msra.gmra.mxu1 %v8989_v20  ;;  %v7936_v20 = vld [vmem:[%s10798_s7 + $0xe8] sm:$0xff]  }
 0x3b9   :  { %v10450_v41 = vpop.f32.mrf.mxu0  ;;  %7470 = vmatpush3.bf16.msra.mxu1 %v7929_v25  ;;  %6257 = vmatprep.mubr.bf16.mxu1 %v5141_v23  ;;  %v4870_v17 = vadd.f32 %v10443_v24, %v4829_v14  ;;  %v5145_v25 = vpack.c.bf16 %v5129_v5, %v5129_v5  ;;  %v7964_v24 = vld [vmem:[%s10798_s7 + $0x1e8] sm:$0xff]   ;;  %v7982_v5 = vld [vmem:[%s10798_s7 + $0x2e0] sm:$0xff]  }
 0x3ba   :  { %6298 = vmatmul.mubr.bf16.vlgmr.msra.gmra.mxu0 %v5142_v37  ;;  %v4871_v45 = vpop.f32.mrf.mxu1  ;;  %7471 = vmatprep.subr.bf16.mxu1 %v7932_v27  ;;  %v7993_v27 = vld [vmem:[%s10798_s7 + $0x338] sm:$0xff]   ;;  %v7963_v37 = vld [vmem:[%s10798_s7 + $0x1b0] sm:$0xff]  }
 0x3bb   :  { %v4872_v28 = vadd.f32 %v4871_v45, %v4831_v51  ;;  %7536 = vmatpush3.bf16.msra.mxu0 %v7931_v35  ;;  %v10458_v46 = vpop.f32.mrf.mxu0  ;;  %v5130_v44 = vmax.f32 %v4870_v17, 0.0  ;;  %v7994_v35 = vld [vmem:[%s10798_s7 + $0x370] sm:$0xff]   ;;  %v7996_v51 = vld [vmem:[%s10798_s7 + $0x368] sm:$0xff]   ;;  %v7966_v45 = vld [vmem:[%s10798_s7 + $0x1e0] sm:$0xff]  }
 0x3bc   :  { %v4873_v47 = vpop.f32.mrf.mxu1  ;;  %7537 = vmatprep.subr.bf16.mxu0 %v7934_v42  ;;  %v7995_v42 = vld [vmem:[%s10798_s7 + $0x330] sm:$0xff]  }
 0x3bd   :  { %v5131_v50 = vmax.f32 %v4872_v28, 0.0  ;;  %v4914_v52 = vpop.f32.mrf.mxu0  ;;  %7472 = vmatpush3.bf16.msra.mxu1 %v7933_v55  ;;  %v5146_v23 = vpack.c.bf16 %v5130_v44, %v5130_v44  ;;  %v7965_v55 = vld [vmem:[%s10798_s7 + $0x1a8] sm:$0xff]   ;;  %v7998_v28 = vld [vmem:[%s10798_s7 + $0x360] sm:$0xff]   ;;  %v7968_v47 = vld [vmem:[%s10798_s7 + $0x1d8] sm:$0xff]  }
 0x3be   :  { %v4874_v9 = vpop.f32.mrf.mxu1  ;;  %7473 = vmatprep.subr.bf16.mxu1 %v7936_v20  ;;  %v7997_v20 = vld [vmem:[%s10798_s7 + $0x328] sm:$0xff]   ;;  %v7969_v52 = vld [vmem:[%s10798_s7 + $0x198] sm:$0xff]  }
 0x3bf   :  { %v5147_v60 = vpack.c.bf16 %v5131_v50, %v5131_v50  ;;  %7538 = vmatpush3.bf16.msra.mxu0 %v7935_v36  ;;  %v4915_v61 = vpop.f32.mrf.mxu0  ;;  %v7967_v36 = vld [vmem:[%s10798_s7 + $0x1a0] sm:$0xff]   ;;  %v8000_v50 = vld [vmem:[%s10798_s7 + $0x358] sm:$0xff]  }
 0x3c0   :  { %7539 = vmatprep.subr.bf16.mxu0 %v7938_v49  ;;  %v7999_v49 = vld [vmem:[%s10798_s7 + $0x320] sm:$0xff]   ;;  %v8001_v9 = vld [vmem:[%s10798_s7 + $0x318] sm:$0xff]   ;;  %v7972_v61 = vld [vmem:[%s10798_s7 + $0x1c8] sm:$0xff]  }
 0x3c1   :  { %7474 = vmatpush3.bf16.msra.mxu1 %v7937_v53  ;;  %6377 = vmatprep.mubr.bf16.mxu0 %v5147_v60  ;;  %v7970_v53 = vld [vmem:[%s10798_s7 + $0x1d0] sm:$0xff]  }
 0x3c2   :  { %7475 = vmatprep.subr.bf16.mxu1 %v7940_v57  ;;  %v8002_v57 = vld [vmem:[%s10798_s7 + $0x350] sm:$0xff]  }
 0x3c3   :  { %7540 = vmatpush3.bf16.msra.mxu0 %v7939_v63  ;;  %v7971_v60 = vld [vmem:[%s10798_s7 + $0x190] sm:$0xff]  }
 0x3c4   :  { %7541 = vmatprep.subr.bf16.mxu0 %v7942_v2  ;;  %v8003_v63 = vld [vmem:[%s10798_s7 + $0x310] sm:$0xff]   ;;  %v8004_v2 = vld [vmem:[%s10798_s7 + $0x348] sm:$0xff]  }
 0x3c5   :  { %7476 = vmatpush3.bf16.msra.mxu1 %v7941_v29  ;;  %v7973_v29 = vld [vmem:[%s10798_s7 + $0x188] sm:$0xff]  }
 0x3c6   :  { %7477 = vmatprep.subr.bf16.mxu1 %v7944_v30  ;;  %v7974_v30 = vld [vmem:[%s10798_s7 + $0x1c0] sm:$0xff]  }
 0x3c7   :  { %7542 = vmatpush3.bf16.msra.mxu0 %v7943_v34  ;;  %v8005_v34 = vld [vmem:[%s10798_s7 + $0x308] sm:$0xff]  }
 0x3c8   :  { %7543 = vmatprep.subr.bf16.mxu0 %v7946_v3  ;;  %v8006_v3 = vld [vmem:[%s10798_s7 + $0x340] sm:$0xff]  }
 0x3c9   :  { %7478 = vmatpush3.bf16.msra.mxu1 %v7945_v4  ;;  %v7975_v4 = vld [vmem:[%s10798_s7 + $0x180] sm:$0xff]  }
 0x3ca   :  { %7479 = vmatprep.subr.bf16.mxu1 %v7948_v6  ;;  %v5128_v6 = vmax.f32 %v10242_v21, 0.0 }
 0x3cb   :  { %7544 = vmatpush3.bf16.msra.mxu0 %v7947_v7  ;;  %v7976_v7 = vld [vmem:[%s10798_s7 + $0x2f8] sm:$0xff]  }
 0x3cc   :  { %7545 = vmatprep.subr.bf16.mxu0 %v7950_v8  ;;  %v8007_v8 = vld [vmem:[%s10798_s7 + $0x300] sm:$0xff]   ;;  %v5144_v21 = vpack.c.bf16 %v5128_v6, %v5128_v6 }
 0x3cd   :  { %7480 = vmatpush3.bf16.msra.mxu1 %v7949_v10  ;;  %v1873_v10 = vrot.slane %v10430_v48, %v8436_v43  ;;  %v7979_v43 = vld [vmem:[%s10798_s7 + $0x2b0] sm:$0xff]  }
 0x3ce   :  { %7481 = vmatprep.subr.bf16.mxu1 %v7952_v12  ;;  %v7978_v12 = vld [vmem:[%s10798_s7 + $0x2f0] sm:$0xff]  }
 0x3cf   :  { %7546 = vmatpush3.bf16.msra.mxu0 %v7951_v54 }
 0x3d0   :  { %7547 = vmatprep.subr.bf16.mxu0 %v7954_v13  ;;  %v4913_v13 = vadd.f32 %v10458_v46, %v1873_v10  ;;  %v7981_v46 = vld [vmem:[%s10798_s7 + $0x2a8] sm:$0xff]  }
 0x3d1   :  { %7482 = vmatpush3.bf16.msra.mxu1 %v7953_v39 }
 0x3d2   :  { %7483 = vmatprep.subr.bf16.mxu1 %v7956_v15  ;;  %v7980_v15 = vld [vmem:[%s10798_s7 + $0x2e8] sm:$0xff]  }
 0x3d3   :  { %7548 = vmatpush3.bf16.msra.mxu0 %v7955_v16 }
 0x3d4   :  { %7549 = vmatprep.subr.bf16.mxu0 %v7958_v18 }
 0x3d5   :  { %7484 = vmatpush3.bf16.msra.mxu1 %v7957_v33 }
 0x3d6   :  { %7513 = vmatprep.subr.bf16.mxu1 %v7960_v22 }
 0x3d7   :  { %7550 = vmatpush3.bf16.msra.mxu0 %v7959_v26 }
 0x3d8   :  { %6258 = vmatmul.mubr.bf16.vlgmr.msra.gmra.mxu1 %v5140_v19  ;;  %7579 = vmatprep.subr.bf16.mxu0 %v7992_v56  ;;  %v7983_v56 = vld [vmem:[%s10798_s7 + $0x2a0] sm:$0xff]   ;;  %v7985_v19 = vld [vmem:[%s10798_s7 + $0x298] sm:$0xff]  }
 0x3d9   :  { %7514 = vmatpush3.bf16.msra.mxu1 %v7961_v32  ;;  %6337 = vmatprep.mubr.bf16.mxu1 %v5145_v25  ;;  %v7984_v32 = vld [vmem:[%s10798_s7 + $0x2d8] sm:$0xff]   ;;  %v1869_v25 = vrot.slane %v10430_v48, %v8427_v40  ;;  %v7990_v40 = vld [vmem:[%s10798_s7 + $0x2c0] sm:$0xff]  }
 0x3da   :  { %6378 = vmatmul.mubr.bf16.vlgmr.msra.gmra.mxu0 %v5146_v23  ;;  %7515 = vmatprep.subr.bf16.mxu1 %v7962_v31  ;;  %v7986_v31 = vld [vmem:[%s10798_s7 + $0x2d0] sm:$0xff]   ;;  %v7988_v23 = vld [vmem:[%s10798_s7 + $0x2c8] sm:$0xff]  }
 0x3db   :  { %7580 = vmatpush3.bf16.msra.mxu0 %v7993_v27  ;;  %v7987_v27 = vld [vmem:[%s10798_s7 + $0x290] sm:$0xff]  }
 0x3dc   :  { %7581 = vmatprep.subr.bf16.mxu0 %v7994_v35  ;;  %v4911_v35 = vadd.f32 %v10450_v41, %v1869_v25  ;;  %v8008_v41 = vld [vmem:[%s10798_s7 + $0x3f8] sm:$0xff]  }
 0x3dd   :  { %7516 = vmatpush3.bf16.msra.mxu1 %v7963_v37  ;;  %v7989_v37 = vld [vmem:[%s10798_s7 + $0x288] sm:$0xff]  }
 0x3de   :  { %7517 = vmatprep.subr.bf16.mxu1 %v7964_v24 }
 0x3df   :  { %7582 = vmatpush3.bf16.msra.mxu0 %v7995_v42  ;;  %v7991_v42 = vld [vmem:[%s10798_s7 + $0x280] sm:$0xff]  }
 0x3e0   :  { %7583 = vmatprep.subr.bf16.mxu0 %v7996_v51 }
 0x3e1   :  { %7518 = vmatpush3.bf16.msra.mxu1 %v7965_v55  ;;  %v8009_v55 = vld [vmem:[%s10798_s7 + $0x3b8] sm:$0xff]  }
 0x3e2   :  { %7519 = vmatprep.subr.bf16.mxu1 %v7966_v45 }
 0x3e3   :  { %7584 = vmatpush3.bf16.msra.mxu0 %v7997_v20  ;;  %v8010_v20 = vld [vmem:[%s10798_s7 + $0x3f0] sm:$0xff]  }
 0x3e4   :  { %7585 = vmatprep.subr.bf16.mxu0 %v7998_v28  ;;  %v8011_v28 = vld [vmem:[%s10798_s7 + $0x3b0] sm:$0xff]  }
 0x3e5   :  { %7520 = vmatpush3.bf16.msra.mxu1 %v7967_v36  ;;  %v8012_v36 = vld [vmem:[%s10798_s7 + $0x3e8] sm:$0xff]  }
 0x3e6   :  { %7521 = vmatprep.subr.bf16.mxu1 %v7968_v47  ;;  %v8013_v47 = vld [vmem:[%s10798_s7 + $0x3a8] sm:$0xff]  }
 0x3e7   :  { %7586 = vmatpush3.bf16.msra.mxu0 %v7999_v49  ;;  %v8014_v49 = vld [vmem:[%s10798_s7 + $0x3e0] sm:$0xff]  }
 0x3e8   :  { %7587 = vmatprep.subr.bf16.mxu0 %v8000_v50  ;;  %v8015_v50 = vld [vmem:[%s10798_s7 + $0x3a0] sm:$0xff]  }
 0x3e9   :  { %7522 = vmatpush3.bf16.msra.mxu1 %v7969_v52  ;;  %v8016_v52 = vld [vmem:[%s10798_s7 + $0x3d8] sm:$0xff]  }
 0x3ea   :  { %7523 = vmatprep.subr.bf16.mxu1 %v7970_v53  ;;  %v8017_v53 = vld [vmem:[%s10798_s7 + $0x398] sm:$0xff]  }
 0x3eb   :  { %7588 = vmatpush3.bf16.msra.mxu0 %v8001_v9  ;;  %v8018_v9 = vld [vmem:[%s10798_s7 + $0x3d0] sm:$0xff]  }
 0x3ec   :  { %7589 = vmatprep.subr.bf16.mxu0 %v8002_v57  ;;  %v8019_v57 = vld [vmem:[%s10798_s7 + $0x390] sm:$0xff]  }
 0x3ed   :  { %7524 = vmatpush3.bf16.msra.mxu1 %v7971_v60  ;;  %v8020_v60 = vld [vmem:[%s10798_s7 + $0x3c8] sm:$0xff]  }
 0x3ee   :  { %7525 = vmatprep.subr.bf16.mxu1 %v7972_v61  ;;  %v8021_v61 = vld [vmem:[%s10798_s7 + $0x388] sm:$0xff]  }
 0x3ef   :  { %7590 = vmatpush3.bf16.msra.mxu0 %v8003_v63  ;;  %v8022_v63 = vld [vmem:[%s10798_s7 + $0x3c0] sm:$0xff]  }
 0x3f0   :  { %7591 = vmatprep.subr.bf16.mxu0 %v8004_v2  ;;  %v8023_v2 = vld [vmem:[%s10798_s7 + $0x380] sm:$0xff]  }
 0x3f1   :  { %7526 = vmatpush3.bf16.msra.mxu1 %v7973_v29  ;;  %v1877_v29 = vrot.slane %v10430_v48, %v1844_v58 }
 0x3f2   :  { %7527 = vmatprep.subr.bf16.mxu1 %v7974_v30  ;;  %v1881_v30 = vrot.slane %v10430_v48, %v1848_v1 }
 0x3f3   :  { %7592 = vmatpush3.bf16.msra.mxu0 %v8005_v34 }
 0x3f4   :  { %7593 = vmatprep.subr.bf16.mxu0 %v8006_v3 }
 0x3f5   :  { %7528 = vmatpush3.bf16.msra.mxu1 %v7975_v4 }
 0x3f6   :  { %7557 = vmatprep.subr.bf16.mxu1 %v7976_v7 }
 0x3f7   :  { %7594 = vmatpush3.bf16.msra.mxu0 %v8007_v8 }
 0x3f8   :  { %v4951_v54 = vpop.f32.mrf.mxu1  ;;  %6338 = vmatmul.mubr.bf16.vlgmr.msra.gmra.mxu1 %v5144_v21 }
 0x3f9   :  { %v10647_v39 = vpop.f32.mrf.mxu0  ;;  %7558 = vmatpush3.bf16.msra.mxu1 %v7977_v11  ;;  %v4952_v24 = vadd.f32 %v4951_v54, %v4911_v35 }
 0x3fa   :  { %v4953_v14 = vpop.f32.mrf.mxu1  ;;  %7559 = vmatprep.subr.bf16.mxu1 %v7978_v12  ;;  %v4993_v34 = vadd.f32 %v10647_v39, %v1877_v29 }
 0x3fb   :  { %v4954_v16 = vadd.f32 %v4953_v14, %v4913_v13  ;;  %v10655_v17 = vpop.f32.mrf.mxu0  ;;  %v5132_v51 = vmax.f32 %v4952_v24, 0.0 }
 0x3fc   :  { %v4955_v18 = vpop.f32.mrf.mxu1  ;;  %v4995_v4 = vadd.f32 %v10655_v17, %v1881_v30 }
 0x3fd   :  { %v5133_v33 = vmax.f32 %v4954_v16, 0.0  ;;  %v4996_v62 = vpop.f32.mrf.mxu0  ;;  %7560 = vmatpush3.bf16.msra.mxu1 %v7979_v43  ;;  %v5148_v45 = vpack.c.bf16 %v5132_v51, %v5132_v51  ;;  %v8027_v51 = vld [vmem:[%s10800_s9 + $0x20] sm:$0xff]  }
 0x3fe   :  { %v4956_v22 = vpop.f32.mrf.mxu1  ;;  %7561 = vmatprep.subr.bf16.mxu1 %v7980_v15  ;;  %v1889_v62 = vrot.slane %v10430_v48, %v1856_v0  ;;  %v8056_v0 = vmov 0.0  }
 0x3ff   :  { %v5149_v26 = vpack.c.bf16 %v5133_v33, %v5133_v33  ;;  %v4997_v44 = vpop.f32.mrf.mxu0  ;;  %v1885_v33 = vrot.slane %v10430_v48, %v1852_v59  ;;  %7632 = vmatprep.subr.bf16.mxu0 %v8056_v0  ;;  %v8025_v48 = vld [vmem:[%s10800_s9 + $0x30] sm:$0xff]  }
 0x401   :  { %7562 = vmatpush3.bf16.msra.mxu1 %v7981_v46  ;;  %6417 = vmatprep.mubr.bf16.mxu1 %v5149_v26 }
 0x402   :  { %7563 = vmatprep.subr.bf16.mxu1 %v7982_v5 }
 0x405   :  { %7564 = vmatpush3.bf16.msra.mxu1 %v7983_v56 }
 0x406   :  { %7565 = vmatprep.subr.bf16.mxu1 %v7984_v32 }
 0x409   :  { %7566 = vmatpush3.bf16.msra.mxu1 %v7985_v19 }
 0x40a   :  { %7567 = vmatprep.subr.bf16.mxu1 %v7986_v31 }
 0x40d   :  { %7568 = vmatpush3.bf16.msra.mxu1 %v7987_v27 }
 0x40e   :  { %7569 = vmatprep.subr.bf16.mxu1 %v7988_v23 }
 0x411   :  { %7570 = vmatpush3.bf16.msra.mxu1 %v7989_v37 }
 0x412   :  { %7571 = vmatprep.subr.bf16.mxu1 %v7990_v40 }
 0x415   :  { %7572 = vmatpush3.bf16.msra.mxu1 %v7991_v42  ;;  %v8026_v42 = vld [vmem:[%s10800_s9 + $0x28] sm:$0xff]  }
 0x416   :  { %7601 = vmatprep.subr.bf16.mxu1 %v8008_v41  ;;  %v8028_v41 = vld [vmem:[%s10800_s9 + $0x18] sm:$0xff]  }
 0x418   :  { %6418 = vmatmul.mubr.bf16.vlgmr.msra.gmra.mxu1 %v5148_v45 }
 0x419   :  { %7602 = vmatpush3.bf16.msra.mxu1 %v8009_v55  ;;  %v7309_v55 = vld [vmem:[%s10799_s8] ss:$0 sm:$0xff] }
 0x41a   :  { %7603 = vmatprep.subr.bf16.mxu1 %v8010_v20 }
 0x41d   :  { %7604 = vmatpush3.bf16.msra.mxu1 %v8011_v28 }
 0x41e   :  { %7605 = vmatprep.subr.bf16.mxu1 %v8012_v36  ;;  %v8029_v36 = vld [vmem:[%s10800_s9 + $0x10] sm:$0xff]  }
 0x421   :  { %7606 = vmatpush3.bf16.msra.mxu1 %v8013_v47 }
 0x422   :  { %7607 = vmatprep.subr.bf16.mxu1 %v8014_v49 }
 0x425   :  { %7608 = vmatpush3.bf16.msra.mxu1 %v8015_v50 }
 0x426   :  { %7609 = vmatprep.subr.bf16.mxu1 %v8016_v52 }
 0x429   :  { %7610 = vmatpush3.bf16.msra.mxu1 %v8017_v53 }
 0x42a   :  { %7611 = vmatprep.subr.bf16.mxu1 %v8018_v9 }
 0x42d   :  { %7612 = vmatpush3.bf16.msra.mxu1 %v8019_v57 }
 0x42e   :  { %7613 = vmatprep.subr.bf16.mxu1 %v8020_v60 }
 0x431   :  { %7614 = vmatpush3.bf16.msra.mxu1 %v8021_v61 }
 0x432   :  { %7615 = vmatprep.subr.bf16.mxu1 %v8022_v63 }
 0x435   :  { %7616 = vmatpush3.bf16.msra.mxu1 %v8023_v2 }
 0x438   :  { %v5033_v3 = vpop.f32.mrf.mxu1 }
 0x439   :  { %v5034_v6 = vadd.f32 %v5033_v3, %v4993_v34  ;;  %v5074_v7 = vpop.f32.mrf.mxu0 }
 0x43a   :  { %v5035_v8 = vpop.f32.mrf.mxu1  ;;  %v5075_v46 = vadd.f32 %v5074_v7, %v1885_v33  ;;  %v8030_v7 = vld [vmem:[%s10800_s9 + $0x8] sm:$0xff]  }
 0x43b   :  { %v5036_v10 = vadd.f32 %v5035_v8, %v4995_v4  ;;  %v5076_v11 = vpop.f32.mrf.mxu0  ;;  %v5134_v21 = vmax.f32 %v5034_v6, 0.0  ;;  %v8031_v8 = vld [vmem:[%s10800_s9] sm:$0xff]   ;;  %s8058_s9 = smov [#allocation2]  }
 0x43c   :  { %v5037_v12 = vpop.f32.mrf.mxu1  ;;  %v5077_v5 = vadd.f32 %v5076_v11, %v1889_v62  ;;  %s6627_s29 = sshll.u32 %s8058_s9, 4  ;;  %s6628_s29 = int_to_ptr.vmem [resolvable:$true] %s6627_s29 }
 0x43d   :  { %v5135_v54 = vmax.f32 %v5036_v10, 0.0  ;;  %v5078_v13 = vpop.f32.mrf.mxu0  ;;  %v5150_v15 = vpack.c.bf16 %v5134_v21, %v5134_v21  ;;  %s8033_s4 = scalar_lea.vmem %s6628_s29, 128  ;;  %p8038_p1 = scmp.lt.s32.totalorder %s6628_s29, %s6628_s29 }
 0x43e   :  { %v5038_v58 = vpop.f32.mrf.mxu1  ;;  %p8034_p0 = scmp.ne.s32.totalorder %s6628_s29, %s8033_s4  ;;  %p8039_p2 = scmp.lt.s32.totalorder %s8033_s4, %s8033_s4 }
 0x43f   :  { %v5151_v43 = vpack.c.bf16 %v5135_v54, %v5135_v54  ;;  %v5079_v14 = vpop.f32.mrf.mxu0 }
 0x440   :  { %p8040_p3 = por %p8039_p2, %p8038_p1 }
 0x441   :  { %6457 = vmatprep.mubr.bf16.mxu0 %v5151_v43 }
 0x442   :  { %6458 = vmatmul.mubr.bf16.vlgmr.msra.gmra.mxu0 %v5150_v15  ;;  %p8041_p4 = pnand %p8040_p3, %p8034_p0 }
 0x443   :  { %7633 = vmatpush3.bf16.msra.mxu0 %v8024_v38  ;;  %7648 = vmatprep.mubr.msk.bf16.mxu0 %vm8057_vm0, %v8056_v0 }
 0x444   :  { %7634 = vmatprep.subr.bf16.mxu0 %v8056_v0 }
 0x447   :  { %7635 = vmatpush3.bf16.msra.mxu0 %v8025_v48 }
 0x448   :  { %7636 = vmatprep.subr.bf16.mxu0 %v8056_v0 }
 0x44b   :  { %7637 = vmatpush3.bf16.msra.mxu0 %v8026_v42 }
 0x44c   :  { %7638 = vmatprep.subr.bf16.mxu0 %v8056_v0 }
 0x44f   :  { %7639 = vmatpush3.bf16.msra.mxu0 %v8027_v51 }
 0x450   :  { %7640 = vmatprep.subr.bf16.mxu0 %v8056_v0 }
 0x453   :  { %7641 = vmatpush3.bf16.msra.mxu0 %v8028_v41 }
 0x454   :  { %7642 = vmatprep.subr.bf16.mxu0 %v8056_v0 }
 0x457   :  { %7643 = vmatpush3.bf16.msra.mxu0 %v8029_v36 }
 0x458   :  { %7644 = vmatprep.subr.bf16.mxu0 %v8056_v0 }
 0x459   :  { %v7463_v1 = vpop.f32.mrf.mxu0 }
 0x45b   :  { %v7464_v39 = vpop.f32.mrf.mxu0  ;;  %7645 = vmatpush3.bf16.msra.mxu0 %v8030_v7 }
 0x45c   :  { %v7465_v16 = vadd.f32 %v7464_v39, %v7463_v1  ;;  %7646 = vmatprep.subr.bf16.mxu0 %v8056_v0 }
 0x45d   :  { %v7466_v18 = vpop.f32.mrf.mxu0 }
 0x45e   :  { %v6220_v47 = vadd.f32 %v7465_v16, %v7309_v55 }
 0x45f   :  { %v7467_v17 = vpop.f32.mrf.mxu0  ;;  %7647 = vmatpush3.bf16.msra.mxu0 %v8031_v8 }
 0x478   :  { %v5115_v22 = vpop.f32.mrf.mxu1 }
 0x479   :  { %v5116_v26 = vadd.f32 %v5115_v22, %v5075_v46 }
 0x47a   :  { %v7507_v44 = vpop.f32.mrf.mxu0  ;;  %v5117_v56 = vpop.f32.mrf.mxu1 }
 0x47b   :  { %v5118_v32 = vadd.f32 %v5117_v56, %v5077_v5  ;;  %v5136_v19 = vmax.f32 %v5116_v26, 0.0 }
 0x47c   :  { %v7508_v31 = vpop.f32.mrf.mxu0  ;;  %v5119_v25 = vpop.f32.mrf.mxu1 }
 0x47d   :  { %v5137_v27 = vmax.f32 %v5118_v32, 0.0  ;;  %v7509_v23 = vadd.f32 %v7508_v31, %v7507_v44  ;;  %v5152_v59 = vpack.c.bf16 %v5136_v19, %v5136_v19 }
 0x47e   :  { %v7510_v35 = vpop.f32.mrf.mxu0  ;;  %v5120_v37 = vpop.f32.mrf.mxu1 }
 0x47f   :  { %v5153_v24 = vpack.c.bf16 %v5137_v27, %v5137_v27 }
 0x480   :  { %v7511_v40 = vpop.f32.mrf.mxu0 }
 0x481   :  { %6497 = vmatprep.mubr.bf16.mxu1 %v5153_v24 }
 0x482   :  { %6498 = vmatmul.mubr.bf16.vlgmr.msra.gmra.mxu1 %v5152_v59 }
 0x498   :  { %v7485_v45 = vpop.f32.mrf.mxu1 }
 0x49a   :  { %v7551_v20 = vpop.f32.mrf.mxu0  ;;  %v7486_v28 = vpop.f32.mrf.mxu1 }
 0x49b   :  { %v7487_v49 = vadd.f32 %v7486_v28, %v7485_v45 }
 0x49c   :  { %v7552_v50 = vpop.f32.mrf.mxu0  ;;  %v7488_v52 = vpop.f32.mrf.mxu1 }
 0x49d   :  { %v6260_v53 = vadd.f32 %v7487_v49, %v6220_v47  ;;  %v7553_v9 = vadd.f32 %v7552_v50, %v7551_v20 }
 0x49e   :  { %v7554_v57 = vpop.f32.mrf.mxu0  ;;  %v7489_v60 = vpop.f32.mrf.mxu1 }
 0x49f   :  { %v6300_v61 = vadd.f32 %v7509_v23, %v6260_v53 }
 0x4a0   :  { %v7555_v63 = vpop.f32.mrf.mxu0 }
 0x4b8   :  { %v7529_v2 = vpop.f32.mrf.mxu1 }
 0x4ba   :  { %v7530_v29 = vpop.f32.mrf.mxu1 }
 0x4bb   :  { %v7531_v30 = vadd.f32 %v7530_v29, %v7529_v2 }
 0x4bc   :  { %v7532_v34 = vpop.f32.mrf.mxu1 }
 0x4bd   :  { %v6340_v3 = vadd.f32 %v7531_v30, %v6300_v61 }
 0x4be   :  { %v7533_v4 = vpop.f32.mrf.mxu1 }
 0x4bf   :  { %v6380_v6 = vadd.f32 %v7553_v9, %v6340_v3 }
 0x4d8   :  { %v7573_v10 = vpop.f32.mrf.mxu1 }
 0x4da   :  { %v7574_v11 = vpop.f32.mrf.mxu1 }
 0x4db   :  { %v7575_v21 = vadd.f32 %v7574_v11, %v7573_v10 }
 0x4dc   :  { %v7576_v12 = vpop.f32.mrf.mxu1 }
 0x4dd   :  { %v6420_v54 = vadd.f32 %v7575_v21, %v6380_v6 }
 0x4de   :  { %v7577_v13 = vpop.f32.mrf.mxu1 }
 0x502   :  { %v7595_v58 = vpop.f32.mrf.mxu0 }
 0x504   :  { %v7596_v43 = vpop.f32.mrf.mxu0 }
 0x505   :  { %v7597_v14 = vadd.f32 %v7596_v43, %v7595_v58 }
 0x506   :  { %v7598_v15 = vpop.f32.mrf.mxu0 }
 0x507   :  { %v6460_v1 = vadd.f32 %v7597_v14, %v6420_v54 }
 0x508   :  { %v7599_v39 = vpop.f32.mrf.mxu0 }
 0x542   :  { %v7617_v16 = vpop.f32.mrf.mxu1 }
 0x544   :  { %v7618_v18 = vpop.f32.mrf.mxu1 }
 0x545   :  { %v7619_v17 = vadd.f32 %v7618_v18, %v7617_v16 }
 0x546   :  { %v7620_v33 = vpop.f32.mrf.mxu1 }
 0x547   :  { %v6500_v62 = vadd.f32 %v7619_v17, %v6460_v1 }
 0x548   :  { %v7621_v46 = vpop.f32.mrf.mxu1 }
 0x549   :  { %v6505_v22 = vpack.c.bf16 %v6500_v62, %v6500_v62  ;;  %6617 = vst [vmem:[#allocation2] sm:$0xff] %v6500_v62 }
 0x54b   :  { %7649 = vmatmul.mubr.bf16.vlgmr.msra.gmra.mxu0 %v6505_v22 }
 0x54c   :  { %8044 = shalt.err (!%p8041_p4)
}
 0x54d   :  { %6630 = dma.vmem_to_hbm [thread:$0]  %s6628_s29, 128, %s10803_s12, [#allocation3]   ;;  %v7438_v5 = vld [vmem:[%s10801_s10] ss:$0 sm:$0xff] }
 0x60b   :  { %v6611_v26 = vpop.f32.mrf.mxu0 }
 0x60c   :  { %v6612_v44 = vadd.f32 %v7438_v5, %v6611_v26 }
 0x60d   :  { %v7650_v56 = vpop.f32.mrf.mxu0 }
 0x60e   :  { %6618 = vst [vmem:[%s10802_s11] sm:$0xff] %v6612_v44 }
 0x60f   :  { %v6614_v32 = vpop.f32.mrf.mxu0 }
 0x611   :  { %v7651_v19 = vpop.f32.mrf.mxu0 }
 0x612   :  { %8053 = dma.done.wait [#allocation3], 128  }
 0x613   :  { %8054 = vsyncadd [#allocation3], 4294967168 }
 0x614   :  { %6636 = vsyncpa [#allocation3], 1 }

</bundles_post_ra>
